<compile_context>
chip_gen: v7x
topology: tpu7x:2x2x1
jax: 0.10.0
libtpu: 0.0.40
codegen_flags: <defaults>
</compile_context>

<pallas_src>
import math

import numpy as np
import jax
import jax.numpy as jnp
from jax.experimental import pallas as pl
from jax.experimental.pallas import tpu as pltpu

# --- config (mirrors SelfAttention(dim=32, head_dim=16, sizes=(4, 8))) ---
DIM = 32
HEAD_DIM = 16
SIZES = (4, 8)
N_HEADS = DIM // HEAD_DIM
COND_DIM = 256
ROT_D = HEAD_DIM // 8 * 3                 # rotary dim d in _apply_rotary_emb_inplace
LENGTHS = tuple(s * s for s in SIZES)
SEQ = sum(LENGTHS)                        # 16 + 64 = 80
LN_EPS = 1e-5
NEG_INF = -1e30
SCALE = 1.0 / math.sqrt(HEAD_DIM)         # 0.25 exactly -> folding it is lossless


# ----------------------- buffers (numpy, mirror the torch helpers) -----------------------
def make_axial_pos(h, w):
    h_pos = np.linspace(-1.0, 1.0, h + 1)
    w_pos = np.linspace(-1.0, 1.0, w + 1)
    h_pos = (h_pos[:-1] + h_pos[1:]) / 2
    w_pos = (w_pos[:-1] + w_pos[1:]) / 2
    hh, ww = np.meshgrid(h_pos, w_pos, indexing="ij")
    return np.stack([hh, ww], axis=-1).reshape(h * w, 2)


def make_axial_pos_multiscale(sizes):
    d = len(sizes)
    poses = []
    for i, size in enumerate(sizes):
        pos_ax = make_axial_pos(size, size)
        pos_rest = np.full((pos_ax.shape[0], 1), i / (d - 1))
        poses.append(np.concatenate([pos_ax, pos_rest], axis=-1))
    return np.concatenate(poses, axis=0)


def make_block_causal_mask(lengths):
    n = sum(lengths)
    mask = np.zeros((n, n), dtype=bool)
    i = 0
    for length in lengths:
        mask[i:, i:i + length] = True
        i += length
    return mask


def make_theta():
    log_min, log_max = math.log(math.pi), math.log(10 * math.pi)
    n_f = HEAD_DIM // 8 * N_HEADS
    freqs = np.exp(np.linspace(log_min, log_max, n_f + 1)[:-1])
    freqs = freqs.reshape(HEAD_DIM // 8, N_HEADS).T          # (H, HEAD_DIM//8)
    pos = make_axial_pos_multiscale(SIZES)                   # (SEQ, 3)
    theta_h = pos[:, None, 0:1] * freqs
    theta_w = pos[:, None, 1:2] * freqs
    theta_d = pos[:, None, 2:3] * freqs
    return np.concatenate([theta_h, theta_w, theta_d], axis=-1)  # (SEQ, H, ROT_D)


# ----------------------- host-side constant packing (module buffers) ----------------------
def _build_rotary_trig5():
    """(SEQ, 5*DIM) lane-dense slab [cos | sin_signed | cos | sin_signed | ones],
    head-major over each DIM-wide group, matching [q | q_perm | k | k_perm | v]."""
    theta = make_theta().astype(np.float32)                  # (SEQ, H, ROT_D)
    cos, sin = np.cos(theta), np.sin(theta)
    rest = HEAD_DIM - 2 * ROT_D
    cos_heads, sin_heads = [], []
    for h in range(N_HEADS):
        c, s = cos[:, h, :], sin[:, h, :]
        cos_heads.append(np.concatenate([c, c, np.ones((SEQ, rest), np.float32)], axis=-1))
        sin_heads.append(np.concatenate([-s, s, np.zeros((SEQ, rest), np.float32)], axis=-1))
    cosf = np.concatenate(cos_heads, axis=-1)                # (SEQ, DIM)
    sinf = np.concatenate(sin_heads, axis=-1)                # (SEQ, DIM)
    ones = np.ones((SEQ, DIM), np.float32)
    return np.concatenate([cosf, sinf, cosf, sinf, ones], axis=-1)   # (SEQ, 160)


def _build_perm_index():
    """Per-head rotary 'partner column' index (exact gather; no matmul)."""
    idx = np.arange(DIM)
    for h in range(N_HEADS):
        base = h * HEAD_DIM
        for j in range(ROT_D):
            idx[base + j] = base + j + ROT_D          # partner of x1 is x2
            idx[base + j + ROT_D] = base + j          # partner of x2 is x1
        # rest columns map to themselves (their sin factor is 0, value irrelevant)
    return idx


TRIG5 = jnp.asarray(_build_rotary_trig5())                                      # (SEQ, 160)
PERM_IDX = _build_perm_index()                                                  # (32,) int
MASK_BIAS = jnp.asarray(
    np.where(make_block_causal_mask(LENGTHS), 0.0, NEG_INF).astype(np.float32))  # (SEQ, SEQ)


# ----------------------------------- Pallas kernel ---------------------------------------
def self_attention_kernel(x_ref, mod_ref, wproj_ref, bproj_ref,
                          outw_ref, outb_ref, trig_ref, maskb_ref, o_ref):
    Bt = x_ref.shape[0]
    x = x_ref[...]                                   # (Bt, SEQ, DIM) -- skip connection

    # AdaLN with precomputed per-batch modulation; the "+1" is already folded into w_mod.
    mod = mod_ref[...]                               # (Bt, 1, 2*DIM)
    w_mod = mod[..., :DIM]
    b_mod = mod[..., DIM:]
    mean = jnp.mean(x, axis=-1, keepdims=True)
    cen = x - mean
    var = jnp.mean(cen * cen, axis=-1, keepdims=True)
    h = (cen * jax.lax.rsqrt(var + LN_EPS)) * w_mod + b_mod     # (Bt, SEQ, DIM)

    # Single lane-dense fused projection: [q*scale | q_perm*scale | k | k_perm | v].
    # (default matmul precision: single-pass bf16 inputs, f32 accumulate)
    hf = h.reshape(Bt * SEQ, DIM)
    proj = jnp.dot(hf, wproj_ref[...], preferred_element_type=jnp.float32) + bproj_ref[...]

    # Rotary: one full-width lane-dense multiply over the whole 160-wide slab
    # ([cos|sin|cos|sin|ones]) followed by two sliced adds.  Scale already folded into q.
    t = proj.reshape(Bt, SEQ, 5 * DIM) * trig_ref[...]
    q = t[..., 0 * DIM:1 * DIM] + t[..., 1 * DIM:2 * DIM]        # (Bt, SEQ, DIM), pre-scaled
    k = t[..., 2 * DIM:3 * DIM] + t[..., 3 * DIM:4 * DIM]
    v = t[..., 4 * DIM:5 * DIM]

    mask_bias = maskb_ref[...]                       # (SEQ, SEQ) additive 0 / -1e30
    outw = outw_ref[...]                             # (DIM, DIM)

    # Per-head attention over the whole fused batch (batched einsums), with the
    # out-projection folded per head -> no in-kernel concatenates.
    acc = None
    for hh in range(N_HEADS):
        sl = slice(hh * HEAD_DIM, (hh + 1) * HEAD_DIM)
        qh, kh, vh = q[..., sl], k[..., sl], v[..., sl]
        s = jnp.einsum('bqd,bkd->bqk', qh, kh,
                       preferred_element_type=jnp.float32) + mask_bias
        m = jnp.max(s, axis=-1, keepdims=True)
        p = jnp.exp(s - m)
        denom = jnp.sum(p, axis=-1, keepdims=True)
        oh = jnp.einsum('bqk,bkd->bqd', p, vh, preferred_element_type=jnp.float32)
        # Deferred softmax normalization: normalize the (SEQ, head_dim) output, not the
        # (SEQ, SEQ) probability matrix.  EUP reciprocal keeps this off the VPU divide path.
        oh = oh * pl.reciprocal(denom, approx=True)
        contrib = jnp.dot(oh.reshape(Bt * SEQ, HEAD_DIM), outw[sl, :],
                          preferred_element_type=jnp.float32)    # (Bt*SEQ, DIM)
        acc = contrib if acc is None else acc + contrib

    out = acc + outb_ref[...]                        # (Bt*SEQ, DIM)
    o_ref[...] = out.reshape(Bt, SEQ, DIM) + x


# ------------------------------------- wrapper --------------------------------------------
def _default_batch_block(B):
    # Single-TC chips (v5e/v6e): fuse the whole batch into one grid step — the grid is a
    # purely serial loop there, so extra steps are pure overhead.
    # v7x has 2 TensorCores/chip: split the batch 2-way so the "parallel" axis can be
    # sharded across cores.  (If an xprof trace shows both steps on one core, switch the
    # batch axis to pltpu.CORE_PARALLEL / pl.core_map for explicit cross-core sharding.)
    try:
        kind = jax.devices()[0].device_kind.lower()
    except Exception:
        kind = ""
    if "v7" in kind and B >= 2 and B % 2 == 0:
        return B // 2
    return B


def self_attention_forward(x, cond, ada_w, ada_b, qkv_w, qkv_b, out_w, out_b,
                           *, batch_block=None):
    """Full module forward. Weights in 'torch layout' stored as (in, out)."""
    B = x.shape[0]
    if batch_block is None:
        batch_block = _default_batch_block(B)
    assert B % batch_block == 0
    Bt = batch_block
    grid = (B // Bt,)

    # AdaLN cond projection hoisted out of the kernel (tiny M=1 matmul, done once by XLA);
    # the "+1" of AdaLN is folded into the weight half here (exact).
    mod = cond @ ada_w + ada_b                                           # (B, 1, 2*DIM)
    mod = jnp.concatenate([mod[..., :DIM] + 1.0, mod[..., DIM:]], axis=-1)

    # Fold the rotary partner permutation (exact column gather) and the 1/sqrt(head_dim)
    # softmax scale (exact: 0.25) into one fused QKV weight slab.
    wq, wk, wv = qkv_w[:, :DIM], qkv_w[:, DIM:2 * DIM], qkv_w[:, 2 * DIM:]
    bq, bk, bv = qkv_b[:DIM], qkv_b[DIM:2 * DIM], qkv_b[2 * DIM:]
    wq_s, bq_s = wq * SCALE, bq * SCALE
    wproj = jnp.concatenate(
        [wq_s, wq_s[:, PERM_IDX], wk, wk[:, PERM_IDX], wv], axis=-1)     # (32, 160)
    bproj = jnp.concatenate(
        [bq_s, bq_s[PERM_IDX], bk, bk[PERM_IDX], bv]).reshape(1, 5 * DIM)
    ob2 = out_b.reshape(1, DIM)

    # VMEM footprint per step is ~0.2 MB even on v7x's 64 MiB — no tiling pressure; the
    # kernel is overhead/layout-bound, so the biggest block (whole batch) is best.
    return pl.pallas_call(
        self_attention_kernel,
        out_shape=jax.ShapeDtypeStruct((B, SEQ, DIM), jnp.float32),
        grid=grid,
        in_specs=[
            pl.BlockSpec((Bt, SEQ, DIM), lambda g: (g, 0, 0)),
            pl.BlockSpec((Bt, 1, 2 * DIM), lambda g: (g, 0, 0)),
            pl.BlockSpec(wproj.shape, lambda g: (0, 0)),
            pl.BlockSpec(bproj.shape, lambda g: (0, 0)),
            pl.BlockSpec(out_w.shape, lambda g: (0, 0)),
            pl.BlockSpec(ob2.shape, lambda g: (0, 0)),
            pl.BlockSpec(TRIG5.shape, lambda g: (0, 0)),
            pl.BlockSpec(MASK_BIAS.shape, lambda g: (0, 0)),
        ],
        out_specs=pl.BlockSpec((Bt, SEQ, DIM), lambda g: (g, 0, 0)),
        compiler_params=pltpu.CompilerParams(dimension_semantics=("parallel",)),
    )(x, mod, wproj, bproj, out_w, ob2, TRIG5, MASK_BIAS)


# ------------------------------ pure-JAX reference (torch semantics) ----------------------
def reference(x, cond, ada_w, ada_b, qkv_w, qkv_b, out_w, out_b, theta, mask):
    B, N, D = x.shape
    wb = cond @ ada_w + ada_b                          # (B,1,2D)
    w, bb = wb[..., :D], wb[..., D:]
    mean = x.mean(-1, keepdims=True)
    var = jnp.mean((x - mean) ** 2, -1, keepdims=True)
    xn = (x - mean) / jnp.sqrt(var + LN_EPS)
    h = xn * (w + 1.0) + bb
    qkv = h @ qkv_w + qkv_b                            # (B,N,3D)
    qkv = qkv.reshape(B, N, 3, N_HEADS, HEAD_DIM).transpose(0, 3, 2, 1, 4)  # (B,H,3,N,hd)
    q, k, v = qkv[:, :, 0], qkv[:, :, 1], qkv[:, :, 2]
    th = jnp.transpose(theta[:N], (1, 0, 2))[None]     # (1,H,N,d)
    cos, sin = jnp.cos(th), jnp.sin(th)

    def rope(t):
        x1, x2, rest = t[..., :ROT_D], t[..., ROT_D:2 * ROT_D], t[..., 2 * ROT_D:]
        return jnp.concatenate([x1 * cos - x2 * sin, x2 * cos + x1 * sin, rest], -1)

    q, k = rope(q), rope(k)
    s = jnp.einsum('bhqd,bhkd->bhqk', q, k) / math.sqrt(HEAD_DIM)
    s = jnp.where(mask[None, None], s, -jnp.inf)
    p = jax.nn.softmax(s, -1)
    o = jnp.einsum('bhqk,bhkd->bhqd', p, v)
    o = o.transpose(0, 2, 1, 3).reshape(B, N, D)
    return o @ out_w + out_b + x


# --------------------------------------- main ---------------------------------------------
if __name__ == "__main__":
    B = 4
    key = jax.random.PRNGKey(0)
    keys = jax.random.split(key, 8)

    x = jax.random.normal(keys[0], (B, SEQ, DIM), jnp.float32)
    cond = jax.random.normal(keys[1], (B, 1, COND_DIM), jnp.float32)

    # Parameters in "torch layout" (weights stored as (in, out)).
    # NOTE: the module zero-inits the AdaLN proj; we use small deterministic random values
    # instead so the modulation path is actually exercised (forward semantics identical).
    ada_w = 0.02 * jax.random.normal(keys[2], (COND_DIM, 2 * DIM), jnp.float32)
    ada_b = 0.02 * jax.random.normal(keys[3], (2 * DIM,), jnp.float32)
    qkv_w = 0.05 * jax.random.normal(keys[4], (DIM, 3 * DIM), jnp.float32)
    qkv_b = 0.05 * jax.random.normal(keys[5], (3 * DIM,), jnp.float32)
    out_w = 0.05 * jax.random.normal(keys[6], (DIM, DIM), jnp.float32)
    out_b = 0.05 * jax.random.normal(keys[7], (DIM,), jnp.float32)

    out = jax.jit(self_attention_forward)(x, cond, ada_w, ada_b, qkv_w, qkv_b, out_w, out_b)
    out = jax.block_until_ready(out)

    theta = jnp.asarray(make_theta(), jnp.float32)          # (SEQ, H, ROT_D)
    mask = jnp.asarray(make_block_causal_mask(LENGTHS))     # (SEQ, SEQ) bool
    ref = reference(x, cond, ada_w, ada_b, qkv_w, qkv_b, out_w, out_b, theta, mask)
    np.testing.assert_allclose(np.asarray(out), np.asarray(ref), rtol=2e-3, atol=2e-3)
    print("KERNEL_OK")
</pallas_src>

<mosaic_0001>
module attributes {stable_mosaic.version = 11 : i64} {
  func.func @self_attention_kernel(%arg0: i32, %arg1: memref<4x80x32xf32, #tpu.memory_space<vmem>>, %arg2: memref<4x1x64xf32, #tpu.memory_space<vmem>>, %arg3: memref<32x160xf32, #tpu.memory_space<vmem>>, %arg4: memref<1x160xf32, #tpu.memory_space<vmem>>, %arg5: memref<32x32xf32, #tpu.memory_space<vmem>>, %arg6: memref<1x32xf32, #tpu.memory_space<vmem>>, %arg7: memref<80x160xf32, #tpu.memory_space<vmem>>, %arg8: memref<80x80xf32, #tpu.memory_space<vmem>>, %arg9: memref<4x80x32xf32, #tpu.memory_space<vmem>>) attributes {dimension_semantics = [#tpu.dimension_semantics<parallel>], iteration_bounds = array<i64: 1>, scalar_prefetch = 0 : i64, scratch_operands = 0 : i64, tpu.core_type = #tpu.core_type<tc>, window_params = [{transform_indices = @transform_0, window_bounds = array<i64: 4, 80, 32>}, {transform_indices = @transform_1, window_bounds = array<i64: 4, 1, 64>}, {pipeline_mode = #tpu.pipeline_mode<synchronous>, transform_indices = @transform_2, window_bounds = array<i64: 32, 160>}, {pipeline_mode = #tpu.pipeline_mode<synchronous>, transform_indices = @transform_3, window_bounds = array<i64: 1, 160>}, {pipeline_mode = #tpu.pipeline_mode<synchronous>, transform_indices = @transform_4, window_bounds = array<i64: 32, 32>}, {pipeline_mode = #tpu.pipeline_mode<synchronous>, transform_indices = @transform_5, window_bounds = array<i64: 1, 32>}, {pipeline_mode = #tpu.pipeline_mode<synchronous>, transform_indices = @transform_6, window_bounds = array<i64: 80, 160>}, {pipeline_mode = #tpu.pipeline_mode<synchronous>, transform_indices = @transform_7, window_bounds = array<i64: 80, 80>}, {transform_indices = @transform_8, window_bounds = array<i64: 4, 80, 32>}]} {
    %c0 = arith.constant 0 : index
    %c0_0 = arith.constant 0 : index
    %c0_1 = arith.constant 0 : index
    %0 = vector.load %arg1[%c0, %c0_0, %c0_1] : memref<4x80x32xf32, #tpu.memory_space<vmem>>, vector<4x80x32xf32>
    %c0_2 = arith.constant 0 : index
    %c0_3 = arith.constant 0 : index
    %c0_4 = arith.constant 0 : index
    %1 = vector.load %arg2[%c0_2, %c0_3, %c0_4] : memref<4x1x64xf32, #tpu.memory_space<vmem>>, vector<4x1x64xf32>
    %2 = vector.extract_strided_slice %1 {offsets = [0, 0, 0], sizes = [4, 1, 32], strides = [1, 1, 1]} : vector<4x1x64xf32> to vector<4x1x32xf32>
    %3 = vector.extract_strided_slice %1 {offsets = [0, 0, 32], sizes = [4, 1, 32], strides = [1, 1, 1]} : vector<4x1x64xf32> to vector<4x1x32xf32>
    %cst = arith.constant dense<0.000000e+00> : vector<4x80xf32>
    %4 = vector.multi_reduction <add>, %0, %cst [2] : vector<4x80x32xf32> to vector<4x80xf32>
    %5 = vector.shape_cast %4 : vector<4x80xf32> to vector<4x80x1xf32>
    %cst_5 = arith.constant 3.200000e+01 : f32
    %6 = vector.broadcast %cst_5 : f32 to vector<4x80x1xf32>
    %7 = arith.divf %5, %6 : vector<4x80x1xf32>
    %8 = vector.broadcast %7 : vector<4x80x1xf32> to vector<4x80x32xf32>
    %9 = arith.subf %0, %8 : vector<4x80x32xf32>
    %10 = arith.mulf %9, %9 : vector<4x80x32xf32>
    %cst_6 = arith.constant dense<0.000000e+00> : vector<4x80xf32>
    %11 = vector.multi_reduction <add>, %10, %cst_6 [2] : vector<4x80x32xf32> to vector<4x80xf32>
    %12 = vector.shape_cast %11 : vector<4x80xf32> to vector<4x80x1xf32>
    %cst_7 = arith.constant 3.200000e+01 : f32
    %13 = vector.broadcast %cst_7 : f32 to vector<4x80x1xf32>
    %14 = arith.divf %12, %13 : vector<4x80x1xf32>
    %cst_8 = arith.constant 9.99999974E-6 : f32
    %15 = vector.broadcast %cst_8 : f32 to vector<4x80x1xf32>
    %16 = arith.addf %14, %15 : vector<4x80x1xf32>
    %17 = math.rsqrt %16 : vector<4x80x1xf32>
    %18 = vector.broadcast %17 : vector<4x80x1xf32> to vector<4x80x32xf32>
    %19 = arith.mulf %9, %18 : vector<4x80x32xf32>
    %20 = vector.broadcast %2 : vector<4x1x32xf32> to vector<4x80x32xf32>
    %21 = arith.mulf %19, %20 : vector<4x80x32xf32>
    %22 = vector.broadcast %3 : vector<4x1x32xf32> to vector<4x80x32xf32>
    %23 = arith.addf %21, %22 : vector<4x80x32xf32>
    %24 = vector.shape_cast %23 : vector<4x80x32xf32> to vector<320x32xf32>
    %c0_9 = arith.constant 0 : index
    %c0_10 = arith.constant 0 : index
    %25 = vector.load %arg3[%c0_9, %c0_10] : memref<32x160xf32, #tpu.memory_space<vmem>>, vector<32x160xf32>
    %cst_11 = arith.constant dense<0.000000e+00> : vector<320x160xf32>
    %26 = tpu.matmul %24, %25, %cst_11 {dimension_numbers = #tpu.dot_dimension_numbers<[1], [0], [0], [1], [0, 0, 1, 1], [], []>} : vector<320x32xf32>, vector<32x160xf32>, vector<320x160xf32> -> vector<320x160xf32>
    %c0_12 = arith.constant 0 : index
    %c0_13 = arith.constant 0 : index
    %27 = vector.load %arg4[%c0_12, %c0_13] : memref<1x160xf32, #tpu.memory_space<vmem>>, vector<1x160xf32>
    %28 = vector.broadcast %27 : vector<1x160xf32> to vector<320x160xf32>
    %29 = arith.addf %26, %28 : vector<320x160xf32>
    %30 = vector.shape_cast %29 : vector<320x160xf32> to vector<4x80x160xf32>
    %c0_14 = arith.constant 0 : index
    %c0_15 = arith.constant 0 : index
    %31 = vector.load %arg7[%c0_14, %c0_15] : memref<80x160xf32, #tpu.memory_space<vmem>>, vector<80x160xf32>
    %32 = vector.shape_cast %31 : vector<80x160xf32> to vector<1x80x160xf32>
    %33 = vector.broadcast %32 : vector<1x80x160xf32> to vector<4x80x160xf32>
    %34 = arith.mulf %30, %33 : vector<4x80x160xf32>
    %35 = vector.extract_strided_slice %34 {offsets = [0, 0, 0], sizes = [4, 80, 32], strides = [1, 1, 1]} : vector<4x80x160xf32> to vector<4x80x32xf32>
    %36 = vector.extract_strided_slice %34 {offsets = [0, 0, 32], sizes = [4, 80, 32], strides = [1, 1, 1]} : vector<4x80x160xf32> to vector<4x80x32xf32>
    %37 = arith.addf %35, %36 : vector<4x80x32xf32>
    %38 = vector.extract_strided_slice %34 {offsets = [0, 0, 64], sizes = [4, 80, 32], strides = [1, 1, 1]} : vector<4x80x160xf32> to vector<4x80x32xf32>
    %39 = vector.extract_strided_slice %34 {offsets = [0, 0, 96], sizes = [4, 80, 32], strides = [1, 1, 1]} : vector<4x80x160xf32> to vector<4x80x32xf32>
    %40 = arith.addf %38, %39 : vector<4x80x32xf32>
    %41 = vector.extract_strided_slice %34 {offsets = [0, 0, 128], sizes = [4, 80, 32], strides = [1, 1, 1]} : vector<4x80x160xf32> to vector<4x80x32xf32>
    %c0_16 = arith.constant 0 : index
    %c0_17 = arith.constant 0 : index
    %42 = vector.load %arg8[%c0_16, %c0_17] : memref<80x80xf32, #tpu.memory_space<vmem>>, vector<80x80xf32>
    %c0_18 = arith.constant 0 : index
    %c0_19 = arith.constant 0 : index
    %43 = vector.load %arg5[%c0_18, %c0_19] : memref<32x32xf32, #tpu.memory_space<vmem>>, vector<32x32xf32>
    %44 = vector.extract_strided_slice %37 {offsets = [0, 0, 0], sizes = [4, 80, 16], strides = [1, 1, 1]} : vector<4x80x32xf32> to vector<4x80x16xf32>
    %45 = vector.extract_strided_slice %40 {offsets = [0, 0, 0], sizes = [4, 80, 16], strides = [1, 1, 1]} : vector<4x80x32xf32> to vector<4x80x16xf32>
    %46 = vector.extract_strided_slice %41 {offsets = [0, 0, 0], sizes = [4, 80, 16], strides = [1, 1, 1]} : vector<4x80x32xf32> to vector<4x80x16xf32>
    "tpu.trace_start"() <{level = 10 : i32, message = "bqd,bkd->bqk"}> : () -> ()
    %cst_20 = arith.constant dense<0.000000e+00> : vector<4x80x80xf32>
    %47 = tpu.matmul %44, %45, %cst_20 {dimension_numbers = #tpu.dot_dimension_numbers<[2], [2], [1], [1], [0, 0, 0, 1, 1, 1], [0], [0]>} : vector<4x80x16xf32>, vector<4x80x16xf32>, vector<4x80x80xf32> -> vector<4x80x80xf32>
    "tpu.trace_stop"() : () -> ()
    %48 = vector.shape_cast %42 : vector<80x80xf32> to vector<1x80x80xf32>
    %49 = vector.broadcast %48 : vector<1x80x80xf32> to vector<4x80x80xf32>
    %50 = arith.addf %47, %49 : vector<4x80x80xf32>
    %cst_21 = arith.constant dense<0xFF800000> : vector<4x80xf32>
    %51 = vector.multi_reduction <maximumf>, %50, %cst_21 [2] : vector<4x80x80xf32> to vector<4x80xf32>
    %52 = vector.shape_cast %51 : vector<4x80xf32> to vector<4x80x1xf32>
    %53 = vector.broadcast %52 : vector<4x80x1xf32> to vector<4x80x80xf32>
    %54 = arith.subf %50, %53 : vector<4x80x80xf32>
    %55 = math.exp %54 : vector<4x80x80xf32>
    %cst_22 = arith.constant dense<0.000000e+00> : vector<4x80xf32>
    %56 = vector.multi_reduction <add>, %55, %cst_22 [2] : vector<4x80x80xf32> to vector<4x80xf32>
    %57 = vector.shape_cast %56 : vector<4x80xf32> to vector<4x80x1xf32>
    "tpu.trace_start"() <{level = 10 : i32, message = "bqk,bkd->bqd"}> : () -> ()
    %cst_23 = arith.constant dense<0.000000e+00> : vector<4x80x16xf32>
    %58 = tpu.matmul %55, %46, %cst_23 {dimension_numbers = #tpu.dot_dimension_numbers<[2], [1], [1], [2], [0, 0, 0, 1, 1, 2], [0], [0]>} : vector<4x80x80xf32>, vector<4x80x16xf32>, vector<4x80x16xf32> -> vector<4x80x16xf32>
    "tpu.trace_stop"() : () -> ()
    %59 = tpu.reciprocal %57 {approx = true} : vector<4x80x1xf32> -> vector<4x80x1xf32>
    %60 = vector.broadcast %59 : vector<4x80x1xf32> to vector<4x80x16xf32>
    %61 = arith.mulf %58, %60 : vector<4x80x16xf32>
    %62 = vector.shape_cast %61 : vector<4x80x16xf32> to vector<320x16xf32>
    %63 = vector.extract_strided_slice %43 {offsets = [0, 0], sizes = [16, 32], strides = [1, 1]} : vector<32x32xf32> to vector<16x32xf32>
    %cst_24 = arith.constant dense<0.000000e+00> : vector<320x32xf32>
    %64 = tpu.matmul %62, %63, %cst_24 {dimension_numbers = #tpu.dot_dimension_numbers<[1], [0], [0], [1], [0, 0, 1, 1], [], []>} : vector<320x16xf32>, vector<16x32xf32>, vector<320x32xf32> -> vector<320x32xf32>
    %65 = vector.extract_strided_slice %37 {offsets = [0, 0, 16], sizes = [4, 80, 16], strides = [1, 1, 1]} : vector<4x80x32xf32> to vector<4x80x16xf32>
    %66 = vector.extract_strided_slice %40 {offsets = [0, 0, 16], sizes = [4, 80, 16], strides = [1, 1, 1]} : vector<4x80x32xf32> to vector<4x80x16xf32>
    %67 = vector.extract_strided_slice %41 {offsets = [0, 0, 16], sizes = [4, 80, 16], strides = [1, 1, 1]} : vector<4x80x32xf32> to vector<4x80x16xf32>
    "tpu.trace_start"() <{level = 10 : i32, message = "bqd,bkd->bqk"}> : () -> ()
    %cst_25 = arith.constant dense<0.000000e+00> : vector<4x80x80xf32>
    %68 = tpu.matmul %65, %66, %cst_25 {dimension_numbers = #tpu.dot_dimension_numbers<[2], [2], [1], [1], [0, 0, 0, 1, 1, 1], [0], [0]>} : vector<4x80x16xf32>, vector<4x80x16xf32>, vector<4x80x80xf32> -> vector<4x80x80xf32>
    "tpu.trace_stop"() : () -> ()
    %69 = vector.shape_cast %42 : vector<80x80xf32> to vector<1x80x80xf32>
    %70 = vector.broadcast %69 : vector<1x80x80xf32> to vector<4x80x80xf32>
    %71 = arith.addf %68, %70 : vector<4x80x80xf32>
    %cst_26 = arith.constant dense<0xFF800000> : vector<4x80xf32>
    %72 = vector.multi_reduction <maximumf>, %71, %cst_26 [2] : vector<4x80x80xf32> to vector<4x80xf32>
    %73 = vector.shape_cast %72 : vector<4x80xf32> to vector<4x80x1xf32>
    %74 = vector.broadcast %73 : vector<4x80x1xf32> to vector<4x80x80xf32>
    %75 = arith.subf %71, %74 : vector<4x80x80xf32>
    %76 = math.exp %75 : vector<4x80x80xf32>
    %cst_27 = arith.constant dense<0.000000e+00> : vector<4x80xf32>
    %77 = vector.multi_reduction <add>, %76, %cst_27 [2] : vector<4x80x80xf32> to vector<4x80xf32>
    %78 = vector.shape_cast %77 : vector<4x80xf32> to vector<4x80x1xf32>
    "tpu.trace_start"() <{level = 10 : i32, message = "bqk,bkd->bqd"}> : () -> ()
    %cst_28 = arith.constant dense<0.000000e+00> : vector<4x80x16xf32>
    %79 = tpu.matmul %76, %67, %cst_28 {dimension_numbers = #tpu.dot_dimension_numbers<[2], [1], [1], [2], [0, 0, 0, 1, 1, 2], [0], [0]>} : vector<4x80x80xf32>, vector<4x80x16xf32>, vector<4x80x16xf32> -> vector<4x80x16xf32>
    "tpu.trace_stop"() : () -> ()
    %80 = tpu.reciprocal %78 {approx = true} : vector<4x80x1xf32> -> vector<4x80x1xf32>
    %81 = vector.broadcast %80 : vector<4x80x1xf32> to vector<4x80x16xf32>
    %82 = arith.mulf %79, %81 : vector<4x80x16xf32>
    %83 = vector.shape_cast %82 : vector<4x80x16xf32> to vector<320x16xf32>
    %84 = vector.extract_strided_slice %43 {offsets = [16, 0], sizes = [16, 32], strides = [1, 1]} : vector<32x32xf32> to vector<16x32xf32>
    %cst_29 = arith.constant dense<0.000000e+00> : vector<320x32xf32>
    %85 = tpu.matmul %83, %84, %cst_29 {dimension_numbers = #tpu.dot_dimension_numbers<[1], [0], [0], [1], [0, 0, 1, 1], [], []>} : vector<320x16xf32>, vector<16x32xf32>, vector<320x32xf32> -> vector<320x32xf32>
    %86 = arith.addf %64, %85 : vector<320x32xf32>
    %c0_30 = arith.constant 0 : index
    %c0_31 = arith.constant 0 : index
    %87 = vector.load %arg6[%c0_30, %c0_31] : memref<1x32xf32, #tpu.memory_space<vmem>>, vector<1x32xf32>
    %88 = vector.broadcast %87 : vector<1x32xf32> to vector<320x32xf32>
    %89 = arith.addf %86, %88 : vector<320x32xf32>
    %90 = vector.shape_cast %89 : vector<320x32xf32> to vector<4x80x32xf32>
    %91 = arith.addf %90, %0 : vector<4x80x32xf32>
    %c0_32 = arith.constant 0 : index
    %c0_33 = arith.constant 0 : index
    %c0_34 = arith.constant 0 : index
    %92 = vector.load %arg9[%c0_32, %c0_33, %c0_34] : memref<4x80x32xf32, #tpu.memory_space<vmem>>, vector<4x80x32xf32>
    tpu.vector_store %arg9[%c0_32, %c0_33, %c0_34], %91 {strides = array<i32>} : memref<4x80x32xf32, #tpu.memory_space<vmem>>, vector<4x80x32xf32>,
    return
  }
  func.func @transform_0(%arg0: i32) -> (i32, i32, i32) {
    %c0_i32 = arith.constant 0 : i32
    %c0_i32_0 = arith.constant 0 : i32
    %c0_i32_1 = arith.constant 0 : i32
    return %arg0, %c0_i32, %c0_i32_0 : i32, i32, i32
  }
  func.func @transform_1(%arg0: i32) -> (i32, i32, i32) {
    %c0_i32 = arith.constant 0 : i32
    %c0_i32_0 = arith.constant 0 : i32
    %c0_i32_1 = arith.constant 0 : i32
    return %arg0, %c0_i32, %c0_i32_0 : i32, i32, i32
  }
  func.func @transform_2(%arg0: i32) -> (i32, i32) {
    %c0_i32 = arith.constant 0 : i32
    %c0_i32_0 = arith.constant 0 : i32
    %c0_i32_1 = arith.constant 0 : i32
    return %c0_i32, %c0_i32_0 : i32, i32
  }
  func.func @transform_3(%arg0: i32) -> (i32, i32) {
    %c0_i32 = arith.constant 0 : i32
    %c0_i32_0 = arith.constant 0 : i32
    %c0_i32_1 = arith.constant 0 : i32
    return %c0_i32, %c0_i32_0 : i32, i32
  }
  func.func @transform_4(%arg0: i32) -> (i32, i32) {
    %c0_i32 = arith.constant 0 : i32
    %c0_i32_0 = arith.constant 0 : i32
    %c0_i32_1 = arith.constant 0 : i32
    return %c0_i32, %c0_i32_0 : i32, i32
  }
  func.func @transform_5(%arg0: i32) -> (i32, i32) {
    %c0_i32 = arith.constant 0 : i32
    %c0_i32_0 = arith.constant 0 : i32
    %c0_i32_1 = arith.constant 0 : i32
    return %c0_i32, %c0_i32_0 : i32, i32
  }
  func.func @transform_6(%arg0: i32) -> (i32, i32) {
    %c0_i32 = arith.constant 0 : i32
    %c0_i32_0 = arith.constant 0 : i32
    %c0_i32_1 = arith.constant 0 : i32
    return %c0_i32, %c0_i32_0 : i32, i32
  }
  func.func @transform_7(%arg0: i32) -> (i32, i32) {
    %c0_i32 = arith.constant 0 : i32
    %c0_i32_0 = arith.constant 0 : i32
    %c0_i32_1 = arith.constant 0 : i32
    return %c0_i32, %c0_i32_0 : i32, i32
  }
  func.func @transform_8(%arg0: i32) -> (i32, i32, i32) {
    %c0_i32 = arith.constant 0 : i32
    %c0_i32_0 = arith.constant 0 : i32
    %c0_i32_1 = arith.constant 0 : i32
    return %arg0, %c0_i32, %c0_i32_0 : i32, i32, i32
  }
}

</mosaic_0001>

<bundles_post_ra>
// kernel: self_attention_forward.1
= control target key start
LH: loop header
LB: loop body
LE: loop exit
PB: predicated region body
PF: predicated region fallthrough
CT: control target
= control target key end

     0   :  { %vm73_vm0 = vcmask 261120   ;;  %s8765_s17 = smov 96   ;;  %vm1500_vm1 = vcmask 130048   ;;  %vm2211_vm3 = vcmask 654336   ;;  %s12802_s0 = inlined_call_operand.vmem [shape: f32[4,80,32], index: 0, kind: input, shape index: {}]   ;;  %s12803_s1 = inlined_call_operand.vmem [shape: f32[4,1,64], index: 1, kind: input, shape index: {}]   ;;  %s12804_s2 = inlined_call_operand.vmem [shape: f32[32,160], index: 2, kind: input, shape index: {}]   ;;  %s12805_s3 = inlined_call_operand.vmem [shape: f32[1,160], index: 3, kind: input, shape index: {}]   ;;  %s12806_s6 = inlined_call_operand.vmem [shape: f32[80,160], index: 6, kind: input, shape index: {}]   ;;  %s12807_s7 = inlined_call_operand.vmem [shape: f32[80,80], index: 7, kind: input, shape index: {}]   ;;  %s12808_s4 = inlined_call_operand.vmem [shape: f32[32,32], index: 4, kind: input, shape index: {}]   ;;  %s12809_s5 = inlined_call_operand.vmem [shape: f32[1,32], index: 5, kind: input, shape index: {}]   ;;  %s12810_s8 = inlined_call_operand.vmem [shape: f32[4,80,32], index: 8, kind: output, shape index: {}]  }
   0x1   :  { %v8818_v0 = vld [vmem:[%s12802_s0 + $0x10] sm:$0xff]  ;;  %v8823_v1 = vld [vmem:[%s12802_s0] sm:$0xff]  ;;  %v8828_v2 = vld [vmem:[%s12802_s0 + $0x18] sm:$0xff] }
   0x2   :  { %v80_v3 = vsel %vm73_vm0, %v8818_v0, 0.0  ;;  %v74_v4 = vsel %vm73_vm0, %v8823_v1, 0.0  ;;  %v8837_v5 = vld [vmem:[%s12802_s0 + $0x8] sm:$0xff]  ;;  %v83_v6 = vsel %vm73_vm0, %v8828_v2, 0.0  ;;  %v8851_v9 = vld [vmem:[%s12802_s0 + $0x20] sm:$0xff]  ;;  %v8860_v12 = vld [vmem:[%s12802_s0 + $0x38] sm:$0xff] }
   0x3   :  { %81 = vadd.xlane.f32.xlu1 %v80_v3  ;;  %75 = vadd.xlane.f32.xlu0 %v74_v4  ;;  %v77_v7 = vsel %vm73_vm0, %v8837_v5, 0.0  ;;  %v8846_v8 = vld [vmem:[%s12802_s0 + $0x28] sm:$0xff]  ;;  %v86_v11 = vsel %vm73_vm0, %v8851_v9, 0.0  ;;  %v8865_v13 = vld [vmem:[%s12802_s0 + $0x30] sm:$0xff]  ;;  %v95_v14 = vsel %vm73_vm0, %v8860_v12, 0.0  ;;  %v8879_v17 = vld [vmem:[%s12802_s0 + $0x40] sm:$0xff] }
   0x4   :  { %v89_v10 = vsel %vm73_vm0, %v8846_v8, 0.0  ;;  %v92_v15 = vsel %vm73_vm0, %v8865_v13, 0.0  ;;  %v8874_v16 = vld [vmem:[%s12802_s0 + $0x48] sm:$0xff]  ;;  %v98_v19 = vsel %vm73_vm0, %v8879_v17, 0.0  ;;  %v8888_v20 = vld [vmem:[%s12802_s0 + $0x50] sm:$0xff]  ;;  %v8893_v21 = vld [vmem:[%s12802_s0 + $0x58] sm:$0xff] }
   0x5   :  { %v101_v18 = vsel %vm73_vm0, %v8874_v16, 0.0  ;;  %v104_v22 = vsel %vm73_vm0, %v8888_v20, 0.0  ;;  %v107_v23 = vsel %vm73_vm0, %v8893_v21, 0.0  ;;  %v8902_v24 = vld [vmem:[%s12802_s0 + $0x68] sm:$0xff]  ;;  %v8907_v25 = vld [vmem:[%s12802_s0 + $0x60] sm:$0xff]  ;;  %v8916_v28 = vld [vmem:[%s12802_s0 + $0x78] sm:$0xff] }
   0x6   :  { %v113_v26 = vsel %vm73_vm0, %v8902_v24, 0.0  ;;  %v110_v27 = vsel %vm73_vm0, %v8907_v25, 0.0  ;;  %v8921_v29 = vld [vmem:[%s12802_s0 + $0x70] sm:$0xff]  ;;  %v119_v30 = vsel %vm73_vm0, %v8916_v28, 0.0  ;;  %v8930_v32 = vld [vmem:[%s12802_s0 + $0x88] sm:$0xff]  ;;  %v8935_v33 = vld [vmem:[%s12802_s0 + $0x80] sm:$0xff] }
   0x7   :  { %84 = vadd.xlane.f32.xlu1 %v83_v6  ;;  %78 = vadd.xlane.f32.xlu0 %v77_v7  ;;  %v116_v31 = vsel %vm73_vm0, %v8921_v29, 0.0  ;;  %v125_v34 = vsel %vm73_vm0, %v8930_v32, 0.0  ;;  %v122_v35 = vsel %vm73_vm0, %v8935_v33, 0.0  ;;  %v8944_v36 = vld [vmem:[%s12802_s0 + $0x98] sm:$0xff]  ;;  %v8949_v37 = vld [vmem:[%s12802_s0 + $0x90] sm:$0xff]  ;;  %v8958_v40 = vld [vmem:[%s12802_s0 + $0xa0] sm:$0xff] }
   0x8   :  { %v131_v38 = vsel %vm73_vm0, %v8944_v36, 0.0  ;;  %v128_v39 = vsel %vm73_vm0, %v8949_v37, 0.0  ;;  %v134_v41 = vsel %vm73_vm0, %v8958_v40, 0.0  ;;  %v8965_v42 = vld [vmem:[%s12802_s0 + $0xa8] sm:$0xff]  ;;  %v8972_v44 = vld [vmem:[%s12802_s0 + $0xb0] sm:$0xff]  ;;  %v8979_v46 = vld [vmem:[%s12802_s0 + $0xb8] sm:$0xff] }
   0x9   :  { %v137_v43 = vsel %vm73_vm0, %v8965_v42, 0.0  ;;  %v140_v45 = vsel %vm73_vm0, %v8972_v44, 0.0  ;;  %v143_v47 = vsel %vm73_vm0, %v8979_v46, 0.0  ;;  %v8986_v48 = vld [vmem:[%s12802_s0 + $0xc0] sm:$0xff]  ;;  %v8993_v50 = vld [vmem:[%s12802_s0 + $0xc8] sm:$0xff]  ;;  %v9005_v53 = vld [vmem:[%s12802_s0 + $0xd0] sm:$0xff] }
   0xa   :  { %v146_v49 = vsel %vm73_vm0, %v8986_v48, 0.0  ;;  %v8998_v51 = vld [vmem:[%s12803_s1] ss:$0 sm:$0xff]  ;;  %v149_v52 = vsel %vm73_vm0, %v8993_v50, 0.0  ;;  %v152_v54 = vsel %vm73_vm0, %v9005_v53, 0.0  ;;  %v9014_v55 = vld [vmem:[%s12802_s0 + $0xd8] sm:$0xff]  ;;  %vm10339_vm2 = vmpackc.low %vm1500_vm1, %vm1500_vm1 }
   0xb   :  { %90 = vadd.xlane.f32.xlu1 %v89_v10  ;;  %87 = vadd.xlane.f32.xlu0 %v86_v11  ;;  %v155_v56 = vsel %vm73_vm0, %v9014_v55, 0.0  ;;  %v9021_v57 = vld [vmem:[%s12802_s0 + $0xe0] sm:$0xff]  ;;  %v9028_v59 = vld [vmem:[%s12802_s0 + $0xe8] sm:$0xff]  ;;  %v9035_v61 = vld [vmem:[%s12802_s0 + $0xf0] sm:$0xff] }
   0xc   :  { %v158_v58 = vsel %vm73_vm0, %v9021_v57, 0.0  ;;  %v161_v60 = vsel %vm73_vm0, %v9028_v59, 0.0  ;;  %v164_v62 = vsel %vm73_vm0, %v9035_v61, 0.0  ;;  %v9042_v63 = vld [vmem:[%s12802_s0 + $0xf8] sm:$0xff]  ;;  %v9049_v4 = vld [vmem:[%s12802_s0 + $0x100] sm:$0xff]  ;;  %v9061_v10 = vld [vmem:[%s12802_s0 + $0x108] sm:$0xff] }
   0xd   :  { %v167_v3 = vsel %vm73_vm0, %v9042_v63, 0.0  ;;  %v9054_v6 = vld [vmem:[%s12802_s0 + $0x120] sm:$0xff]  ;;  %v170_v7 = vsel %vm73_vm0, %v9049_v4, 0.0 }
   0xe   :  { %v182_v11 = vsel %vm73_vm0, %v9054_v6, 0.0 }
   0xf   :  { %96 = vadd.xlane.f32.xlu1 %v95_v14  ;;  %93 = vadd.xlane.f32.xlu0 %v92_v15  ;;  %v9068_v14 = vld [vmem:[%s12802_s0 + $0x128] sm:$0xff]  ;;  %v173_v15 = vsel %vm73_vm0, %v9061_v10, 0.0 }
  0x13   :  { %102 = vadd.xlane.f32.xlu1 %v101_v18  ;;  %99 = vadd.xlane.f32.xlu0 %v98_v19  ;;  %v9075_v18 = vld [vmem:[%s12802_s0 + $0x110] sm:$0xff]  ;;  %v185_v19 = vsel %vm73_vm0, %v9068_v14, 0.0 }
  0x17   :  { %105 = vadd.xlane.f32.xlu0 %v104_v22  ;;  %108 = vadd.xlane.f32.xlu1 %v107_v23  ;;  %v9082_v22 = vld [vmem:[%s12802_s0 + $0x130] sm:$0xff]  ;;  %v176_v23 = vsel %vm73_vm0, %v9075_v18, 0.0 }
  0x1b   :  { %114 = vadd.xlane.f32.xlu1 %v113_v26  ;;  %111 = vadd.xlane.f32.xlu0 %v110_v27  ;;  %v9089_v26 = vld [vmem:[%s12802_s0 + $0x118] sm:$0xff]  ;;  %v188_v27 = vsel %vm73_vm0, %v9082_v22, 0.0 }
  0x1f   :  { %120 = vadd.xlane.f32.xlu1 %v119_v30  ;;  %117 = vadd.xlane.f32.xlu0 %v116_v31  ;;  %v179_v30 = vsel %vm73_vm0, %v9089_v26, 0.0 }
  0x23   :  { %126 = vadd.xlane.f32.xlu1 %v125_v34  ;;  %123 = vadd.xlane.f32.xlu0 %v122_v35 }
  0x27   :  { %132 = vadd.xlane.f32.xlu1 %v131_v38  ;;  %129 = vadd.xlane.f32.xlu0 %v128_v39 }
  0x2b   :  { %135 = vadd.xlane.f32.xlu1 %v134_v41 }
  0x2f   :  { %138 = vadd.xlane.f32.xlu1 %v137_v43 }
  0x33   :  { %141 = vadd.xlane.f32.xlu1 %v140_v45 }
  0x37   :  { %144 = vadd.xlane.f32.xlu1 %v143_v47 }
  0x3b   :  { %147 = vadd.xlane.f32.xlu1 %v146_v49 }
  0x3d   :  { %659 = vrot.lane.b32.xlu0 %v8998_v51, %s8765_s17 }
  0x3f   :  { %150 = vadd.xlane.f32.xlu1 %v149_v52 }
  0x43   :  { %153 = vadd.xlane.f32.xlu1 %v152_v54 }
  0x47   :  { %156 = vadd.xlane.f32.xlu1 %v155_v56 }
  0x4b   :  { %159 = vadd.xlane.f32.xlu1 %v158_v58 }
  0x4f   :  { %162 = vadd.xlane.f32.xlu1 %v161_v60 }
  0x53   :  { %165 = vadd.xlane.f32.xlu1 %v164_v62 }
  0x57   :  { %168 = vadd.xlane.f32.xlu1 %v167_v3 }
  0x5b   :  { %171 = vadd.xlane.f32.xlu1 %v170_v7 }
  0x5c   :  { %183 = vadd.xlane.f32.xlu0 %v182_v11 }
  0x5f   :  { %174 = vadd.xlane.f32.xlu1 %v173_v15 }
  0x60   :  { %186 = vadd.xlane.f32.xlu0 %v185_v19 }
  0x63   :  { %177 = vadd.xlane.f32.xlu1 %v176_v23 }
  0x64   :  { %189 = vadd.xlane.f32.xlu0 %v188_v27 }
  0x67   :  { %180 = vadd.xlane.f32.xlu1 %v179_v30 }
  0x90   :  { %v82_v31 = vpop.xlane.xlu1 %81  ;;  %v76_v34 = vpop.xlane.xlu0 %75 }
  0x91   :  { %v197_v35 = vmul.f32 0.03125, %v82_v31  ;;  %v195_v38 = vmul.f32 0.03125, %v76_v34 }
  0x93   :  { %v9096_v39 = vsub.f32 %v8823_v1, %v195_v38  ;;  %v9099_v45 = vsub.f32 %v8818_v0, %v197_v35 }
  0x94   :  { %v85_v41 = vpop.xlane.xlu1 %84  ;;  %v79_v43 = vpop.xlane.xlu0 %78 }
  0x95   :  { %v198_v47 = vmul.f32 0.03125, %v85_v41  ;;  %v196_v49 = vmul.f32 0.03125, %v79_v43  ;;  %v275_v52 = vmul.f32 %v9096_v39, %v9096_v39  ;;  %v277_v3 = vmul.f32 %v9099_v45, %v9099_v45 }
  0x97   :  { %v9104_v54 = vsub.f32 %v8837_v5, %v196_v49  ;;  %v315_v56 = vsel %vm73_vm0, %v275_v52, 0.0  ;;  %v9108_v1 = vsub.f32 %v8828_v2, %v198_v47  ;;  %v321_v23 = vsel %vm73_vm0, %v277_v3, 0.0 }
  0x98   :  { %v91_v58 = vpop.xlane.xlu1 %90  ;;  %316 = vadd.xlane.f32.xlu0 %v315_v56  ;;  %v88_v60 = vpop.xlane.xlu0 %87 }
  0x99   :  { %v199_v62 = vmul.f32 0.03125, %v88_v60  ;;  %v276_v0 = vmul.f32 %v9104_v54, %v9104_v54  ;;  %v200_v11 = vmul.f32 0.03125, %v91_v58  ;;  %v278_v2 = vmul.f32 %v9108_v1, %v9108_v1 }
  0x9b   :  { %v318_v7 = vsel %vm73_vm0, %v276_v0, 0.0  ;;  %v9116_v19 = vsub.f32 %v8851_v9, %v199_v62  ;;  %v9122_v27 = vsub.f32 %v8846_v8, %v200_v11  ;;  %v324_v38 = vsel %vm73_vm0, %v278_v2, 0.0 }
  0x9c   :  { %v97_v5 = vpop.xlane.xlu1 %96  ;;  %319 = vadd.xlane.f32.xlu0 %v318_v7  ;;  %v94_v15 = vpop.xlane.xlu0 %93 }
  0x9d   :  { %v201_v30 = vmul.f32 0.03125, %v94_v15  ;;  %v279_v41 = vmul.f32 %v9116_v19, %v9116_v19  ;;  %v202_v43 = vmul.f32 0.03125, %v97_v5  ;;  %v280_v52 = vmul.f32 %v9122_v27, %v9122_v27 }
  0x9f   :  { %v9131_v47 = vsub.f32 %v8865_v13, %v201_v30  ;;  %v327_v62 = vsel %vm73_vm0, %v279_v41, 0.0  ;;  %v9146_v3 = vsub.f32 %v8860_v12, %v202_v43 }
  0xa0   :  { %v103_v31 = vpop.xlane.xlu1 %102  ;;  %322 = vadd.xlane.f32.xlu0 %v321_v23  ;;  %v100_v34 = vpop.xlane.xlu0 %99 }
  0xa1   :  { %v204_v35 = vmul.f32 0.03125, %v103_v31  ;;  %v203_v7 = vmul.f32 0.03125, %v100_v34  ;;  %v281_v15 = vmul.f32 %v9131_v47, %v9131_v47  ;;  %v282_v43 = vmul.f32 %v9146_v3, %v9146_v3 }
  0xa3   :  { %v9128_v9 = vsub.f32 %v8874_v16, %v204_v35  ;;  %v9160_v31 = vsub.f32 %v8879_v17, %v203_v7  ;;  %v712_v7 = vld [vmem:[%s12804_s2 + $0x8] sm:$0xff] }
  0xa4   :  { %325 = vadd.xlane.f32.xlu0 %v324_v38  ;;  %v106_v8 = vpop.xlane.xlu0 %105  ;;  %v109_v49 = vpop.xlane.xlu1 %108  ;;  %v333_v38 = vsel %vm73_vm0, %v281_v15, 0.0 }
  0xa5   :  { %v205_v56 = vmul.f32 0.03125, %v106_v8  ;;  %v284_v58 = vmul.f32 %v9128_v9, %v9128_v9  ;;  %v206_v60 = vmul.f32 0.03125, %v109_v49 }
  0xa7   :  { %v9139_v16 = vsub.f32 %v8888_v20, %v205_v56  ;;  %v342_v0 = vsel %vm73_vm0, %v284_v58, 0.0  ;;  %v9143_v13 = vsub.f32 %v8893_v21, %v206_v60  ;;  %v330_v20 = vsel %vm73_vm0, %v280_v52, 0.0 }
  0xa8   :  { %343 = vadd.xlane.f32.xlu1 %v342_v0  ;;  %328 = vadd.xlane.f32.xlu0 %v327_v62  ;;  %v115_v11 = vpop.xlane.xlu1 %114  ;;  %v112_v5 = vpop.xlane.xlu0 %111  ;;  %v336_v60 = vsel %vm73_vm0, %v282_v43, 0.0  ;;  %v283_v62 = vmul.f32 %v9160_v31, %v9160_v31 }
  0xa9   :  { %v208_v23 = vmul.f32 0.03125, %v115_v11  ;;  %v285_v2 = vmul.f32 %v9139_v16, %v9139_v16  ;;  %v286_v21 = vmul.f32 %v9143_v13, %v9143_v13  ;;  %v207_v34 = vmul.f32 0.03125, %v112_v5 }
  0xab   :  { %v9156_v12 = vsub.f32 %v8902_v24, %v208_v23  ;;  %v345_v30 = vsel %vm73_vm0, %v285_v2, 0.0  ;;  %v348_v49 = vsel %vm73_vm0, %v286_v21, 0.0  ;;  %v9172_v56 = vsub.f32 %v8907_v25, %v207_v34  ;;  %v711_v23 = vld [vmem:[%s12804_s2] sm:$0xff] }
  0xac   :  { %331 = vadd.xlane.f32.xlu0 %v330_v20  ;;  %346 = vadd.xlane.f32.xlu1 %v345_v30  ;;  %v121_v35 = vpop.xlane.xlu1 %120  ;;  %v118_v41 = vpop.xlane.xlu0 %117  ;;  %v713_v20 = vld [vmem:[%s12804_s2 + $0x10] sm:$0xff]  ;;  %v339_v34 = vsel %vm73_vm0, %v283_v62, 0.0 }
  0xad   :  { %v210_v8 = vmul.f32 0.03125, %v121_v35  ;;  %v209_v24 = vmul.f32 0.03125, %v118_v41  ;;  %v288_v52 = vmul.f32 %v9156_v12, %v9156_v12  ;;  %v7552_v21 = vpack.c.bf16 %v713_v20, %v711_v23  ;;  %v9227_v20 = vld [vmem:[%s12802_s0 + $0x138] sm:$0xff] }
  0xae   :  { %v287_v35 = vmul.f32 %v9172_v56, %v9172_v56 }
  0xaf   :  { %v9169_v17 = vsub.f32 %v8921_v29, %v209_v24  ;;  %v714_v29 = vld [vmem:[%s12804_s2 + $0x18] sm:$0xff]  ;;  %v9184_v25 = vsub.f32 %v8916_v28, %v210_v8  ;;  %v354_v11 = vsel %vm73_vm0, %v288_v52, 0.0  ;;  %v716_v24 = vld [vmem:[%s12804_s2 + $0x28] sm:$0xff] }
  0xb0   :  { %334 = vadd.xlane.f32.xlu0 %v333_v38  ;;  %349 = vadd.xlane.f32.xlu1 %v348_v49  ;;  %v127_v58 = vpop.xlane.xlu1 %126  ;;  %v124_v0 = vpop.xlane.xlu0 %123  ;;  %v7550_v2 = vpack.c.bf16 %v714_v29, %v712_v7  ;;  %v718_v52 = vld [vmem:[%s12804_s2 + $0x38] sm:$0xff]  ;;  %v351_v7 = vsel %vm73_vm0, %v287_v35, 0.0 }
  0xb1   :  { %v289_v5 = vmul.f32 %v9169_v17, %v9169_v17  ;;  %v211_v15 = vmul.f32 0.03125, %v124_v0  ;;  %v212_v30 = vmul.f32 0.03125, %v127_v58  ;;  %v290_v8 = vmul.f32 %v9184_v25, %v9184_v25 }
  0xb2   :  { %7551 = vmatprep.subr.bf16.mxu0 %v7550_v2  ;;  %7966 = vmatprep.subr.bf16.mxu1 %v7550_v2  ;;  %v7554_v58 = vpack.c.bf16 %v718_v52, %v716_v24  ;;  %v8766_v2 = vmov 0.0  }
  0xb3   :  { %v357_v41 = vsel %vm73_vm0, %v289_v5, 0.0  ;;  %v9200_v43 = vsub.f32 %v8935_v33, %v211_v15  ;;  %7553 = vmatpush1.bf16.msra.mxu0 %v7552_v21  ;;  %v715_v33 = vld [vmem:[%s12804_s2 + $0x20] sm:$0xff]  ;;  %7968 = vmatpush1.bf16.msra.mxu1 %v7552_v21  ;;  %v9217_v62 = vsub.f32 %v8930_v32, %v212_v30  ;;  %v360_v23 = vsel %vm73_vm0, %v290_v8, 0.0 }
  0xb4   :  { %337 = vadd.xlane.f32.xlu0 %v336_v60  ;;  %355 = vadd.xlane.f32.xlu1 %v354_v11  ;;  %v133_v28 = vpop.xlane.xlu1 %132  ;;  %v130_v49 = vpop.xlane.xlu0 %129  ;;  %v717_v60 = vld [vmem:[%s12804_s2 + $0x30] sm:$0xff]  ;;  %v191_v21 = vsel %vm73_vm0, %v9227_v20, 0.0  ;;  %s8769_s2 = smov 112  }
  0xb5   :  { %v214_v38 = vmul.f32 0.03125, %v133_v28  ;;  %v213_v29 = vmul.f32 0.03125, %v130_v49  ;;  %v7556_v11 = vpack.c.bf16 %v717_v60, %v715_v33  ;;  %v291_v32 = vmul.f32 %v9200_v43, %v9200_v43  ;;  %7555 = vmatprep.subr.bf16.mxu0 %v7554_v58  ;;  %7967 = vmatprep.subr.bf16.mxu1 %v7554_v58 }
  0xb6   :  { %915 = vmatprep.mubr.f32.mxu0 %v8766_v2  ;;  %1023 = vmatprep.mubr.f32.mxu1 %v8766_v2  ;;  %v292_v28 = vmul.f32 %v9217_v62, %v9217_v62 }
  0xb7   :  { %v9221_v5 = vsub.f32 %v8944_v36, %v214_v38  ;;  %7557 = vmatpush1.bf16.msra.mxu0 %v7556_v11  ;;  %7969 = vmatpush1.bf16.msra.mxu1 %v7556_v11  ;;  %v9236_v30 = vsub.f32 %v8949_v37, %v213_v29  ;;  %v363_v38 = vsel %vm73_vm0, %v291_v32, 0.0 }
  0xb8   :  { %340 = vadd.xlane.f32.xlu0 %v339_v34  ;;  %358 = vadd.xlane.f32.xlu1 %v357_v41  ;;  %v136_v0 = vpop.xlane.xlu1 %135  ;;  %v366_v49 = vsel %vm73_vm0, %v292_v28, 0.0 }
  0xb9   :  { %v215_v15 = vmul.f32 0.03125, %v136_v0  ;;  %v294_v41 = vmul.f32 %v9221_v5, %v9221_v5  ;;  %v293_v37 = vmul.f32 %v9236_v30, %v9236_v30 }
  0xbb   :  { %v9241_v34 = vsub.f32 %v8958_v40, %v215_v15  ;;  %v372_v40 = vsel %vm73_vm0, %v294_v41, 0.0 }
  0xbc   :  { %352 = vadd.xlane.f32.xlu0 %v351_v7  ;;  %361 = vadd.xlane.f32.xlu1 %v360_v23  ;;  %v139_v36 = vpop.xlane.xlu1 %138  ;;  %v369_v7 = vsel %vm73_vm0, %v293_v37, 0.0 }
  0xbd   :  { %v216_v35 = vmul.f32 0.03125, %v139_v36  ;;  %v295_v58 = vmul.f32 %v9241_v34, %v9241_v34 }
  0xbf   :  { %v9250_v24 = vsub.f32 %v8965_v42, %v216_v35  ;;  %v375_v0 = vsel %vm73_vm0, %v295_v58, 0.0  ;;  %v9286_v58 = vld [vmem:[%s12803_s1 + $0x1] ss:$0 sm:$0xff] }
  0xc0   :  { %192 = vadd.xlane.f32.xlu0 %v191_v21  ;;  %364 = vadd.xlane.f32.xlu1 %v363_v38  ;;  %v142_v8 = vpop.xlane.xlu1 %141 }
  0xc1   :  { %v217_v52 = vmul.f32 0.03125, %v142_v8  ;;  %v296_v42 = vmul.f32 %v9250_v24, %v9250_v24 }
  0xc3   :  { %v9256_v60 = vsub.f32 %v8972_v44, %v217_v52  ;;  %v378_v15 = vsel %vm73_vm0, %v296_v42, 0.0 }
  0xc4   :  { %373 = vadd.xlane.f32.xlu0 %v372_v40  ;;  %367 = vadd.xlane.f32.xlu1 %v366_v49  ;;  %v145_v33 = vpop.xlane.xlu1 %144 }
  0xc5   :  { %v297_v23 = vmul.f32 %v9256_v60, %v9256_v60 }
  0xc7   :  { %v381_v21 = vsel %vm73_vm0, %v297_v23, 0.0 }
  0xc8   :  { %376 = vadd.xlane.f32.xlu0 %v375_v0  ;;  %370 = vadd.xlane.f32.xlu1 %v369_v7  ;;  %v148_v29 = vpop.xlane.xlu1 %147 }
  0xc9   :  { %v219_v11 = vmul.f32 0.03125, %v148_v29 }
  0xcb   :  { %v9266_v32 = vsub.f32 %v8986_v48, %v219_v11 }
  0xcc   :  { %379 = vadd.xlane.f32.xlu0 %v378_v15  ;;  %v151_v44 = vpop.xlane.xlu1 %150 }
  0xcd   :  { %v220_v36 = vmul.f32 0.03125, %v151_v44  ;;  %v299_v28 = vmul.f32 %v9266_v32, %v9266_v32 }
  0xcf   :  { %v9272_v35 = vsub.f32 %v8993_v50, %v220_v36  ;;  %v387_v8 = vsel %vm73_vm0, %v299_v28, 0.0  ;;  %v218_v28 = vmul.f32 0.03125, %v145_v33 }
  0xd0   :  { %382 = vadd.xlane.f32.xlu0 %v381_v21  ;;  %v154_v38 = vpop.xlane.xlu1 %153 }
  0xd1   :  { %v221_v41 = vmul.f32 0.03125, %v154_v38  ;;  %v300_v48 = vmul.f32 %v9272_v35, %v9272_v35 }
  0xd3   :  { %v9278_v49 = vsub.f32 %v9005_v53, %v221_v41  ;;  %v390_v40 = vsel %vm73_vm0, %v300_v48, 0.0  ;;  %v9304_v41 = vsub.f32 %v8979_v46, %v218_v28 }
  0xd4   :  { %388 = vadd.xlane.f32.xlu0 %v387_v8  ;;  %v157_v37 = vpop.xlane.xlu1 %156 }
  0xd5   :  { %v222_v52 = vmul.f32 0.03125, %v157_v37  ;;  %v301_v50 = vmul.f32 %v9278_v49, %v9278_v49  ;;  %v298_v37 = vmul.f32 %v9304_v41, %v9304_v41 }
  0xd7   :  { %v9289_v0 = vsub.f32 %v9014_v55, %v222_v52  ;;  %v393_v42 = vsel %vm73_vm0, %v301_v50, 0.0  ;;  %v9314_v52 = vld [vmem:[%s12803_s1 + $0x2] ss:$0 sm:$0xff] }
  0xd8   :  { %391 = vadd.xlane.f32.xlu0 %v390_v40  ;;  %v160_v7 = vpop.xlane.xlu1 %159 }
  0xd9   :  { %661 = vrot.lane.b32.xlu1 %v9286_v58, %s8765_s17  ;;  %v223_v53 = vmul.f32 0.03125, %v160_v7  ;;  %v302_v29 = vmul.f32 %v9289_v0, %v9289_v0 }
  0xdb   :  { %v9297_v11 = vsub.f32 %v9021_v57, %v223_v53  ;;  %v396_v15 = vsel %vm73_vm0, %v302_v29, 0.0 }
  0xdc   :  { %394 = vadd.xlane.f32.xlu0 %v393_v42  ;;  %v163_v23 = vpop.xlane.xlu1 %162 }
  0xdd   :  { %v303_v55 = vmul.f32 %v9297_v11, %v9297_v11  ;;  %v224_v57 = vmul.f32 0.03125, %v163_v23 }
  0xdf   :  { %v399_v44 = vsel %vm73_vm0, %v303_v55, 0.0  ;;  %v9307_v8 = vsub.f32 %v9028_v59, %v224_v57  ;;  %v384_v59 = vsel %vm73_vm0, %v298_v37, 0.0 }
  0xe0   :  { %397 = vadd.xlane.f32.xlu0 %v396_v15  ;;  %v166_v36 = vpop.xlane.xlu1 %165  ;;  %v9330_v15 = vpop.permute.xlu0 %659 }
  0xe1   :  { %v225_v48 = vmul.f32 0.03125, %v166_v36  ;;  %v304_v50 = vmul.f32 %v9307_v8, %v9307_v8 }
  0xe3   :  { %v9317_v33 = vsub.f32 %v9035_v61, %v225_v48  ;;  %v402_v42 = vsel %vm73_vm0, %v304_v50, 0.0 }
  0xe4   :  { %400 = vadd.xlane.f32.xlu0 %v399_v44  ;;  %v169_v21 = vpop.xlane.xlu1 %168 }
  0xe5   :  { %v226_v46 = vmul.f32 0.03125, %v169_v21  ;;  %v305_v61 = vmul.f32 %v9317_v33, %v9317_v33 }
  0xe7   :  { %v9325_v53 = vsub.f32 %v9042_v63, %v226_v46  ;;  %v405_v23 = vsel %vm73_vm0, %v305_v61, 0.0 }
  0xe8   :  { %v172_v38 = vpop.xlane.xlu1 %171 }
  0xe9   :  { %v306_v36 = vmul.f32 %v9325_v53, %v9325_v53  ;;  %v184_v21 = vpop.xlane.xlu0 %183 }
  0xeb   :  { %v408_v57 = vsel %vm73_vm0, %v306_v36, 0.0 }
  0xec   :  { %v175_v40 = vpop.xlane.xlu1 %174 }
  0xed   :  { %v228_v29 = vmul.f32 0.03125, %v175_v40  ;;  %v187_v40 = vpop.xlane.xlu0 %186 }
  0xef   :  { %v9333_v55 = vsub.f32 %v9061_v10, %v228_v29  ;;  %v227_v10 = vmul.f32 0.03125, %v172_v38 }
  0xf0   :  { %v178_v7 = vpop.xlane.xlu1 %177 }
  0xf1   :  { %v229_v44 = vmul.f32 0.03125, %v178_v7  ;;  %v308_v37 = vmul.f32 %v9333_v55, %v9333_v55  ;;  %v231_v7 = vmul.f32 0.03125, %v184_v21  ;;  %v190_v61 = vpop.xlane.xlu0 %189 }
  0xf3   :  { %v9339_v28 = vsub.f32 %v9075_v18, %v229_v44  ;;  %v9351_v18 = vsub.f32 %v9049_v4, %v227_v10  ;;  %v9355_v29 = vsub.f32 %v9054_v6, %v231_v7 }
  0xf4   :  { %v181_v63 = vpop.xlane.xlu1 %180 }
  0xf5   :  { %v230_v48 = vmul.f32 0.03125, %v181_v63  ;;  %v309_v50 = vmul.f32 %v9339_v28, %v9339_v28  ;;  %v311_v36 = vmul.f32 %v9355_v29, %v9355_v29  ;;  %v233_v63 = vmul.f32 0.03125, %v190_v61  ;;  %v9381_v61 = vld [vmem:[%s12803_s1 + $0x3] ss:$0 sm:$0xff] }
  0xf7   :  { %v9345_v46 = vsub.f32 %v9089_v26, %v230_v48  ;;  %v232_v26 = vmul.f32 0.03125, %v187_v40  ;;  %v423_v21 = vsel %vm73_vm0, %v311_v36, 0.0 }
  0xf9   :  { %v310_v38 = vmul.f32 %v9345_v46, %v9345_v46  ;;  %v9363_v4 = vsub.f32 %v9068_v14, %v232_v26 }
  0xfa   :  { %663 = vrot.lane.b32.xlu0 %v9314_v52, %s8765_s17 }
  0xfb   :  { %v420_v44 = vsel %vm73_vm0, %v310_v38, 0.0  ;;  %v312_v48 = vmul.f32 %v9363_v4, %v9363_v4 }
  0xfd   :  { %385 = vadd.xlane.f32.xlu1 %v384_v59  ;;  %v414_v59 = vsel %vm73_vm0, %v308_v37, 0.0  ;;  %v426_v14 = vsel %vm73_vm0, %v312_v48, 0.0 }
 0x101   :  { %403 = vadd.xlane.f32.xlu1 %v402_v42  ;;  %v417_v42 = vsel %vm73_vm0, %v309_v50, 0.0 }
 0x105   :  { %406 = vadd.xlane.f32.xlu1 %v405_v23  ;;  %v307_v23 = vmul.f32 %v9351_v18, %v9351_v18 }
 0x107   :  { %v411_v6 = vsel %vm73_vm0, %v307_v23, 0.0 }
 0x109   :  { %409 = vadd.xlane.f32.xlu1 %v408_v57  ;;  %v9370_v57 = vsub.f32 %v9082_v22, %v233_v63 }
 0x10b   :  { %v313_v37 = vmul.f32 %v9370_v57, %v9370_v57 }
 0x10d   :  { %415 = vadd.xlane.f32.xlu1 %v414_v59  ;;  %v429_v10 = vsel %vm73_vm0, %v313_v37, 0.0 }
 0x111   :  { %418 = vadd.xlane.f32.xlu1 %v417_v42 }
 0x115   :  { %421 = vadd.xlane.f32.xlu1 %v420_v44 }
 0x119   :  { %412 = vadd.xlane.f32.xlu0 %v411_v6  ;;  %424 = vadd.xlane.f32.xlu1 %v423_v21 }
 0x11d   :  { %427 = vadd.xlane.f32.xlu1 %v426_v14 }
 0x121   :  { %430 = vadd.xlane.f32.xlu1 %v429_v10 }
 0x125   :  { %v317_v40 = vpop.xlane.xlu0 %316 }
 0x126   :  { %v435_v59 = vmul.f32 0.03125, %v317_v40 }
 0x128   :  { %v475_v50 = vadd.f32 1e-05, %v435_v59 }
 0x129   :  { %v320_v7 = vpop.xlane.xlu0 %319 }
 0x12a   :  { %8315 = vrsqrt.f32 %v475_v50  ;;  %v436_v22 = vmul.f32 0.03125, %v320_v7 }
 0x12c   :  { %v476_v42 = vadd.f32 1e-05, %v436_v22 }
 0x12d   :  { %v323_v38 = vpop.xlane.xlu0 %322 }
 0x12e   :  { %8317 = vrsqrt.f32 %v476_v42  ;;  %v437_v26 = vmul.f32 0.03125, %v323_v38 }
 0x130   :  { %v477_v23 = vadd.f32 1e-05, %v437_v26 }
 0x131   :  { %v326_v44 = vpop.xlane.xlu0 %325 }
 0x132   :  { %8319 = vrsqrt.f32 %v477_v23  ;;  %v438_v36 = vmul.f32 0.03125, %v326_v44  ;;  %665 = vrot.lane.b32.xlu1 %v9381_v61, %s8765_s17 }
 0x134   :  { %v8316_v63 = vpop.eup %8315  ;;  %v478_v6 = vadd.f32 1e-05, %v438_v36 }
 0x135   :  { %v344_v21 = vpop.xlane.xlu1 %343  ;;  %v329_v48 = vpop.xlane.xlu0 %328  ;;  %v555_v14 = vmul.f32 %v8316_v63, %v9096_v39 }
 0x136   :  { %8321 = vrsqrt.f32 %v478_v6  ;;  %v439_v37 = vmul.f32 0.03125, %v329_v48 }
 0x137   :  { %v619_v10 = vmul.f32 %v8998_v51, %v555_v14 }
 0x138   :  { %v8318_v40 = vpop.eup %8317  ;;  %v479_v59 = vadd.f32 1e-05, %v439_v37 }
 0x139   :  { %v347_v50 = vpop.xlane.xlu1 %346  ;;  %v332_v7 = vpop.xlane.xlu0 %331  ;;  %v671_v22 = vadd.f32 %v9330_v15, %v619_v10  ;;  %v556_v42 = vmul.f32 %v8318_v40, %v9104_v54 }
 0x13a   :  { %v440_v38 = vmul.f32 0.03125, %v332_v7  ;;  %8323 = vrsqrt.f32 %v479_v59 }
 0x13b   :  { %6097 = vmatmul.mubr.msk.f32.vlgmr.msra.gmra.mrb[0].mxu0 %vm73_vm0, %v671_v22  ;;  %v620_v26 = vmul.f32 %v8998_v51, %v556_v42  ;;  %v444_v22 = vmul.f32 0.03125, %v344_v21 }
 0x13c   :  { %v8320_v23 = vpop.eup %8319  ;;  %v480_v39 = vadd.f32 1e-05, %v440_v38  ;;  %921 = vmatprep.mubr.f32.mxu0 %v8766_v2 }
 0x13d   :  { %v350_v44 = vpop.xlane.xlu1 %349  ;;  %v335_v36 = vpop.xlane.xlu0 %334  ;;  %v672_v63 = vadd.f32 %v9330_v15, %v620_v26  ;;  %v557_v6 = vmul.f32 %v8320_v23, %v9099_v45 }
 0x13e   :  { %v441_v48 = vmul.f32 0.03125, %v335_v36  ;;  %8325 = vrsqrt.f32 %v480_v39 }
 0x13f   :  { %6098 = vmatmul.mubr.msk.f32.gmra.mrb[2].mxu0 %vm73_vm0, %v672_v63  ;;  %v621_v54 = vmul.f32 %v8998_v51, %v557_v6  ;;  %v484_v63 = vadd.f32 1e-05, %v444_v22  ;;  %v446_v22 = vmul.f32 0.03125, %v350_v44 }
 0x140   :  { %v8322_v14 = vpop.eup %8321  ;;  %v481_v37 = vadd.f32 1e-05, %v441_v48  ;;  %927 = vmatprep.mubr.f32.mxu0 %v8766_v2 }
 0x141   :  { %v356_v10 = vpop.xlane.xlu1 %355  ;;  %v338_v40 = vpop.xlane.xlu0 %337  ;;  %v673_v59 = vadd.f32 %v9330_v15, %v621_v54  ;;  %v558_v7 = vmul.f32 %v8322_v14, %v9108_v1  ;;  %v445_v1 = vmul.f32 0.03125, %v347_v50 }
 0x142   :  { %v442_v42 = vmul.f32 0.03125, %v338_v40  ;;  %8327 = vrsqrt.f32 %v481_v37 }
 0x143   :  { %6099 = vmatmul.mubr.msk.f32.gmra.mrb[4].mxu0 %vm73_vm0, %v673_v59  ;;  %v622_v45 = vmul.f32 %v8998_v51, %v558_v7  ;;  %v485_v7 = vadd.f32 1e-05, %v445_v1 }
 0x144   :  { %v482_v38 = vadd.f32 1e-05, %v442_v42  ;;  %933 = vmatprep.mubr.f32.mxu0 %v8766_v2  ;;  %v8324_v26 = vpop.eup %8323 }
 0x145   :  { %v359_v23 = vpop.xlane.xlu1 %358  ;;  %v341_v39 = vpop.xlane.xlu0 %340  ;;  %v674_v36 = vadd.f32 %v9330_v15, %v622_v45  ;;  %v559_v48 = vmul.f32 %v8324_v26, %v9116_v19 }
 0x146   :  { %v443_v6 = vmul.f32 0.03125, %v341_v39  ;;  %8329 = vrsqrt.f32 %v482_v38 }
 0x147   :  { %6100 = vmatmul.mubr.msk.f32.gmra.mrb[6].mxu0 %vm73_vm0, %v674_v36  ;;  %v623_v54 = vmul.f32 %v8998_v51, %v559_v48  ;;  %8331 = vrsqrt.f32 %v484_v63  ;;  %v486_v63 = vadd.f32 1e-05, %v446_v22 }
 0x148   :  { %v483_v21 = vadd.f32 1e-05, %v443_v6  ;;  %939 = vmatprep.mubr.f32.mxu0 %v8766_v2  ;;  %v8326_v14 = vpop.eup %8325 }
 0x149   :  { %v362_v37 = vpop.xlane.xlu1 %361  ;;  %v353_v40 = vpop.xlane.xlu0 %352  ;;  %v675_v59 = vadd.f32 %v9330_v15, %v623_v54  ;;  %v560_v19 = vmul.f32 %v8326_v14, %v9122_v27 }
 0x14a   :  { %8333 = vrsqrt.f32 %v483_v21  ;;  %v447_v26 = vmul.f32 0.03125, %v353_v40 }
 0x14b   :  { %6101 = vmatmul.mubr.msk.f32.gmra.mrb[8].mxu0 %vm73_vm0, %v675_v59  ;;  %v624_v38 = vmul.f32 %v8998_v51, %v560_v19  ;;  %8335 = vrsqrt.f32 %v485_v7  ;;  %v448_v7 = vmul.f32 0.03125, %v356_v10 }
 0x14c   :  { %v8328_v50 = vpop.eup %8327  ;;  %945 = vmatprep.mubr.f32.mxu0 %v8766_v2  ;;  %v487_v54 = vadd.f32 1e-05, %v447_v26  ;;  %8337 = vrsqrt.f32 %v486_v63 }
 0x14d   :  { %v365_v42 = vpop.xlane.xlu1 %364  ;;  %v193_v45 = vpop.xlane.xlu0 %192  ;;  %v561_v36 = vmul.f32 %v8328_v50, %v9131_v47  ;;  %v676_v44 = vadd.f32 %v9330_v15, %v624_v38 }
 0x14e   :  { %v234_v39 = vmul.f32 0.03125, %v193_v45  ;;  %8339 = vrsqrt.f32 %v487_v54 }
 0x14f   :  { %v625_v27 = vmul.f32 %v8998_v51, %v561_v36  ;;  %6102 = vmatmul.mubr.msk.f32.gmra.mrb[10].mxu0 %vm73_vm0, %v676_v44  ;;  %v488_v44 = vadd.f32 1e-05, %v448_v7 }
 0x150   :  { %v9415_v6 = vsub.f32 %v9227_v20, %v234_v39  ;;  %v8330_v48 = vpop.eup %8329  ;;  %951 = vmatprep.mubr.f32.mxu0 %v8766_v2  ;;  %v449_v39 = vmul.f32 0.03125, %v359_v23 }
 0x151   :  { %v368_v1 = vpop.xlane.xlu1 %367  ;;  %v374_v21 = vpop.xlane.xlu0 %373  ;;  %v677_v47 = vadd.f32 %v9330_v15, %v625_v27  ;;  %v562_v20 = vmul.f32 %v8330_v48, %v9146_v3 }
 0x152   :  { %v454_v14 = vmul.f32 0.03125, %v374_v21  ;;  %v314_v40 = vmul.f32 %v9415_v6, %v9415_v6  ;;  %v8332_v59 = vpop.eup %8331  ;;  %v489_v54 = vadd.f32 1e-05, %v449_v39 }
 0x153   :  { %6103 = vmatmul.mubr.msk.f32.gmra.mrb[12].mxu0 %vm73_vm0, %v677_v47  ;;  %v626_v26 = vmul.f32 %v8998_v51, %v562_v20  ;;  %v564_v63 = vmul.f32 %v8332_v59, %v9128_v9 }
 0x154   :  { %v494_v22 = vadd.f32 1e-05, %v454_v14  ;;  %v8334_v19 = vpop.eup %8333  ;;  %v432_v45 = vsel %vm73_vm0, %v314_v40, 0.0  ;;  %957 = vmatprep.mubr.f32.mxu0 %v8766_v2  ;;  %v450_v14 = vmul.f32 0.03125, %v362_v37 }
 0x155   :  { %v371_v50 = vpop.xlane.xlu1 %370  ;;  %v377_v38 = vpop.xlane.xlu0 %376  ;;  %433 = vadd.xlane.f32.xlu0 %v432_v45  ;;  %v563_v3 = vmul.f32 %v8334_v19, %v9160_v31  ;;  %v678_v10 = vadd.f32 %v9330_v15, %v626_v26  ;;  %v628_v40 = vmul.f32 %v8998_v51, %v564_v63 }
 0x156   :  { %v453_v36 = vmul.f32 0.03125, %v371_v50  ;;  %8341 = vrsqrt.f32 %v494_v22  ;;  %v8336_v21 = vpop.eup %8335  ;;  %v455_v47 = vmul.f32 0.03125, %v377_v38  ;;  %v490_v7 = vadd.f32 1e-05, %v450_v14 }
 0x157   :  { %v627_v48 = vmul.f32 %v8998_v51, %v563_v3  ;;  %6104 = vmatmul.mubr.msk.f32.gmra.mrb[14].mxu0 %vm73_vm0, %v678_v10  ;;  %v565_v9 = vmul.f32 %v8336_v21, %v9139_v16  ;;  %v8338_v20 = vpop.eup %8337  ;;  %v451_v22 = vmul.f32 0.03125, %v365_v42  ;;  %v680_v45 = vadd.f32 %v9330_v15, %v628_v40 }
 0x158   :  { %v493_v27 = vadd.f32 1e-05, %v453_v36  ;;  %963 = vmatprep.mubr.f32.mxu0 %v8766_v2  ;;  %v495_v37 = vadd.f32 1e-05, %v455_v47  ;;  %v8340_v38 = vpop.eup %8339  ;;  %v566_v16 = vmul.f32 %v8338_v20, %v9143_v13  ;;  %v452_v36 = vmul.f32 0.03125, %v368_v1 }
 0x159   :  { %v380_v23 = vpop.xlane.xlu0 %379  ;;  %v679_v31 = vadd.f32 %v9330_v15, %v627_v48  ;;  %v9439_v19 = vpop.permute.xlu1 %661  ;;  %v629_v51 = vmul.f32 %v9286_v58, %v565_v9  ;;  %v491_v42 = vadd.f32 1e-05, %v451_v22  ;;  %v567_v63 = vmul.f32 %v8340_v38, %v9172_v56 }
 0x15a   :  { %8343 = vrsqrt.f32 %v493_v27  ;;  %v456_v50 = vmul.f32 0.03125, %v380_v23  ;;  %v630_v13 = vmul.f32 %v9286_v58, %v566_v16  ;;  %v492_v23 = vadd.f32 1e-05, %v452_v36 }
 0x15b   :  { %8345 = vrsqrt.f32 %v488_v44  ;;  %6105 = vmatmul.mubr.msk.f32.gmra.mrb[16].mxu0 %vm73_vm0, %v679_v31  ;;  %v681_v3 = vadd.f32 %v9439_v19, %v629_v51  ;;  %v631_v14 = vmul.f32 %v9286_v58, %v567_v63 }
 0x15c   :  { %8347 = vrsqrt.f32 %v489_v54  ;;  %969 = vmatprep.mubr.f32.mxu0 %v8766_v2  ;;  %v496_v10 = vadd.f32 1e-05, %v456_v50  ;;  %v682_v54 = vadd.f32 %v9439_v19, %v630_v13 }
 0x15d   :  { %v383_v59 = vpop.xlane.xlu0 %382  ;;  %8349 = vrsqrt.f32 %v490_v7  ;;  %v683_v20 = vadd.f32 %v9439_v19, %v631_v14 }
 0x15e   :  { %8351 = vrsqrt.f32 %v495_v37  ;;  %v457_v15 = vmul.f32 0.03125, %v383_v59 }
 0x15f   :  { %6106 = vmatmul.mubr.msk.f32.gmra.mrb[18].mxu0 %vm73_vm0, %v680_v45  ;;  %8353 = vrsqrt.f32 %v491_v42 }
 0x160   :  { %v8342_v39 = vpop.eup %8341  ;;  %975 = vmatprep.mubr.f32.mxu0 %v8766_v2  ;;  %8355 = vrsqrt.f32 %v496_v10  ;;  %v497_v56 = vadd.f32 1e-05, %v457_v15 }
 0x161   :  { %v9445_v26 = vpop.xlane.xlu0 %388  ;;  %v574_v1 = vmul.f32 %v8342_v39, %v9221_v5  ;;  %8357 = vrsqrt.f32 %v492_v23 }
 0x162   :  { %8359 = vrsqrt.f32 %v497_v56 }
 0x163   :  { %6107 = vmatmul.mubr.msk.f32.gmra.mrb[20].mxu0 %vm73_vm0, %v681_v3  ;;  %v638_v9 = vmul.f32 %v9286_v58, %v574_v1 }
 0x164   :  { %v8344_v44 = vpop.eup %8343  ;;  %981 = vmatprep.mubr.f32.mxu0 %v8766_v2 }
 0x165   :  { %v9452_v27 = vpop.xlane.xlu0 %391  ;;  %v573_v48 = vmul.f32 %v8344_v44, %v9236_v30  ;;  %v8346_v21 = vpop.eup %8345  ;;  %v690_v50 = vadd.f32 %v9439_v19, %v638_v9 }
 0x166   :  { %v8348_v47 = vpop.eup %8347  ;;  %v568_v30 = vmul.f32 %v8346_v21, %v9156_v12 }
 0x167   :  { %v637_v31 = vmul.f32 %v9286_v58, %v573_v48  ;;  %6108 = vmatmul.mubr.msk.f32.gmra.mrb[22].mxu0 %vm73_vm0, %v682_v54  ;;  %v569_v59 = vmul.f32 %v8348_v47, %v9169_v17  ;;  %v8350_v7 = vpop.eup %8349  ;;  %v460_v47 = vmul.f32 0.03125, %v9452_v27 }
 0x168   :  { %987 = vmatprep.mubr.f32.mxu0 %v8766_v2  ;;  %v8352_v22 = vpop.eup %8351  ;;  %v632_v12 = vmul.f32 %v9286_v58, %v568_v30  ;;  %v570_v17 = vmul.f32 %v8350_v7, %v9184_v25 }
 0x169   :  { %v9461_v40 = vpop.xlane.xlu0 %394  ;;  %v689_v5 = vadd.f32 %v9439_v19, %v637_v31  ;;  %v633_v38 = vmul.f32 %v9286_v58, %v569_v59  ;;  %v8354_v51 = vpop.eup %8353  ;;  %v575_v16 = vmul.f32 %v8352_v22, %v9241_v34  ;;  %v500_v9 = vadd.f32 1e-05, %v460_v47 }
 0x16a   :  { %v684_v45 = vadd.f32 %v9439_v19, %v632_v12  ;;  %v8356_v39 = vpop.eup %8355  ;;  %v634_v3 = vmul.f32 %v9286_v58, %v570_v17  ;;  %v571_v10 = vmul.f32 %v8354_v51, %v9200_v43 }
 0x16b   :  { %6115 = vmatmul.mubr.msk.f32.vlgmr.msra.gmra.mrb[0].mxu1 %vm73_vm0, %v689_v5  ;;  %6109 = vmatmul.mubr.msk.f32.gmra.mrb[24].mxu0 %vm73_vm0, %v683_v20  ;;  %v685_v36 = vadd.f32 %v9439_v19, %v633_v38  ;;  %v8358_v15 = vpop.eup %8357  ;;  %v639_v25 = vmul.f32 %v9314_v52, %v575_v16  ;;  %v576_v63 = vmul.f32 %v8356_v39, %v9250_v24  ;;  %v461_v20 = vmul.f32 0.03125, %v9461_v40 }
 0x16c   :  { %1029 = vmatprep.mubr.f32.mxu1 %v8766_v2  ;;  %993 = vmatprep.mubr.f32.mxu0 %v8766_v2  ;;  %v8360_v44 = vpop.eup %8359  ;;  %v686_v48 = vadd.f32 %v9439_v19, %v634_v3  ;;  %v635_v1 = vmul.f32 %v9286_v58, %v571_v10  ;;  %v572_v43 = vmul.f32 %v8358_v15, %v9217_v62 }
 0x16d   :  { %v398_v37 = vpop.xlane.xlu0 %397  ;;  %v640_v21 = vmul.f32 %v9314_v52, %v576_v63  ;;  %v577_v24 = vmul.f32 %v8360_v44, %v9256_v60 }
 0x16e   :  { %v687_v54 = vadd.f32 %v9439_v19, %v635_v1  ;;  %v636_v56 = vmul.f32 %v9286_v58, %v572_v43  ;;  %v459_v58 = vmul.f32 0.03125, %v9445_v26  ;;  %v462_v22 = vmul.f32 0.03125, %v398_v37 }
 0x16f   :  { %6116 = vmatmul.mubr.msk.f32.gmra.mrb[2].mxu1 %vm73_vm0, %v690_v50  ;;  %6110 = vmatmul.mubr.msk.f32.gmra.mrb[26].mxu0 %vm73_vm0, %v684_v45  ;;  %v641_v62 = vmul.f32 %v9314_v52, %v577_v24 }
 0x170   :  { %1035 = vmatprep.mubr.f32.mxu1 %v8766_v2  ;;  %999 = vmatprep.mubr.f32.mxu0 %v8766_v2  ;;  %v688_v14 = vadd.f32 %v9439_v19, %v636_v56  ;;  %v499_v31 = vadd.f32 1e-05, %v459_v58  ;;  %v501_v19 = vadd.f32 1e-05, %v461_v20  ;;  %v502_v50 = vadd.f32 1e-05, %v462_v22 }
 0x171   :  { %v401_v42 = vpop.xlane.xlu0 %400 }
 0x172   :  { %8361 = vrsqrt.f32 %v499_v31  ;;  %v463_v45 = vmul.f32 0.03125, %v401_v42 }
 0x173   :  { %6111 = vmatmul.mubr.msk.f32.gmra.mrb[28].mxu0 %vm73_vm0, %v685_v36 }
 0x174   :  { %1005 = vmatprep.mubr.f32.mxu0 %v8766_v2  ;;  %v503_v27 = vadd.f32 1e-05, %v463_v45 }
 0x175   :  { %v9489_v34 = vpop.permute.xlu0 %663 }
 0x176   :  { %v691_v13 = vadd.f32 %v9489_v34, %v639_v25  ;;  %v692_v23 = vadd.f32 %v9489_v34, %v640_v21  ;;  %v693_v60 = vadd.f32 %v9489_v34, %v641_v62 }
 0x177   :  { %6112 = vmatmul.mubr.msk.f32.gmra.mrb[30].mxu0 %vm73_vm0, %v686_v48 }
 0x178   :  { %6117 = vmatmul.mubr.msk.f32.gmra.mrb[4].mxu1 %vm73_vm0, %v691_v13  ;;  %1011 = vmatprep.mubr.f32.mxu0 %v8766_v2 }
 0x179   :  { %1041 = vmatprep.mubr.f32.mxu1 %v8766_v2 }
 0x17b   :  { %6113 = vmatmul.mubr.msk.f32.gmra.mrb[32].mxu0 %vm73_vm0, %v687_v54 }
 0x17c   :  { %6118 = vmatmul.mubr.msk.f32.gmra.mrb[6].mxu1 %vm73_vm0, %v692_v23  ;;  %1017 = vmatprep.mubr.f32.mxu0 %v8766_v2  ;;  %v8362_v38 = vpop.eup %8361 }
 0x17d   :  { %1047 = vmatprep.mubr.f32.mxu1 %v8766_v2  ;;  %v579_v40 = vmul.f32 %v8362_v38, %v9266_v32 }
 0x17f   :  { %6114 = vmatmul.mubr.msk.f32.gmra.mrb[34].mxu0 %vm73_vm0, %v688_v14  ;;  %v643_v42 = vmul.f32 %v9314_v52, %v579_v40 }
 0x180   :  { %6119 = vmatmul.mubr.msk.f32.gmra.mrb[8].mxu1 %vm73_vm0, %v693_v60 }
 0x181   :  { %1053 = vmatprep.mubr.f32.mxu1 %v8766_v2 }
 0x18a   :  { %v386_v5 = vpop.xlane.xlu1 %385 }
 0x18b   :  { %v458_v30 = vmul.f32 0.03125, %v386_v5 }
 0x18d   :  { %v498_v59 = vadd.f32 1e-05, %v458_v30 }
 0x18e   :  { %v404_v7 = vpop.xlane.xlu1 %403 }
 0x18f   :  { %8363 = vrsqrt.f32 %v498_v59  ;;  %v464_v51 = vmul.f32 0.03125, %v404_v7 }
 0x190   :  { %8365 = vrsqrt.f32 %v500_v9 }
 0x191   :  { %8367 = vrsqrt.f32 %v501_v19  ;;  %v504_v37 = vadd.f32 1e-05, %v464_v51 }
 0x192   :  { %v407_v12 = vpop.xlane.xlu1 %406  ;;  %8369 = vrsqrt.f32 %v502_v50 }
 0x193   :  { %8371 = vrsqrt.f32 %v503_v27  ;;  %v465_v44 = vmul.f32 0.03125, %v407_v12 }
 0x194   :  { %8373 = vrsqrt.f32 %v504_v37 }
 0x195   :  { %v505_v43 = vadd.f32 1e-05, %v465_v44 }
 0x196   :  { %v410_v26 = vpop.xlane.xlu1 %409 }
 0x197   :  { %v466_v21 = vmul.f32 0.03125, %v410_v26  ;;  %8375 = vrsqrt.f32 %v505_v43 }
 0x199   :  { %v8364_v17 = vpop.eup %8363  ;;  %v506_v60 = vadd.f32 1e-05, %v466_v21 }
 0x19a   :  { %v416_v16 = vpop.xlane.xlu1 %415  ;;  %v578_v39 = vmul.f32 %v8364_v17, %v9304_v41  ;;  %v8366_v36 = vpop.eup %8365  ;;  %v695_v41 = vadd.f32 %v9489_v34, %v643_v42 }
 0x19b   :  { %v580_v25 = vmul.f32 %v8366_v36, %v9272_v35  ;;  %v8368_v63 = vpop.eup %8367  ;;  %8377 = vrsqrt.f32 %v506_v60  ;;  %v468_v30 = vmul.f32 0.03125, %v416_v16 }
 0x19c   :  { %v642_v3 = vmul.f32 %v9314_v52, %v578_v39  ;;  %v581_v48 = vmul.f32 %v8368_v63, %v9278_v49  ;;  %v8370_v1 = vpop.eup %8369 }
 0x19d   :  { %v644_v13 = vmul.f32 %v9314_v52, %v580_v25  ;;  %v582_v56 = vmul.f32 %v8370_v1, %v9289_v0  ;;  %v8372_v62 = vpop.eup %8371  ;;  %v508_v19 = vadd.f32 1e-05, %v468_v30 }
 0x19e   :  { %v419_v10 = vpop.xlane.xlu1 %418  ;;  %v694_v15 = vadd.f32 %v9489_v34, %v642_v3  ;;  %v645_v54 = vmul.f32 %v9314_v52, %v581_v48  ;;  %v583_v47 = vmul.f32 %v8372_v62, %v9297_v11  ;;  %v8374_v5 = vpop.eup %8373 }
 0x19f   :  { %v696_v23 = vadd.f32 %v9489_v34, %v644_v13  ;;  %v646_v31 = vmul.f32 %v9314_v52, %v582_v56  ;;  %v469_v0 = vmul.f32 0.03125, %v419_v10  ;;  %v584_v7 = vmul.f32 %v8374_v5, %v9307_v8 }
 0x1a0   :  { %6120 = vmatmul.mubr.msk.f32.gmra.mrb[10].mxu1 %vm73_vm0, %v694_v15  ;;  %v697_v58 = vadd.f32 %v9489_v34, %v645_v54  ;;  %v647_v59 = vmul.f32 %v9314_v52, %v583_v47 }
 0x1a1   :  { %1059 = vmatprep.mubr.f32.mxu1 %v8766_v2  ;;  %v698_v20 = vadd.f32 %v9489_v34, %v646_v31  ;;  %v8376_v11 = vpop.eup %8375  ;;  %v509_v22 = vadd.f32 1e-05, %v469_v0  ;;  %v648_v26 = vmul.f32 %v9314_v52, %v584_v7 }
 0x1a2   :  { %v422_v32 = vpop.xlane.xlu1 %421  ;;  %v699_v45 = vadd.f32 %v9489_v34, %v647_v59  ;;  %v585_v38 = vmul.f32 %v8376_v11, %v9317_v33 }
 0x1a3   :  { %v470_v12 = vmul.f32 0.03125, %v422_v32  ;;  %v700_v51 = vadd.f32 %v9489_v34, %v648_v26 }
 0x1a4   :  { %6121 = vmatmul.mubr.msk.f32.gmra.mrb[12].mxu1 %vm73_vm0, %v695_v41  ;;  %v649_v52 = vmul.f32 %v9381_v61, %v585_v38 }
 0x1a5   :  { %1065 = vmatprep.mubr.f32.mxu1 %v8766_v2  ;;  %v8378_v17 = vpop.eup %8377  ;;  %v510_v8 = vadd.f32 1e-05, %v470_v12 }
 0x1a6   :  { %v425_v35 = vpop.xlane.xlu1 %424  ;;  %v413_v24 = vpop.xlane.xlu0 %412  ;;  %v586_v40 = vmul.f32 %v8378_v17, %v9325_v53  ;;  %v9624_v17 = vld [vmem:[%s12806_s6 + $0x10] sm:$0xff] }
 0x1a7   :  { %v467_v14 = vmul.f32 0.03125, %v413_v24  ;;  %v471_v27 = vmul.f32 0.03125, %v425_v35 }
 0x1a8   :  { %6122 = vmatmul.mubr.msk.f32.gmra.mrb[14].mxu1 %vm73_vm0, %v696_v23  ;;  %v650_v34 = vmul.f32 %v9381_v61, %v586_v40 }
 0x1a9   :  { %v507_v49 = vadd.f32 1e-05, %v467_v14  ;;  %1071 = vmatprep.mubr.f32.mxu1 %v8766_v2  ;;  %v511_v36 = vadd.f32 1e-05, %v471_v27 }
 0x1aa   :  { %v428_v9 = vpop.xlane.xlu1 %427 }
 0x1ab   :  { %8379 = vrsqrt.f32 %v507_v49  ;;  %v472_v33 = vmul.f32 0.03125, %v428_v9 }
 0x1ac   :  { %6123 = vmatmul.mubr.msk.f32.gmra.mrb[16].mxu1 %vm73_vm0, %v697_v58  ;;  %8381 = vrsqrt.f32 %v508_v19 }
 0x1ad   :  { %1077 = vmatprep.mubr.f32.mxu1 %v8766_v2  ;;  %8383 = vrsqrt.f32 %v509_v22  ;;  %v512_v15 = vadd.f32 1e-05, %v472_v33 }
 0x1ae   :  { %v431_v50 = vpop.xlane.xlu1 %430  ;;  %8385 = vrsqrt.f32 %v510_v8  ;;  %v9629_v8 = vld [vmem:[%s12806_s6 + $0x8] sm:$0xff] }
 0x1af   :  { %8387 = vrsqrt.f32 %v511_v36  ;;  %v473_v42 = vmul.f32 0.03125, %v431_v50 }
 0x1b0   :  { %6124 = vmatmul.mubr.msk.f32.gmra.mrb[18].mxu1 %vm73_vm0, %v698_v20  ;;  %8389 = vrsqrt.f32 %v512_v15  ;;  %v721_v20 = vlaneseq }
 0x1b1   :  { %1083 = vmatprep.mubr.f32.mxu1 %v8766_v2 }
 0x1b2   :  { %v9552_v39 = vpop.permute.xlu1 %665  ;;  %v722_v59 = vshrl.u32 %v721_v20, 7 }
 0x1b3   :  { %v701_v3 = vadd.f32 %v9552_v39, %v649_v52  ;;  %v702_v53 = vadd.f32 %v9552_v39, %v650_v34 }
 0x1b4   :  { %6125 = vmatmul.mubr.msk.f32.gmra.mrb[20].mxu1 %vm73_vm0, %v699_v45  ;;  %v723_v7 = vsub.s32 0, %v722_v59  ;;  %v727_v19 = vsub.s32 1, %v722_v59 }
 0x1b5   :  { %1089 = vmatprep.mubr.f32.mxu1 %v8766_v2  ;;  %v8380_v16 = vpop.eup %8379 }
 0x1b6   :  { %v587_v37 = vmul.f32 %v8380_v16, %v9351_v18  ;;  %v8382_v10 = vpop.eup %8381  ;;  %v513_v18 = vadd.f32 1e-05, %v473_v42  ;;  %v9635_v16 = vld [vmem:[%s12806_s6 + $0x18] sm:$0xff] }
 0x1b7   :  { %v8384_v63 = vpop.eup %8383  ;;  %v588_v44 = vmul.f32 %v8382_v10, %v9333_v55 }
 0x1b8   :  { %6126 = vmatmul.mubr.msk.f32.gmra.mrb[22].mxu1 %vm73_vm0, %v700_v51  ;;  %v651_v25 = vmul.f32 %v9381_v61, %v587_v37  ;;  %v589_v41 = vmul.f32 %v8384_v63, %v9339_v28  ;;  %v8386_v13 = vpop.eup %8385  ;;  %8391 = vrsqrt.f32 %v513_v18  ;;  %v9668_v63 = vld [vmem:[%s12806_s6 + $0x30] sm:$0xff] }
 0x1b9   :  { %1095 = vmatprep.mubr.f32.mxu1 %v8766_v2  ;;  %v652_v48 = vmul.f32 %v9381_v61, %v588_v44  ;;  %v590_v43 = vmul.f32 %v8386_v13, %v9345_v46  ;;  %v8388_v21 = vpop.eup %8387  ;;  %v9673_v44 = vld [vmem:[%s12806_s6 + $0x28] sm:$0xff] }
 0x1ba   :  { %v703_v32 = vadd.f32 %v9552_v39, %v651_v25  ;;  %v653_v55 = vmul.f32 %v9381_v61, %v589_v41  ;;  %v591_v24 = vmul.f32 %v8388_v21, %v9355_v29  ;;  %v8390_v23 = vpop.eup %8389  ;;  %v9681_v41 = vld [vmem:[%s12806_s6 + $0x38] sm:$0xff]  ;;  %v9696_v21 = vld [vmem:[%s12806_s6 + $0x40] sm:$0xff] }
 0x1bb   :  { %v704_v1 = vadd.f32 %v9552_v39, %v652_v48  ;;  %v654_v35 = vmul.f32 %v9381_v61, %v590_v43  ;;  %v592_v56 = vmul.f32 %v8390_v23, %v9363_v4 }
 0x1bc   :  { %6127 = vmatmul.mubr.msk.f32.gmra.mrb[24].mxu1 %vm73_vm0, %v701_v3  ;;  %v705_v28 = vadd.f32 %v9552_v39, %v653_v55  ;;  %v655_v46 = vmul.f32 %v9381_v61, %v591_v24  ;;  %v9652_v3 = vld [vmem:[%s12806_s6 + $0x20] sm:$0xff] }
 0x1bd   :  { %1101 = vmatprep.mubr.f32.mxu1 %v8766_v2  ;;  %v706_v54 = vadd.f32 %v9552_v39, %v654_v35  ;;  %v656_v29 = vmul.f32 %v9381_v61, %v592_v56 }
 0x1be   :  { %v707_v60 = vadd.f32 %v9552_v39, %v655_v46 }
 0x1bf   :  { %v708_v49 = vadd.f32 %v9552_v39, %v656_v29 }
 0x1c0   :  { %6128 = vmatmul.mubr.msk.f32.gmra.mrb[26].mxu1 %vm73_vm0, %v702_v53 }
 0x1c1   :  { %1107 = vmatprep.mubr.f32.mxu1 %v8766_v2 }
 0x1c2   :  { %v8392_v62 = vpop.eup %8391 }
 0x1c3   :  { %v593_v14 = vmul.f32 %v8392_v62, %v9370_v57  ;;  %v9712_v62 = vld [vmem:[%s12806_s6 + $0x50] sm:$0xff] }
 0x1c4   :  { %6129 = vmatmul.mubr.msk.f32.gmra.mrb[28].mxu1 %vm73_vm0, %v703_v32 }
 0x1c5   :  { %1113 = vmatprep.mubr.f32.mxu1 %v8766_v2  ;;  %v657_v58 = vmul.f32 %v9381_v61, %v593_v14 }
 0x1c7   :  { %v709_v4 = vadd.f32 %v9552_v39, %v657_v58 }
 0x1c8   :  { %6130 = vmatmul.mubr.msk.f32.gmra.mrb[30].mxu1 %vm73_vm0, %v704_v1 }
 0x1c9   :  { %1119 = vmatprep.mubr.f32.mxu1 %v8766_v2 }
 0x1cc   :  { %6131 = vmatmul.mubr.msk.f32.gmra.mrb[32].mxu1 %vm73_vm0, %v705_v28 }
 0x1cd   :  { %1125 = vmatprep.mubr.f32.mxu1 %v8766_v2 }
 0x1d0   :  { %6132 = vmatmul.mubr.msk.f32.gmra.mrb[34].mxu1 %vm73_vm0, %v706_v54 }
 0x1d1   :  { %1131 = vmatprep.mubr.f32.mxu1 %v8766_v2 }
 0x1d4   :  { %6133 = vmatmul.mubr.msk.f32.gmra.mrb[36].mxu1 %vm73_vm0, %v707_v60  ;;  %v9719_v60 = vld [vmem:[%s12806_s6 + $0x48] sm:$0xff] }
 0x1d5   :  { %1137 = vmatprep.mubr.f32.mxu1 %v8766_v2 }
 0x1d8   :  { %6134 = vmatmul.mubr.msk.f32.gmra.mrb[38].mxu1 %vm73_vm0, %v708_v49  ;;  %v9725_v49 = vld [vmem:[%s12806_s6 + $0x58] sm:$0xff] }
 0x1d9   :  { %1143 = vmatprep.mubr.f32.mxu1 %v8766_v2 }
 0x1dc   :  { %6135 = vmatmul.mubr.msk.f32.gmra.mrb[40].mxu1 %vm73_vm0, %v709_v4 }
 0x1dd   :  { %1149 = vmatprep.mubr.f32.mxu1 %v8766_v2  ;;  %v719_v2 = vld [vmem:[%s12805_s3] sm:$0x3] }
 0x1de   :  { %v9607_v11 = vrot.slane %v719_v2, %v723_v7 }
 0x1e2   :  { %v434_v31 = vpop.xlane.xlu0 %433 }
 0x1e3   :  { %v474_v57 = vmul.f32 0.03125, %v434_v31 }
 0x1e5   :  { %v514_v47 = vadd.f32 1e-05, %v474_v57 }
 0x1e7   :  { %8393 = vrsqrt.f32 %v514_v47 }
 0x1f1   :  { %v8394_v5 = vpop.eup %8393 }
 0x1f2   :  { %v594_v30 = vmul.f32 %v8394_v5, %v9415_v6  ;;  %v9612_v6 = vld [vmem:[%s12806_s6] sm:$0xff] }
 0x1f3   :  { %v9740_v5 = vld [vmem:[%s12806_s6 + $0x60] sm:$0xff] }
 0x1f4   :  { %v658_v9 = vmul.f32 %v9381_v61, %v594_v30  ;;  %v9614_v61 = vrot.slane %v719_v2, %v727_v19  ;;  %v9756_v19 = vld [vmem:[%s12806_s6 + $0x70] sm:$0xff] }
 0x1f6   :  { %v710_v0 = vadd.f32 %v9552_v39, %v658_v9 }
 0x1f8   :  { %6136 = vmatmul.mubr.msk.f32.gmra.mrb[42].mxu1 %vm73_vm0, %v710_v0 }
 0x20e   :  { %v917_v22 = vpop.f32.mrb[0].mxu0 }
 0x20f   :  { %v918_v12 = vadd.f32 %v917_v22, %v9607_v11  ;;  %v919_v50 = vpop.f32.mrb[1].mxu0  ;;  %v9761_v22 = vld [vmem:[%s12806_s6 + $0x68] sm:$0xff] }
 0x210   :  { %v920_v26 = vadd.f32 %v919_v50, %v9614_v61 }
 0x211   :  { %v9618_v45 = vmul.f32 %v9612_v6, %v918_v12 }
 0x212   :  { %v923_v38 = vpop.f32.mrb[2].mxu0  ;;  %v9644_v40 = vmul.f32 %v9629_v8, %v920_v26  ;;  %v9769_v26 = vld [vmem:[%s12806_s6 + $0x78] sm:$0xff] }
 0x213   :  { %v924_v27 = vadd.f32 %v923_v38, %v9607_v11  ;;  %v925_v51 = vpop.f32.mrb[3].mxu0  ;;  %1296 = vrot.lane.b32.xlu0 %v9618_v45, %s8765_s17 }
 0x214   :  { %v926_v39 = vadd.f32 %v925_v51, %v9614_v61  ;;  %12940 = vst [vmem:[#allocation2_spill] sm:$0xff] %v9644_v40 }
 0x215   :  { %v9641_v52 = vmul.f32 %v9624_v17, %v924_v27 }
 0x216   :  { %v9647_v36 = vmul.f32 %v9635_v16, %v926_v39  ;;  %v929_v33 = vpop.f32.mrb[4].mxu0 }
 0x217   :  { %v930_v37 = vadd.f32 %v929_v33, %v9607_v11  ;;  %1298 = vrot.lane.b32.xlu1 %v9641_v52, %s8765_s17  ;;  %v931_v34 = vpop.f32.mrb[5].mxu0 }
 0x218   :  { %12941 = vst [vmem:[#allocation3_spill] sm:$0xff] %v9647_v36  ;;  %v7678_v15 = vpack.c.bf16 %v9647_v36, %v9644_v40  ;;  %v932_v53 = vadd.f32 %v931_v34, %v9614_v61 }
 0x219   :  { %v9662_v42 = vmul.f32 %v9652_v3, %v930_v37  ;;  %v9784_v37 = vld [vmem:[%s12806_s6 + $0x80] sm:$0xff] }
 0x21a   :  { %v935_v25 = vpop.f32.mrb[6].mxu0  ;;  %7679 = vmatprep.subr.bf16.mxu0 %v7678_v15  ;;  %v9688_v1 = vmul.f32 %v9673_v44, %v932_v53 }
 0x21b   :  { %v936_v18 = vadd.f32 %v935_v25, %v9607_v11  ;;  %7681 = vmatpush3.bf16.msra.mxu0 %v7678_v15  ;;  %1300 = vrot.lane.b32.xlu1 %v9662_v42, %s8765_s17  ;;  %v937_v32 = vpop.f32.mrb[7].mxu0 }
 0x21c   :  { %v938_v13 = vadd.f32 %v937_v32, %v9614_v61  ;;  %12942 = vst [vmem:[#allocation4_spill] sm:$0xff] %v9688_v1 }
 0x21d   :  { %v9685_v48 = vmul.f32 %v9668_v63, %v936_v18 }
 0x21e   :  { %v9691_v55 = vmul.f32 %v9681_v41, %v938_v13  ;;  %v941_v43 = vpop.f32.mrb[8].mxu0 }
 0x21f   :  { %1302 = vrot.lane.b32.xlu1 %v9685_v48, %s8765_s17  ;;  %v942_v35 = vadd.f32 %v941_v43, %v9607_v11  ;;  %v943_v24 = vpop.f32.mrb[9].mxu0  ;;  %v9800_v43 = vld [vmem:[%s12806_s6 + $0x90] sm:$0xff] }
 0x220   :  { %12943 = vst [vmem:[#allocation5_spill] sm:$0xff] %v9691_v55  ;;  %v7682_v23 = vpack.c.bf16 %v9691_v55, %v9688_v1  ;;  %v944_v46 = vadd.f32 %v943_v24, %v9614_v61 }
 0x221   :  { %v9706_v54 = vmul.f32 %v9696_v21, %v942_v35  ;;  %v9805_v35 = vld [vmem:[%s12806_s6 + $0x88] sm:$0xff] }
 0x222   :  { %7683 = vmatprep.subr.bf16.mxu0 %v7682_v23  ;;  %v947_v56 = vpop.f32.mrb[10].mxu0  ;;  %v9732_v31 = vmul.f32 %v9719_v60, %v944_v46  ;;  %v9811_v46 = vld [vmem:[%s12806_s6 + $0x98] sm:$0xff]  ;;  %s8767_s6 = smov 64  }
 0x223   :  { %7685 = vmatpush3.bf16.msra.mxu0 %v7682_v23  ;;  %1304 = vrot.lane.b32.xlu1 %v9706_v54, %s8765_s17  ;;  %v948_v29 = vadd.f32 %v947_v56, %v9607_v11  ;;  %v949_v14 = vpop.f32.mrb[11].mxu0 }
 0x224   :  { %v950_v58 = vadd.f32 %v949_v14, %v9614_v61  ;;  %12944 = vst [vmem:[#allocation6_spill] sm:$0xff] %v9732_v31 }
 0x225   :  { %v9729_v4 = vmul.f32 %v9712_v62, %v948_v29 }
 0x226   :  { %v9735_v57 = vmul.f32 %v9725_v49, %v950_v58  ;;  %v953_v47 = vpop.f32.mrb[12].mxu0 }
 0x227   :  { %v954_v30 = vadd.f32 %v953_v47, %v9607_v11  ;;  %v955_v9 = vpop.f32.mrb[13].mxu0  ;;  %1306 = vrot.lane.b32.xlu0 %v9729_v4, %s8765_s17 }
 0x228   :  { %12945 = vst [vmem:[#allocation7_spill] sm:$0xff] %v9735_v57  ;;  %v7686_v20 = vpack.c.bf16 %v9735_v57, %v9732_v31  ;;  %v956_v7 = vadd.f32 %v955_v9, %v9614_v61 }
 0x229   :  { %v9750_v59 = vmul.f32 %v9740_v5, %v954_v30 }
 0x22a   :  { %v959_v2 = vpop.f32.mrb[14].mxu0  ;;  %7687 = vmatprep.subr.bf16.mxu0 %v7686_v20  ;;  %v9776_v51 = vmul.f32 %v9761_v22, %v956_v7 }
 0x22b   :  { %v960_v12 = vadd.f32 %v959_v2, %v9607_v11  ;;  %7689 = vmatpush3.bf16.msra.mxu0 %v7686_v20  ;;  %1308 = vrot.lane.b32.xlu1 %v9750_v59, %s8765_s17  ;;  %v961_v50 = vpop.f32.mrb[15].mxu0 }
 0x22c   :  { %v962_v38 = vadd.f32 %v961_v50, %v9614_v61  ;;  %12946 = vst [vmem:[#allocation8_spill] sm:$0xff] %v9776_v51 }
 0x22d   :  { %v9773_v27 = vmul.f32 %v9756_v19, %v960_v12 }
 0x22e   :  { %v9779_v39 = vmul.f32 %v9769_v26, %v962_v38  ;;  %v965_v33 = vpop.f32.mrb[16].mxu0 }
 0x22f   :  { %v966_v34 = vadd.f32 %v965_v33, %v9607_v11  ;;  %v967_v15 = vpop.f32.mrb[17].mxu0  ;;  %1310 = vrot.lane.b32.xlu0 %v9773_v27, %s8765_s17 }
 0x230   :  { %12947 = vst [vmem:[#allocation9_spill] sm:$0xff] %v9779_v39  ;;  %v7690_v25 = vpack.c.bf16 %v9779_v39, %v9776_v51  ;;  %v968_v32 = vadd.f32 %v967_v15, %v9614_v61 }
 0x231   :  { %v9794_v18 = vmul.f32 %v9784_v37, %v966_v34 }
 0x232   :  { %v971_v13 = vpop.f32.mrb[18].mxu0  ;;  %7691 = vmatprep.subr.bf16.mxu0 %v7690_v25  ;;  %v9820_v14 = vmul.f32 %v9805_v35, %v968_v32 }
 0x233   :  { %v972_v24 = vadd.f32 %v971_v13, %v9607_v11  ;;  %v973_v23 = vpop.f32.mrb[19].mxu0  ;;  %7693 = vmatpush3.bf16.msra.mxu0 %v7690_v25  ;;  %1312 = vrot.lane.b32.xlu1 %v9794_v18, %s8765_s17 }
 0x234   :  { %v974_v56 = vadd.f32 %v973_v23, %v9614_v61  ;;  %12948 = vst [vmem:[#allocation10_spill] sm:$0xff] %v9820_v14 }
 0x235   :  { %v9817_v29 = vmul.f32 %v9800_v43, %v972_v24 }
 0x236   :  { %v9823_v58 = vmul.f32 %v9811_v46, %v974_v56  ;;  %v977_v47 = vpop.f32.mrb[20].mxu0 }
 0x237   :  { %v978_v30 = vadd.f32 %v977_v47, %v9607_v11  ;;  %v979_v9 = vpop.f32.mrb[21].mxu0  ;;  %1314 = vrot.lane.b32.xlu0 %v9817_v29, %s8765_s17 }
 0x238   :  { %12949 = vst [vmem:[#allocation11_spill] sm:$0xff] %v9823_v58  ;;  %v7694_v7 = vpack.c.bf16 %v9823_v58, %v9820_v14  ;;  %v980_v12 = vadd.f32 %v979_v9, %v9614_v61 }
 0x239   :  { %v9833_v2 = vmul.f32 %v9612_v6, %v978_v30 }
 0x23a   :  { %v983_v50 = vpop.f32.mrb[22].mxu0  ;;  %7695 = vmatprep.subr.bf16.mxu0 %v7694_v7  ;;  %v9846_v13 = vmul.f32 %v9629_v8, %v980_v12 }
 0x23b   :  { %v984_v38 = vadd.f32 %v983_v50, %v9607_v11  ;;  %v985_v33 = vpop.f32.mrb[23].mxu0  ;;  %7697 = vmatpush3.bf16.msra.mxu0 %v7694_v7  ;;  %1316 = vrot.lane.b32.xlu1 %v9833_v2, %s8765_s17 }
 0x23c   :  { %v986_v34 = vadd.f32 %v985_v33, %v9614_v61  ;;  %12950 = vst [vmem:[#allocation12_spill] sm:$0xff] %v9846_v13 }
 0x23d   :  { %v9843_v25 = vmul.f32 %v9624_v17, %v984_v38 }
 0x23e   :  { %v9840_v15 = vpop.f32.mrb[0].mxu1  ;;  %v9849_v24 = vmul.f32 %v9635_v16, %v986_v34  ;;  %v989_v23 = vpop.f32.mrb[24].mxu0 }
 0x23f   :  { %v1027_v32 = vpop.f32.mrb[1].mxu1  ;;  %v990_v56 = vadd.f32 %v989_v23, %v9607_v11  ;;  %v991_v47 = vpop.f32.mrb[25].mxu0  ;;  %1318 = vrot.lane.b32.xlu0 %v9843_v25, %s8765_s17 }
 0x240   :  { %12951 = vst [vmem:[#allocation13_spill] sm:$0xff] %v9849_v24  ;;  %v1028_v9 = vadd.f32 %v1027_v32, %v9614_v61  ;;  %v9861_v12 = vpack.c.bf16 %v9849_v24, %v9846_v13  ;;  %v992_v33 = vadd.f32 %v991_v47, %v9614_v61 }
 0x241   :  { %v9864_v50 = vmul.f32 %v9652_v3, %v990_v56 }
 0x242   :  { %v9857_v7 = vpop.f32.mrb[2].mxu1  ;;  %12952 = vst [vmem:[#allocation14_spill] sm:$0xff] %v9861_v12  ;;  %v995_v34 = vpop.f32.mrb[26].mxu0  ;;  %v9872_v32 = vmul.f32 %v9805_v35, %v1028_v9  ;;  %v9882_v47 = vmul.f32 %v9673_v44, %v992_v33 }
 0x243   :  { %v1033_v38 = vpop.f32.mrb[3].mxu1  ;;  %v996_v53 = vadd.f32 %v995_v34, %v9607_v11  ;;  %v997_v30 = vpop.f32.mrb[27].mxu0  ;;  %1320 = vrot.lane.b32.xlu1 %v9864_v50, %s8765_s17 }
 0x244   :  { %v1034_v23 = vadd.f32 %v1033_v38, %v9614_v61  ;;  %12953 = vst [vmem:[#allocation15_spill] sm:$0xff] %v9872_v32  ;;  %v998_v28 = vadd.f32 %v997_v30, %v9614_v61  ;;  %12955 = vst [vmem:[#allocation17_spill] sm:$0xff] %v9882_v47 }
 0x245   :  { %v9879_v20 = vmul.f32 %v9668_v63, %v996_v53 }
 0x246   :  { %v9876_v56 = vmul.f32 %v9811_v46, %v1034_v23  ;;  %v9885_v38 = vmul.f32 %v9681_v41, %v998_v28  ;;  %v1001_v0 = vpop.f32.mrb[28].mxu0 }
 0x247   :  { %v1002_v30 = vadd.f32 %v1001_v0, %v9607_v11  ;;  %v1003_v23 = vpop.f32.mrb[29].mxu0  ;;  %1322 = vrot.lane.b32.xlu0 %v9879_v20, %s8765_s17 }
 0x248   :  { %12954 = vst [vmem:[#allocation16_spill] sm:$0xff] %v9876_v56  ;;  %12956 = vst [vmem:[#allocation18_spill] sm:$0xff] %v9885_v38  ;;  %v9891_v9 = vpack.c.bf16 %v9876_v56, %v9872_v32  ;;  %v9900_v28 = vpack.c.bf16 %v9885_v38, %v9882_v47  ;;  %v1004_v10 = vadd.f32 %v1003_v23, %v9614_v61 }
 0x249   :  { %v9903_v33 = vmul.f32 %v9696_v21, %v1002_v30 }
 0x24a   :  { %12957 = vst [vmem:[#allocation19_spill] sm:$0xff] %v9891_v9  ;;  %12958 = vst [vmem:[#allocation20_spill] sm:$0xff] %v9900_v28  ;;  %v1007_v32 = vpop.f32.mrb[30].mxu0  ;;  %v9919_v39 = vmul.f32 %v9719_v60, %v1004_v10 }
 0x24b   :  { %v9905_v34 = vpop.f32.mrb[4].mxu1  ;;  %v1008_v56 = vadd.f32 %v1007_v32, %v9607_v11  ;;  %v1009_v13 = vpop.f32.mrb[31].mxu0  ;;  %1324 = vrot.lane.b32.xlu1 %v9903_v33, %s8765_s17 }
 0x24c   :  { %v1039_v0 = vpop.f32.mrb[5].mxu1  ;;  %v1010_v53 = vadd.f32 %v1009_v13, %v9614_v61  ;;  %12959 = vst [vmem:[#allocation21_spill] sm:$0xff] %v9919_v39 }
 0x24d   :  { %v9913_v24 = vmul.f32 %v9712_v62, %v1008_v56  ;;  %v1040_v30 = vadd.f32 %v1039_v0, %v9614_v61 }
 0x24e   :  { %v9922_v23 = vmul.f32 %v9725_v49, %v1010_v53  ;;  %v1013_v32 = vpop.f32.mrb[32].mxu0 }
 0x24f   :  { %v9916_v51 = vpop.f32.mrb[6].mxu1  ;;  %v1014_v55 = vadd.f32 %v1013_v32, %v9607_v11  ;;  %v1015_v47 = vpop.f32.mrb[33].mxu0  ;;  %1326 = vrot.lane.b32.xlu0 %v9913_v24, %s8765_s17  ;;  %v9935_v53 = vmul.f32 %v9629_v8, %v1040_v30 }
 0x250   :  { %12960 = vst [vmem:[#allocation22_spill] sm:$0xff] %v9922_v23  ;;  %v1045_v1 = vpop.f32.mrb[7].mxu1  ;;  %v9932_v10 = vpack.c.bf16 %v9922_v23, %v9919_v39 }
 0x251   :  { %v1046_v13 = vadd.f32 %v1045_v1, %v9614_v61  ;;  %12962 = vst [vmem:[#allocation24_spill] sm:$0xff] %v9935_v53  ;;  %v9938_v0 = vmul.f32 %v9740_v5, %v1014_v55  ;;  %v1016_v1 = vadd.f32 %v1015_v47, %v9614_v61 }
 0x252   :  { %12961 = vst [vmem:[#allocation23_spill] sm:$0xff] %v9932_v10  ;;  %v1019_v14 = vpop.f32.mrb[34].mxu0 }
 0x253   :  { %v9941_v32 = vmul.f32 %v9635_v16, %v1046_v13  ;;  %v9943_v38 = vpop.f32.mrb[8].mxu1  ;;  %v1021_v39 = vpop.f32.mrb[35].mxu0  ;;  %1328 = vrot.lane.b32.xlu0 %v9938_v0, %s8765_s17  ;;  %v9957_v13 = vmul.f32 %v9761_v22, %v1016_v1 }
 0x254   :  { %v1051_v58 = vpop.f32.mrb[9].mxu1  ;;  %v1022_v30 = vadd.f32 %v1021_v39, %v9614_v61 }
 0x255   :  { %12963 = vst [vmem:[#allocation25_spill] sm:$0xff] %v9941_v32  ;;  %v9952_v55 = vpack.c.bf16 %v9941_v32, %v9935_v53  ;;  %12965 = vst [vmem:[#allocation27_spill] sm:$0xff] %v9957_v13  ;;  %v1052_v53 = vadd.f32 %v1051_v58, %v9614_v61 }
 0x256   :  { %v9960_v47 = vmul.f32 %v9769_v26, %v1022_v30 }
 0x257   :  { %12964 = vst [vmem:[#allocation26_spill] sm:$0xff] %v9952_v55  ;;  %7719 = vmatprep.subr.bf16.mxu0 %v9952_v55  ;;  %v9973_v1 = vmul.f32 %v9673_v44, %v1052_v53 }
 0x258   :  { %12966 = vst [vmem:[#allocation28_spill] sm:$0xff] %v9960_v47  ;;  %v9966_v23 = vpack.c.bf16 %v9960_v47, %v9957_v13 }
 0x259   :  { %12968 = vst [vmem:[#allocation30_spill] sm:$0xff] %v9973_v1 }
 0x25a   :  { %12967 = vst [vmem:[#allocation29_spill] sm:$0xff] %v9966_v23 }
 0x273   :  { %v9969_v32 = vpop.f32.mrb[10].mxu1 }
 0x274   :  { %v1057_v39 = vpop.f32.mrb[11].mxu1 }
 0x275   :  { %v1058_v31 = vadd.f32 %v1057_v39, %v9614_v61 }
 0x277   :  { %v9976_v30 = vmul.f32 %v9681_v41, %v1058_v31  ;;  %v9978_v57 = vpop.f32.mrb[12].mxu1 }
 0x278   :  { %v1063_v56 = vpop.f32.mrb[13].mxu1 }
 0x279   :  { %12969 = vst [vmem:[#allocation31_spill] sm:$0xff] %v9976_v30  ;;  %v9984_v58 = vpack.c.bf16 %v9976_v30, %v9973_v1  ;;  %v1064_v47 = vadd.f32 %v1063_v56, %v9614_v61 }
 0x27b   :  { %12970 = vst [vmem:[#allocation32_spill] sm:$0xff] %v9984_v58  ;;  %v9987_v40 = vpop.f32.mrb[14].mxu1  ;;  %v9991_v31 = vmul.f32 %v9719_v60, %v1064_v47 }
 0x27c   :  { %v1069_v39 = vpop.f32.mrb[15].mxu1 }
 0x27d   :  { %v1070_v53 = vadd.f32 %v1069_v39, %v9614_v61  ;;  %12971 = vst [vmem:[#allocation33_spill] sm:$0xff] %v9991_v31 }
 0x27f   :  { %v9994_v36 = vmul.f32 %v9725_v49, %v1070_v53  ;;  %v9996_v55 = vpop.f32.mrb[16].mxu1 }
 0x280   :  { %v1075_v13 = vpop.f32.mrb[17].mxu1 }
 0x281   :  { %12972 = vst [vmem:[#allocation34_spill] sm:$0xff] %v9994_v36  ;;  %v10002_v56 = vpack.c.bf16 %v9994_v36, %v9991_v31  ;;  %v1076_v30 = vadd.f32 %v1075_v13, %v9614_v61 }
 0x283   :  { %12973 = vst [vmem:[#allocation35_spill] sm:$0xff] %v10002_v56  ;;  %v10005_v58 = vpop.f32.mrb[18].mxu1  ;;  %v10012_v23 = vmul.f32 %v9761_v22, %v1076_v30  ;;  %v1020_v56 = vadd.f32 %v1019_v14, %v9607_v11  ;;  %v1026_v14 = vadd.f32 %v9840_v15, %v9607_v11 }
 0x284   :  { %v1081_v39 = vpop.f32.mrb[19].mxu1 }
 0x285   :  { %v1082_v47 = vadd.f32 %v1081_v39, %v9614_v61  ;;  %v1297_v9 = vpop.permute.xlu0 %1296  ;;  %12975 = vst [vmem:[#allocation37_spill] sm:$0xff] %v10012_v23 }
 0x286   :  { %v10009_v53 = vadd.f32 %v1297_v9, %v9618_v45 }
 0x287   :  { %v10015_v1 = vmul.f32 %v9769_v26, %v1082_v47  ;;  %v10017_v31 = vpop.f32.mrb[20].mxu1 }
 0x288   :  { %12974 = vst [vmem:[#allocation36_spill] sm:$0xff] %v10009_v53  ;;  %v1087_v36 = vpop.f32.mrb[21].mxu1  ;;  %6882 = vmatprep.mubr.msk.f32.mxu1 %vm1500_vm1, %v10009_v53 }
 0x289   :  { %12976 = vst [vmem:[#allocation38_spill] sm:$0xff] %v10015_v1  ;;  %v1299_v39 = vpop.permute.xlu1 %1298  ;;  %v10025_v45 = vpack.c.bf16 %v10015_v1, %v10012_v23  ;;  %v1088_v30 = vadd.f32 %v1087_v36, %v9614_v61  ;;  %v10052_v23 = vmul.f32 %v9756_v19, %v1020_v56  ;;  %v10072_v1 = vmul.f32 %v9784_v37, %v1026_v14 }
 0x28a   :  { %v10028_v9 = vadd.f32 %v1299_v39, %v9641_v52 }
 0x28b   :  { %12977 = vst [vmem:[#allocation39_spill] sm:$0xff] %v10025_v45  ;;  %v10031_v47 = vpop.f32.mrb[22].mxu1  ;;  %v10042_v52 = vmul.f32 %v9805_v35, %v1088_v30 }
 0x28c   :  { %v1093_v10 = vpop.f32.mrb[23].mxu1  ;;  %v10036_v28 = vpack.i.bf16 %v10028_v9, %v10009_v53 }
 0x28d   :  { %v1094_v13 = vadd.f32 %v1093_v10, %v9614_v61  ;;  %v1301_v12 = vpop.permute.xlu1 %1300  ;;  %12979 = vst [vmem:[#allocation41_spill] sm:$0xff] %v10042_v52 }
 0x28e   :  { %12978 = vst [vmem:[#allocation40_spill] sm:$0xff] %v10036_v28  ;;  %8016 = vrot.lane.b32.xlu1 %v10036_v28, %s8767_s6 }
 0x28f   :  { %v10045_v36 = vmul.f32 %v9811_v46, %v1094_v13  ;;  %v10047_v39 = vpop.f32.mrb[24].mxu1  ;;  %v10061_v13 = vadd.f32 %v1301_v12, %v9662_v42 }
 0x290   :  { %v1099_v10 = vpop.f32.mrb[25].mxu1 }
 0x291   :  { %12980 = vst [vmem:[#allocation42_spill] sm:$0xff] %v10045_v36  ;;  %v1303_v45 = vpop.permute.xlu1 %1302  ;;  %v10058_v30 = vpack.c.bf16 %v10045_v36, %v10042_v52  ;;  %v1100_v15 = vadd.f32 %v1099_v10, %v9614_v61  ;;  %v1032_v52 = vadd.f32 %v9857_v7, %v9607_v11 }
 0x292   :  { %v10064_v53 = vadd.f32 %v1303_v45, %v9685_v48  ;;  %1330 = vrot.lane.b32.xlu1 %v10052_v23, %s8765_s17 }
 0x293   :  { %12981 = vst [vmem:[#allocation43_spill] sm:$0xff] %v10058_v30  ;;  %v10069_v56 = vpop.f32.mrb[26].mxu1  ;;  %v10086_v12 = vmul.f32 %v9629_v8, %v1100_v15  ;;  %v10094_v14 = vmul.f32 %v9800_v43, %v1032_v52 }
 0x294   :  { %v1105_v36 = vpop.f32.mrb[27].mxu1  ;;  %v10078_v42 = vpack.i.bf16 %v10064_v53, %v10061_v13 }
 0x295   :  { %v1106_v48 = vadd.f32 %v1105_v36, %v9614_v61  ;;  %12983 = vst [vmem:[#allocation45_spill] sm:$0xff] %v10086_v12  ;;  %v1038_v36 = vadd.f32 %v9905_v34, %v9607_v11 }
 0x296   :  { %12982 = vst [vmem:[#allocation44_spill] sm:$0xff] %v10078_v42  ;;  %8021 = vrot.lane.b32.xlu0 %v10078_v42, %s8767_s6  ;;  %1332 = vrot.lane.b32.xlu1 %v10072_v1, %s8765_s17  ;;  %v1305_v42 = vpop.permute.xlu1 %1304 }
 0x297   :  { %v10089_v45 = vmul.f32 %v9635_v16, %v1106_v48  ;;  %v10091_v7 = vpop.f32.mrb[28].mxu1  ;;  %v10110_v48 = vmul.f32 %v9612_v6, %v1038_v36  ;;  %v10113_v34 = vadd.f32 %v1305_v42, %v9706_v54 }
 0x298   :  { %v1111_v10 = vpop.f32.mrb[29].mxu1 }
 0x299   :  { %12984 = vst [vmem:[#allocation46_spill] sm:$0xff] %v10089_v45  ;;  %v10102_v8 = vpack.c.bf16 %v10089_v45, %v10086_v12  ;;  %v1112_v16 = vadd.f32 %v1111_v10, %v9614_v61  ;;  %v1307_v15 = vpop.permute.xlu0 %1306  ;;  %v1044_v45 = vadd.f32 %v9916_v51, %v9607_v11 }
 0x29a   :  { %1334 = vrot.lane.b32.xlu0 %v10094_v14, %s8765_s17  ;;  %v10116_v30 = vadd.f32 %v1307_v15, %v9729_v4 }
 0x29b   :  { %12985 = vst [vmem:[#allocation47_spill] sm:$0xff] %v10102_v8  ;;  %v10107_v52 = vpop.f32.mrb[30].mxu1  ;;  %v10128_v36 = vmul.f32 %v9673_v44, %v1112_v16  ;;  %v10144_v44 = vmul.f32 %v9624_v17, %v1044_v45 }
 0x29c   :  { %v1117_v28 = vpop.f32.mrb[31].mxu1  ;;  %v10125_v10 = vpack.i.bf16 %v10116_v30, %v10113_v34 }
 0x29d   :  { %v1118_v12 = vadd.f32 %v1117_v28, %v9614_v61  ;;  %12987 = vst [vmem:[#allocation49_spill] sm:$0xff] %v10128_v36  ;;  %v1309_v42 = vpop.permute.xlu1 %1308 }
 0x29e   :  { %1336 = vrot.lane.b32.xlu0 %v10110_v48, %s8765_s17  ;;  %12986 = vst [vmem:[#allocation48_spill] sm:$0xff] %v10125_v10  ;;  %8026 = vrot.lane.b32.xlu1 %v10125_v10, %s8767_s6  ;;  %v10152_v10 = vadd.f32 %v1309_v42, %v9750_v59 }
 0x29f   :  { %v10131_v54 = vmul.f32 %v9681_v41, %v1118_v12  ;;  %v10133_v4 = vpop.f32.mrb[32].mxu1  ;;  %v1050_v41 = vadd.f32 %v9943_v38, %v9607_v11  ;;  %v1056_v38 = vadd.f32 %v9969_v32, %v9607_v11 }
 0x2a0   :  { %v1123_v28 = vpop.f32.mrb[33].mxu1 }
 0x2a1   :  { %12988 = vst [vmem:[#allocation50_spill] sm:$0xff] %v10131_v54  ;;  %v10141_v15 = vpack.c.bf16 %v10131_v54, %v10128_v36  ;;  %v1124_v12 = vadd.f32 %v1123_v28, %v9614_v61  ;;  %v1311_v16 = vpop.permute.xlu0 %1310  ;;  %v10161_v54 = vmul.f32 %v9652_v3, %v1050_v41 }
 0x2a2   :  { %v10155_v51 = vadd.f32 %v1311_v16, %v9773_v27  ;;  %1338 = vrot.lane.b32.xlu1 %v10144_v44, %s8765_s17 }
 0x2a3   :  { %12989 = vst [vmem:[#allocation51_spill] sm:$0xff] %v10141_v15  ;;  %v10149_v8 = vpop.f32.mrb[34].mxu1  ;;  %v10170_v59 = vmul.f32 %v9719_v60, %v1124_v12  ;;  %v1062_v12 = vadd.f32 %v9978_v57, %v9607_v11  ;;  %v1068_v57 = vadd.f32 %v9987_v40, %v9607_v11 }
 0x2a4   :  { %v1129_v36 = vpop.f32.mrb[35].mxu1  ;;  %v10167_v28 = vpack.i.bf16 %v10155_v51, %v10152_v10 }
 0x2a5   :  { %v1130_v45 = vadd.f32 %v1129_v36, %v9614_v61  ;;  %12991 = vst [vmem:[#allocation53_spill] sm:$0xff] %v10170_v59  ;;  %v1313_v41 = vpop.permute.xlu1 %1312 }
 0x2a6   :  { %12990 = vst [vmem:[#allocation52_spill] sm:$0xff] %v10167_v28  ;;  %1340 = vrot.lane.b32.xlu1 %v10161_v54, %s8765_s17  ;;  %8031 = vrot.lane.b32.xlu0 %v10167_v28, %s8767_s6  ;;  %v10196_v28 = vadd.f32 %v1313_v41, %v9794_v18 }
 0x2a7   :  { %v10173_v27 = vmul.f32 %v9725_v49, %v1130_v45  ;;  %v10175_v42 = vpop.f32.mrb[36].mxu1  ;;  %v10188_v49 = vmul.f32 %v9668_v63, %v1056_v38 }
 0x2a8   :  { %v1135_v36 = vpop.f32.mrb[37].mxu1 }
 0x2a9   :  { %12992 = vst [vmem:[#allocation54_spill] sm:$0xff] %v10173_v27  ;;  %v10185_v60 = vpack.c.bf16 %v10173_v27, %v10170_v59  ;;  %v1136_v16 = vadd.f32 %v1135_v36, %v9614_v61  ;;  %v1315_v45 = vpop.permute.xlu0 %1314  ;;  %v10205_v27 = vmul.f32 %v9696_v21, %v1062_v12 }
 0x2aa   :  { %v10199_v32 = vadd.f32 %v1315_v45, %v9817_v29  ;;  %1342 = vrot.lane.b32.xlu0 %v10188_v49, %s8765_s17 }
 0x2ab   :  { %12993 = vst [vmem:[#allocation55_spill] sm:$0xff] %v10185_v60  ;;  %v10193_v15 = vpop.f32.mrb[38].mxu1  ;;  %v10214_v18 = vmul.f32 %v9761_v22, %v1136_v16  ;;  %v1074_v16 = vadd.f32 %v9996_v55, %v9607_v11  ;;  %v1086_v55 = vadd.f32 %v10017_v31, %v9607_v11  ;;  %v1098_v31 = vadd.f32 %v10047_v39, %v9607_v11 }
 0x2ac   :  { %v1141_v59 = vpop.f32.mrb[39].mxu1  ;;  %v10211_v36 = vpack.i.bf16 %v10199_v32, %v10196_v28 }
 0x2ad   :  { %v1142_v38 = vadd.f32 %v1141_v59, %v9614_v61  ;;  %12994 = vst [vmem:[#allocation56_spill] sm:$0xff] %v10214_v18  ;;  %v1317_v12 = vpop.permute.xlu1 %1316  ;;  %v10245_v40 = vmul.f32 %v9740_v5, %v1074_v16 }
 0x2ae   :  { %1344 = vrot.lane.b32.xlu0 %v10205_v27, %s8765_s17  ;;  %8036 = vrot.lane.b32.xlu1 %v10211_v36, %s8767_s6 }
 0x2af   :  { %v10217_v29 = vmul.f32 %v9769_v26, %v1142_v38  ;;  %v10219_v41 = vpop.f32.mrb[40].mxu1  ;;  %v10232_v26 = vmul.f32 %v9712_v62, %v1068_v57  ;;  %v10237_v38 = vadd.f32 %v1317_v12, %v9833_v2  ;;  %v1080_v57 = vadd.f32 %v10005_v58, %v9607_v11 }
 0x2b0   :  { %v1147_v59 = vpop.f32.mrb[41].mxu1 }
 0x2b1   :  { %12995 = vst [vmem:[#allocation57_spill] sm:$0xff] %v10217_v29  ;;  %v10229_v22 = vpack.c.bf16 %v10217_v29, %v10214_v18  ;;  %v1319_v45 = vpop.permute.xlu0 %1318 }
 0x2b2   :  { %v10240_v60 = vadd.f32 %v1319_v45, %v9843_v25  ;;  %1346 = vrot.lane.b32.xlu1 %v10232_v26, %s8765_s17  ;;  %v10258_v25 = vmul.f32 %v9756_v19, %v1080_v57  ;;  %v10271_v45 = vmul.f32 %v9784_v37, %v1086_v55  ;;  %v1092_v57 = vadd.f32 %v10031_v47, %v9607_v11 }
 0x2b3   :  { %12996 = vst [vmem:[#allocation58_spill] sm:$0xff] %v10229_v22 }
 0x2b4   :  { %v10251_v18 = vpack.i.bf16 %v10240_v60, %v10237_v38 }
 0x2b5   :  { %v1321_v2 = vpop.permute.xlu1 %1320 }
 0x2b6   :  { %1348 = vrot.lane.b32.xlu1 %v10245_v40, %s8765_s17  ;;  %8041 = vrot.lane.b32.xlu0 %v10251_v18, %s8767_s6  ;;  %v10263_v58 = vadd.f32 %v1321_v2, %v9864_v50  ;;  %v10284_v50 = vmul.f32 %v9800_v43, %v1092_v57  ;;  %v1104_v57 = vadd.f32 %v10069_v56, %v9607_v11 }
 0x2b9   :  { %v1323_v12 = vpop.permute.xlu0 %1322 }
 0x2ba   :  { %v10266_v16 = vadd.f32 %v1323_v12, %v9879_v20  ;;  %1350 = vrot.lane.b32.xlu0 %v10258_v25, %s8765_s17  ;;  %v10297_v12 = vmul.f32 %v9612_v6, %v1098_v31  ;;  %v1110_v6 = vadd.f32 %v10091_v7, %v9607_v11 }
 0x2bc   :  { %v10277_v29 = vpack.i.bf16 %v10266_v16, %v10263_v58 }
 0x2bd   :  { %v1325_v20 = vpop.permute.xlu1 %1324 }
 0x2be   :  { %1352 = vrot.lane.b32.xlu0 %v10271_v45, %s8765_s17  ;;  %8046 = vrot.lane.b32.xlu1 %v10277_v29, %s8767_s6  ;;  %v10289_v47 = vadd.f32 %v1325_v20, %v9903_v33  ;;  %v1148_v33 = vadd.f32 %v1147_v59, %v9614_v61  ;;  %v10320_v20 = vmul.f32 %v9652_v3, %v1110_v6 }
 0x2c1   :  { %v1327_v2 = vpop.permute.xlu0 %1326 }
 0x2c2   :  { %v10292_v55 = vadd.f32 %v1327_v2, %v9913_v24  ;;  %1354 = vrot.lane.b32.xlu1 %v10284_v50, %s8765_s17  ;;  %v10310_v24 = vmul.f32 %v9624_v17, %v1104_v57  ;;  %v10324_v2 = vmul.f32 %v9805_v35, %v1148_v33 }
 0x2c4   :  { %12997 = vst [vmem:[#allocation59_spill] sm:$0xff] %v10292_v55  ;;  %v10303_v22 = vpack.i.bf16 %v10292_v55, %v10289_v47  ;;  %12998 = vst [vmem:[#allocation60_spill] sm:$0xff] %v10324_v2 }
 0x2c6   :  { %1356 = vrot.lane.b32.xlu1 %v10297_v12, %s8765_s17  ;;  %8051 = vrot.lane.b32.xlu0 %v10303_v22, %s8767_s6 }
 0x2ca   :  { %1358 = vrot.lane.b32.xlu0 %v10310_v24, %s8765_s17 }
 0x2cb   :  { %v10317_v39 = vpop.f32.mrb[42].mxu1 }
 0x2cc   :  { %v1153_v56 = vpop.f32.mrb[43].mxu1 }
 0x2cd   :  { %v1154_v31 = vadd.f32 %v1153_v56, %v9614_v61  ;;  %v1329_v61 = vpop.permute.xlu0 %1328 }
 0x2ce   :  { %1360 = vrot.lane.b32.xlu0 %v10320_v20, %s8765_s17  ;;  %v10344_v56 = vadd.f32 %v1329_v61, %v9938_v0 }
 0x2cf   :  { %v10327_v17 = vmul.f32 %v9811_v46, %v1154_v31 }
 0x2d0   :  { %13002 = vst [vmem:[#allocation62_spill] sm:$0xff] %v10344_v56 }
 0x2d1   :  { %12999 = vst [vmem:[#allocation61_spill] sm:$0xff] %v10327_v17  ;;  %v10335_v59 = vpack.c.bf16 %v10327_v17, %v10324_v2 }
 0x300   :  { %v8017_v3 = vpop.permute.xlu1 %8016 }
 0x301   :  { %v8019_v57 = vunpack.i.h.bf16 %v8017_v3  ;;  %v8018_v6 = vunpack.i.l.bf16 %v8017_v3  ;;  %v1116_v3 = vadd.f32 %v10107_v52, %v9607_v11 }
 0x303   :  { %v7558_v46 = vpack.c.bf16 %v8019_v57, %v8018_v6  ;;  %v10362_v61 = vmul.f32 %v9668_v63, %v1116_v3 }
 0x304   :  { %v1331_v33 = vpop.permute.xlu1 %1330 }
 0x305   :  { %v10347_v31 = vadd.f32 %v1331_v33, %v10052_v23  ;;  %7560 = vmatprep.subr.msk.bf16.mxu1 %vm10339_vm2, %v7558_v46 }
 0x306   :  { %7563 = vmatpush3.bf16.xpose.msk.msra.mxu1 %vm10339_vm2, %v7558_v46  ;;  %v1122_v46 = vadd.f32 %v10133_v4, %v9607_v11  ;;  %v1128_v4 = vadd.f32 %v10149_v8, %v9607_v11 }
 0x307   :  { %v10357_v7 = vpack.i.bf16 %v10347_v31, %v10344_v56 }
 0x308   :  { %v8022_v57 = vpop.permute.xlu0 %8021  ;;  %v1333_v23 = vpop.permute.xlu1 %1332  ;;  %v10379_v63 = vmul.f32 %v9696_v21, %v1122_v46  ;;  %v1134_v21 = vadd.f32 %v10175_v42, %v9607_v11  ;;  %v1140_v42 = vadd.f32 %v10193_v15, %v9607_v11  ;;  %v1146_v15 = vadd.f32 %v10219_v41, %v9607_v11 }
 0x309   :  { %v8024_v6 = vunpack.i.h.bf16 %v8022_v57  ;;  %v8023_v0 = vunpack.i.l.bf16 %v8022_v57  ;;  %8056 = vrot.lane.b32.xlu1 %v10357_v7, %s8767_s6  ;;  %v10367_v52 = vadd.f32 %v1333_v23, %v10072_v1  ;;  %v1152_v41 = vadd.f32 %v10317_v39, %v9607_v11 }
 0x30a   :  { %v10399_v23 = vmul.f32 %v9740_v5, %v1134_v21 }
 0x30b   :  { %v7564_v33 = vpack.c.bf16 %v8024_v6, %v8023_v0  ;;  %13003 = vst [vmem:[#allocation63_spill] sm:$0xff] %v10367_v52 }
 0x30c   :  { %v1335_v2 = vpop.permute.xlu0 %1334 }
 0x30d   :  { %v10370_v17 = vadd.f32 %v1335_v2, %v10094_v14  ;;  %1362 = vrot.lane.b32.xlu1 %v10362_v61, %s8765_s17  ;;  %7566 = vmatprep.subr.msk.bf16.mxu1 %vm10339_vm2, %v7564_v33  ;;  %v10392_v2 = vmul.f32 %v9712_v62, %v1128_v4 }
 0x30e   :  { %7569 = vmatpush3.bf16.xpose.msk.msra.mxu1 %vm10339_vm2, %v7564_v33 }
 0x30f   :  { %13004 = vst [vmem:[#allocation64_spill] sm:$0xff] %v10370_v17  ;;  %v10385_v1 = vpack.i.bf16 %v10370_v17, %v10367_v52 }
 0x310   :  { %v8027_v14 = vpop.permute.xlu1 %8026  ;;  %v1337_v8 = vpop.permute.xlu0 %1336 }
 0x311   :  { %1364 = vrot.lane.b32.xlu1 %v10379_v63, %s8765_s17  ;;  %8061 = vrot.lane.b32.xlu0 %v10385_v1, %s8767_s6  ;;  %v8029_v3 = vunpack.i.h.bf16 %v8027_v14  ;;  %v8028_v57 = vunpack.i.l.bf16 %v8027_v14  ;;  %v10402_v46 = vadd.f32 %v1337_v8, %v10110_v48  ;;  %v10422_v14 = vmul.f32 %v9756_v19, %v1140_v42 }
 0x312   :  { %v10439_v19 = vmul.f32 %v9784_v37, %v1146_v15  ;;  %v10452_v37 = vmul.f32 %v9800_v43, %v1152_v41 }
 0x313   :  { %v7570_v6 = vpack.c.bf16 %v8029_v3, %v8028_v57  ;;  %13005 = vst [vmem:[#allocation65_spill] sm:$0xff] %v10402_v46 }
 0x314   :  { %v1339_v0 = vpop.permute.xlu1 %1338 }
 0x315   :  { %1366 = vrot.lane.b32.xlu0 %v10392_v2, %s8765_s17  ;;  %v10405_v62 = vadd.f32 %v1339_v0, %v10144_v44  ;;  %7572 = vmatprep.subr.msk.bf16.mxu1 %vm10339_vm2, %v7570_v6 }
 0x316   :  { %7575 = vmatpush3.bf16.xpose.msk.msra.mxu1 %vm10339_vm2, %v7570_v6 }
 0x317   :  { %13006 = vst [vmem:[#allocation66_spill] sm:$0xff] %v10405_v62  ;;  %v10417_v5 = vpack.i.bf16 %v10405_v62, %v10402_v46 }
 0x318   :  { %v8032_v48 = vpop.permute.xlu0 %8031  ;;  %v1341_v4 = vpop.permute.xlu1 %1340 }
 0x319   :  { %1368 = vrot.lane.b32.xlu0 %v10399_v23, %s8765_s17  ;;  %v8034_v33 = vunpack.i.h.bf16 %v8032_v48  ;;  %v8033_v44 = vunpack.i.l.bf16 %v8032_v48  ;;  %8066 = vrot.lane.b32.xlu1 %v10417_v5, %s8767_s6  ;;  %v10427_v57 = vadd.f32 %v1341_v4, %v10161_v54 }
 0x31b   :  { %v7576_v21 = vpack.c.bf16 %v8034_v33, %v8033_v44  ;;  %13007 = vst [vmem:[#allocation67_spill] sm:$0xff] %v10427_v57 }
 0x31c   :  { %v1343_v3 = vpop.permute.xlu0 %1342 }
 0x31d   :  { %v10430_v8 = vadd.f32 %v1343_v3, %v10188_v49  ;;  %1370 = vrot.lane.b32.xlu1 %v10422_v14, %s8765_s17  ;;  %7578 = vmatprep.subr.msk.bf16.mxu1 %vm10339_vm2, %v7576_v21 }
 0x31e   :  { %7581 = vmatpush3.bf16.xpose.msk.msra.mxu1 %vm10339_vm2, %v7576_v21 }
 0x31f   :  { %13008 = vst [vmem:[#allocation68_spill] sm:$0xff] %v10430_v8  ;;  %v10445_v54 = vpack.i.bf16 %v10430_v8, %v10427_v57 }
 0x320   :  { %v8037_v49 = vpop.permute.xlu1 %8036  ;;  %v1345_v42 = vpop.permute.xlu0 %1344 }
 0x321   :  { %v8039_v6 = vunpack.i.h.bf16 %v8037_v49  ;;  %v8038_v0 = vunpack.i.l.bf16 %v8037_v49  ;;  %1372 = vrot.lane.b32.xlu1 %v10439_v19, %s8765_s17  ;;  %8071 = vrot.lane.b32.xlu0 %v10445_v54, %s8767_s6  ;;  %v10455_v11 = vadd.f32 %v1345_v42, %v10205_v27 }
 0x323   :  { %v7582_v48 = vpack.c.bf16 %v8039_v6, %v8038_v0  ;;  %13009 = vst [vmem:[#allocation69_spill] sm:$0xff] %v10455_v11 }
 0x324   :  { %v1347_v33 = vpop.permute.xlu1 %1346 }
 0x325   :  { %v10458_v39 = vadd.f32 %v1347_v33, %v10232_v26  ;;  %1374 = vrot.lane.b32.xlu0 %v10452_v37, %s8765_s17  ;;  %7584 = vmatprep.subr.msk.bf16.mxu1 %vm10339_vm2, %v7582_v48  ;;  %s8768_s17 = smov 48  }
 0x326   :  { %7587 = vmatpush3.bf16.xpose.msk.msra.mxu1 %vm10339_vm2, %v7582_v48 }
 0x327   :  { %13010 = vst [vmem:[#allocation70_spill] sm:$0xff] %v10458_v39  ;;  %v10468_v43 = vpack.i.bf16 %v10458_v39, %v10455_v11 }
 0x328   :  { %v8042_v44 = vpop.permute.xlu0 %8041  ;;  %v1349_v26 = vpop.permute.xlu1 %1348 }
 0x329   :  { %v8044_v4 = vunpack.i.h.bf16 %v8042_v44  ;;  %v8043_v27 = vunpack.i.l.bf16 %v8042_v44  ;;  %8076 = vrot.lane.b32.xlu1 %v10468_v43, %s8767_s6  ;;  %v10473_v3 = vadd.f32 %v1349_v26, %v10245_v40 }
 0x32b   :  { %v7588_v15 = vpack.c.bf16 %v8044_v4, %v8043_v27  ;;  %13011 = vst [vmem:[#allocation71_spill] sm:$0xff] %v10473_v3 }
 0x32c   :  { %v1351_v21 = vpop.permute.xlu0 %1350 }
 0x32d   :  { %v10476_v41 = vadd.f32 %v1351_v21, %v10258_v25  ;;  %6883 = vmatmul.mubr.msk.f32.vlgmr.msra.gmra.mrb[44].mxu1 %vm1500_vm1, %v10028_v9  ;;  %7590 = vmatprep.subr.msk.bf16.mxu1 %vm10339_vm2, %v7588_v15 }
 0x32e   :  { %6885 = vmatprep.mubr.msk.f32.mxu1 %vm1500_vm1, %v10061_v13  ;;  %7593 = vmatpush3.bf16.xpose.msk.msra.mxu1 %vm10339_vm2, %v7588_v15 }
 0x32f   :  { %13012 = vst [vmem:[#allocation72_spill] sm:$0xff] %v10476_v41  ;;  %v10488_v49 = vpack.i.bf16 %v10476_v41, %v10473_v3 }
 0x330   :  { %v8047_v40 = vpop.permute.xlu1 %8046  ;;  %v1353_v0 = vpop.permute.xlu0 %1352 }
 0x331   :  { %v8049_v6 = vunpack.i.h.bf16 %v8047_v40  ;;  %v8048_v25 = vunpack.i.l.bf16 %v8047_v40  ;;  %8081 = vrot.lane.b32.xlu0 %v10488_v49, %s8767_s6  ;;  %6886 = vmatmul.mubr.msk.f32.gmra.mrb[46].mxu1 %vm1500_vm1, %v10064_v53  ;;  %v10497_v33 = vadd.f32 %v1353_v0, %v10271_v45 }
 0x332   :  { %6888 = vmatprep.mubr.msk.f32.mxu1 %vm1500_vm1, %v10113_v34 }
 0x333   :  { %v7594_v42 = vpack.c.bf16 %v8049_v6, %v8048_v25  ;;  %13013 = vst [vmem:[#allocation73_spill] sm:$0xff] %v10497_v33 }
 0x334   :  { %v1355_v48 = vpop.permute.xlu1 %1354 }
 0x335   :  { %v10500_v44 = vadd.f32 %v1355_v48, %v10284_v50  ;;  %6889 = vmatmul.mubr.msk.f32.gmra.mrb[48].mxu1 %vm1500_vm1, %v10116_v30  ;;  %7596 = vmatprep.subr.msk.bf16.mxu1 %vm10339_vm2, %v7594_v42 }
 0x336   :  { %6891 = vmatprep.mubr.msk.f32.mxu1 %vm1500_vm1, %v10152_v10  ;;  %7599 = vmatpush3.bf16.xpose.msk.msra.mxu1 %vm10339_vm2, %v7594_v42 }
 0x337   :  { %13014 = vst [vmem:[#allocation74_spill] sm:$0xff] %v10500_v44  ;;  %v10512_v4 = vpack.i.bf16 %v10500_v44, %v10497_v33 }
 0x338   :  { %v8052_v45 = vpop.permute.xlu0 %8051  ;;  %v1357_v26 = vpop.permute.xlu1 %1356 }
 0x339   :  { %v8054_v27 = vunpack.i.h.bf16 %v8052_v45  ;;  %v8053_v50 = vunpack.i.l.bf16 %v8052_v45  ;;  %8086 = vrot.lane.b32.xlu1 %v10512_v4, %s8767_s6  ;;  %6892 = vmatmul.mubr.msk.f32.gmra.mrb[50].mxu1 %vm1500_vm1, %v10155_v51  ;;  %v10521_v40 = vadd.f32 %v1357_v26, %v10297_v12 }
 0x33a   :  { %6894 = vmatprep.mubr.msk.f32.mxu1 %vm1500_vm1, %v10196_v28 }
 0x33b   :  { %v7600_v15 = vpack.c.bf16 %v8054_v27, %v8053_v50  ;;  %13015 = vst [vmem:[#allocation75_spill] sm:$0xff] %v10521_v40 }
 0x33c   :  { %v1359_v21 = vpop.permute.xlu0 %1358 }
 0x33d   :  { %v10524_v6 = vadd.f32 %v1359_v21, %v10310_v24  ;;  %6895 = vmatmul.mubr.msk.f32.gmra.mrb[52].mxu1 %vm1500_vm1, %v10199_v32  ;;  %7602 = vmatprep.subr.msk.bf16.mxu1 %vm10339_vm2, %v7600_v15 }
 0x33e   :  { %7605 = vmatpush3.bf16.xpose.msk.msra.mxu1 %vm10339_vm2, %v7600_v15  ;;  %6917 = vmatprep.mubr.msk.f32.mxu1 %vm1500_vm1, %v10237_v38 }
 0x33f   :  { %13016 = vst [vmem:[#allocation76_spill] sm:$0xff] %v10524_v6  ;;  %v10536_v25 = vpack.i.bf16 %v10524_v6, %v10521_v40 }
 0x340   :  { %v1361_v42 = vpop.permute.xlu0 %1360 }
 0x341   :  { %8091 = vrot.lane.b32.xlu0 %v10536_v25, %s8767_s6  ;;  %v10541_v27 = vadd.f32 %v1361_v42, %v10320_v20 }
 0x343   :  { %13017 = vst [vmem:[#allocation77_spill] sm:$0xff] %v10541_v27 }
 0x37b   :  { %v8057_v12 = vpop.permute.xlu1 %8056 }
 0x37c   :  { %v8059_v24 = vunpack.i.h.bf16 %v8057_v12  ;;  %v8058_v0 = vunpack.i.l.bf16 %v8057_v12 }
 0x37e   :  { %v7606_v48 = vpack.c.bf16 %v8059_v24, %v8058_v0 }
 0x37f   :  { %v1363_v45 = vpop.permute.xlu1 %1362 }
 0x380   :  { %v10544_v50 = vadd.f32 %v1363_v45, %v10362_v61  ;;  %7608 = vmatprep.subr.msk.bf16.mxu1 %vm10339_vm2, %v7606_v48 }
 0x381   :  { %7611 = vmatpush3.bf16.xpose.msk.msra.mxu1 %vm10339_vm2, %v7606_v48 }
 0x382   :  { %13018 = vst [vmem:[#allocation78_spill] sm:$0xff] %v10544_v50  ;;  %v10552_v26 = vpack.i.bf16 %v10544_v50, %v10541_v27 }
 0x383   :  { %v8062_v15 = vpop.permute.xlu0 %8061  ;;  %v1365_v20 = vpop.permute.xlu1 %1364 }
 0x384   :  { %13019 = vst [vmem:[#allocation79_spill] sm:$0xff] %v10552_v26  ;;  %v8064_v21 = vunpack.i.h.bf16 %v8062_v15  ;;  %v8063_v12 = vunpack.i.l.bf16 %v8062_v15  ;;  %8096 = vrot.lane.b32.xlu1 %v10552_v26, %s8767_s6  ;;  %v10557_v0 = vadd.f32 %v1365_v20, %v10379_v63 }
 0x386   :  { %v7612_v24 = vpack.c.bf16 %v8064_v21, %v8063_v12  ;;  %13020 = vst [vmem:[#allocation80_spill] sm:$0xff] %v10557_v0 }
 0x387   :  { %v1367_v61 = vpop.permute.xlu0 %1366 }
 0x388   :  { %v10560_v42 = vadd.f32 %v1367_v61, %v10392_v2  ;;  %7614 = vmatprep.subr.msk.bf16.mxu1 %vm10339_vm2, %v7612_v24 }
 0x389   :  { %7617 = vmatpush3.bf16.xpose.msk.msra.mxu1 %vm10339_vm2, %v7612_v24 }
 0x38a   :  { %13021 = vst [vmem:[#allocation81_spill] sm:$0xff] %v10560_v42  ;;  %v10568_v48 = vpack.i.bf16 %v10560_v42, %v10557_v0 }
 0x38b   :  { %v8067_v45 = vpop.permute.xlu1 %8066  ;;  %v1369_v21 = vpop.permute.xlu0 %1368 }
 0x38c   :  { %13022 = vst [vmem:[#allocation82_spill] sm:$0xff] %v10568_v48  ;;  %8101 = vrot.lane.b32.xlu0 %v10568_v48, %s8767_s6  ;;  %v8069_v15 = vunpack.i.h.bf16 %v8067_v45  ;;  %v8068_v63 = vunpack.i.l.bf16 %v8067_v45  ;;  %v10577_v20 = vadd.f32 %v1369_v21, %v10399_v23 }
 0x38e   :  { %v7618_v12 = vpack.c.bf16 %v8069_v15, %v8068_v63  ;;  %13023 = vst [vmem:[#allocation83_spill] sm:$0xff] %v10577_v20 }
 0x38f   :  { %v1371_v2 = vpop.permute.xlu1 %1370 }
 0x390   :  { %6918 = vmatmul.mubr.msk.f32.vlgmr.msra.gmra.mrb[54].mxu1 %vm1500_vm1, %v10240_v60  ;;  %v10580_v24 = vadd.f32 %v1371_v2, %v10422_v14  ;;  %7620 = vmatprep.subr.msk.bf16.mxu1 %vm10339_vm2, %v7618_v12 }
 0x391   :  { %6920 = vmatprep.mubr.msk.f32.mxu1 %vm1500_vm1, %v10263_v58  ;;  %7623 = vmatpush3.bf16.xpose.msk.msra.mxu1 %vm10339_vm2, %v7618_v12 }
 0x392   :  { %13024 = vst [vmem:[#allocation84_spill] sm:$0xff] %v10580_v24  ;;  %v10588_v61 = vpack.i.bf16 %v10580_v24, %v10577_v20 }
 0x393   :  { %v8072_v45 = vpop.permute.xlu0 %8071  ;;  %v1373_v15 = vpop.permute.xlu1 %1372 }
 0x394   :  { %13025 = vst [vmem:[#allocation85_spill] sm:$0xff] %v10588_v61  ;;  %6921 = vmatmul.mubr.msk.f32.gmra.mrb[56].mxu1 %vm1500_vm1, %v10266_v16  ;;  %v8074_v23 = vunpack.i.h.bf16 %v8072_v45  ;;  %v8073_v14 = vunpack.i.l.bf16 %v8072_v45  ;;  %8106 = vrot.lane.b32.xlu1 %v10588_v61, %s8767_s6  ;;  %v10601_v12 = vadd.f32 %v1373_v15, %v10439_v19  ;;  %v13028_v45 = vld [vmem:[#allocation40_spill] sm:$0xff] }
 0x395   :  { %6923 = vmatprep.mubr.msk.f32.mxu1 %vm1500_vm1, %v10289_v47  ;;  %v13030_v15 = vld [vmem:[#allocation48_spill] sm:$0xff] }
 0x396   :  { %v7624_v63 = vpack.c.bf16 %v8074_v23, %v8073_v14  ;;  %13026 = vst [vmem:[#allocation86_spill] sm:$0xff] %v10601_v12 }
 0x397   :  { %v1375_v21 = vpop.permute.xlu0 %1374 }
 0x398   :  { %6924 = vmatmul.mubr.msk.f32.gmra.mrb[58].mxu1 %vm1500_vm1, %v10292_v55  ;;  %v10604_v2 = vadd.f32 %v1375_v21, %v10452_v37  ;;  %8116 = vrot.lane.b32.xlu1 %v13028_v45, %s8768_s17  ;;  %v13031_v21 = vld [vmem:[#allocation52_spill] sm:$0xff] }
 0x399   :  { %6926 = vmatprep.mubr.msk.f32.mxu1 %vm1500_vm1, %v10344_v56  ;;  %7626 = vmatprep.subr.msk.bf16.mxu1 %vm10339_vm2, %v7624_v63  ;;  %v13032_v45 = vld [vmem:[#allocation44_spill] sm:$0xff] }
 0x39a   :  { %13027 = vst [vmem:[#allocation87_spill] sm:$0xff] %v10604_v2  ;;  %7629 = vmatpush3.bf16.xpose.msk.msra.mxu1 %vm10339_vm2, %v7624_v63  ;;  %v10614_v23 = vpack.i.bf16 %v10604_v2, %v10601_v12 }
 0x39b   :  { %v8077_v19 = vpop.permute.xlu1 %8076 }
 0x39c   :  { %13029 = vst [vmem:[#allocation40_spill] sm:$0xff] %v10614_v23  ;;  %6927 = vmatmul.mubr.msk.f32.gmra.mrb[60].mxu1 %vm1500_vm1, %v10347_v31  ;;  %v8079_v37 = vunpack.i.h.bf16 %v8077_v19  ;;  %v8078_v14 = vunpack.i.l.bf16 %v8077_v19  ;;  %8126 = vrot.lane.b32.xlu1 %v13030_v15, %s8768_s17 }
 0x39d   :  { %6929 = vmatprep.mubr.msk.f32.mxu1 %vm1500_vm1, %v10367_v52  ;;  %8111 = vrot.lane.b32.xlu0 %v10614_v23, %s8767_s6 }
 0x39e   :  { %v7630_v63 = vpack.c.bf16 %v8079_v37, %v8078_v14 }
 0x3a0   :  { %6930 = vmatmul.mubr.msk.f32.gmra.mrb[62].mxu1 %vm1500_vm1, %v10370_v17  ;;  %8136 = vrot.lane.b32.xlu1 %v13031_v21, %s8768_s17 }
 0x3a1   :  { %6952 = vmatprep.mubr.msk.f32.mxu1 %vm1500_vm1, %v10402_v46  ;;  %8121 = vrot.lane.b32.xlu0 %v13032_v45, %s8768_s17 }
 0x3a2   :  { %7632 = vmatprep.subr.msk.bf16.mxu1 %vm10339_vm2, %v7630_v63 }
 0x3a3   :  { %7635 = vmatpush3.bf16.xpose.msk.msra.mxu1 %vm10339_vm2, %v7630_v63  ;;  %v8082_v19 = vpop.permute.xlu0 %8081 }
 0x3a4   :  { %v8084_v37 = vunpack.i.h.bf16 %v8082_v19  ;;  %v8083_v14 = vunpack.i.l.bf16 %v8082_v19  ;;  %8146 = vrot.lane.b32.xlu1 %v10211_v36, %s8768_s17  ;;  %v13033_v36 = vld [vmem:[#allocation36_spill] sm:$0xff] }
 0x3a5   :  { %8131 = vrot.lane.b32.xlu0 %v10251_v18, %s8768_s17 }
 0x3a6   :  { %v7636_v15 = vpack.c.bf16 %v8084_v37, %v8083_v14 }
 0x3a8   :  { %8151 = vrot.lane.b32.xlu1 %v10303_v22, %s8768_s17  ;;  %7638 = vmatprep.subr.msk.bf16.mxu1 %vm10339_vm2, %v7636_v15 }
 0x3a9   :  { %8141 = vrot.lane.b32.xlu0 %v10277_v29, %s8768_s17 }
 0x3ab   :  { %7641 = vmatpush3.bf16.xpose.msk.msra.mxu1 %vm10339_vm2, %v7636_v15  ;;  %v8087_v63 = vpop.permute.xlu1 %8086 }
 0x3ac   :  { %v8089_v21 = vunpack.i.h.bf16 %v8087_v63  ;;  %v8088_v45 = vunpack.i.l.bf16 %v8087_v63  ;;  %3232 = vrot.lane.b32.xlu1 %v13033_v36, %s8769_s2  ;;  %v10761_v36 = vld [vmem:[%s12807_s7 + $0x28] sm:$0xff] }
 0x3ad   :  { %8156 = vrot.lane.b32.xlu0 %v10417_v5, %s8768_s17 }
 0x3ae   :  { %v7642_v18 = vpack.c.bf16 %v8089_v21, %v8088_v45 }
 0x3b0   :  { %3234 = vrot.lane.b32.xlu1 %v10028_v9, %s8769_s2  ;;  %7644 = vmatprep.subr.msk.bf16.mxu1 %vm10339_vm2, %v7642_v18 }
 0x3b1   :  { %3240 = vrot.lane.b32.xlu0 %v10113_v34, %s8769_s2 }
 0x3b3   :  { %7647 = vmatpush3.bf16.xpose.msk.msra.mxu1 %vm10339_vm2, %v7642_v18  ;;  %v8092_v29 = vpop.permute.xlu0 %8091 }
 0x3b4   :  { %v8094_v22 = vunpack.i.h.bf16 %v8092_v29  ;;  %v8093_v19 = vunpack.i.l.bf16 %v8092_v29  ;;  %8161 = vrot.lane.b32.xlu1 %v10357_v7, %s8768_s17 }
 0x3b5   :  { %8171 = vrot.lane.b32.xlu0 %v10385_v1, %s8768_s17 }
 0x3b6   :  { %v7648_v5 = vpack.c.bf16 %v8094_v22, %v8093_v19  ;;  %v10766_v22 = vld [vmem:[%s12807_s7 + $0x20] sm:$0xff] }
 0x3b8   :  { %3236 = vrot.lane.b32.xlu1 %v10061_v13, %s8769_s2  ;;  %7650 = vmatprep.subr.msk.bf16.mxu1 %vm10339_vm2, %v7648_v5 }
 0x3b9   :  { %3246 = vrot.lane.b32.xlu0 %v10155_v51, %s8769_s2 }
 0x3ba   :  { %6953 = vmatmul.mubr.msk.f32.vlgmr.msra.gmra.mrb[64].mxu1 %vm1500_vm1, %v10405_v62 }
 0x3bb   :  { %6955 = vmatprep.mubr.msk.f32.mxu1 %vm1500_vm1, %v10427_v57  ;;  %7653 = vmatpush3.bf16.xpose.msk.msra.mxu1 %vm10339_vm2, %v7648_v5 }
 0x3bc   :  { %3238 = vrot.lane.b32.xlu1 %v10064_v53, %s8769_s2 }
 0x3bd   :  { %3248 = vrot.lane.b32.xlu0 %v10196_v28, %s8769_s2  ;;  %v10721_v28 = vld [vmem:[%s12807_s7 + $0x8] sm:$0xff] }
 0x3be   :  { %6956 = vmatmul.mubr.msk.f32.gmra.mrb[66].mxu1 %vm1500_vm1, %v10430_v8 }
 0x3bf   :  { %6958 = vmatprep.mubr.msk.f32.mxu1 %vm1500_vm1, %v10455_v11 }
 0x3c0   :  { %8166 = vrot.lane.b32.xlu1 %v10445_v54, %s8768_s17 }
 0x3c1   :  { %8181 = vrot.lane.b32.xlu0 %v10536_v25, %s8768_s17  ;;  %v10748_v25 = vld [vmem:[%s12807_s7 + $0x10] sm:$0xff] }
 0x3c2   :  { %6959 = vmatmul.mubr.msk.f32.gmra.mrb[68].mxu1 %vm1500_vm1, %v10458_v39 }
 0x3c3   :  { %6961 = vmatprep.mubr.msk.f32.mxu1 %vm1500_vm1, %v10473_v3 }
 0x3c4   :  { %3242 = vrot.lane.b32.xlu1 %v10116_v30, %s8769_s2 }
 0x3c5   :  { %3429 = vrot.lane.b32.xlu0 %v10240_v60, %s8769_s2  ;;  %v10726_v60 = vld [vmem:[%s12807_s7] sm:$0xff] }
 0x3c6   :  { %6962 = vmatmul.mubr.msk.f32.gmra.mrb[70].mxu1 %vm1500_vm1, %v10476_v41 }
 0x3c7   :  { %6964 = vmatprep.mubr.msk.f32.mxu1 %vm1500_vm1, %v10497_v33 }
 0x3c8   :  { %3244 = vrot.lane.b32.xlu1 %v10152_v10, %s8769_s2 }
 0x3ca   :  { %6965 = vmatmul.mubr.msk.f32.gmra.mrb[72].mxu1 %vm1500_vm1, %v10500_v44 }
 0x3cb   :  { %6987 = vmatprep.mubr.msk.f32.mxu1 %vm1500_vm1, %v10521_v40 }
 0x3cc   :  { %8176 = vrot.lane.b32.xlu1 %v10468_v43, %s8768_s17  ;;  %v10741_v43 = vld [vmem:[%s12807_s7 + $0x18] sm:$0xff] }
 0x3d0   :  { %3250 = vrot.lane.b32.xlu1 %v10199_v32, %s8769_s2 }
 0x3d4   :  { %3427 = vrot.lane.b32.xlu1 %v10237_v38, %s8769_s2 }
 0x3d8   :  { %8186 = vrot.lane.b32.xlu1 %v10488_v49, %s8768_s17 }
 0x3f6   :  { %v8097_v53 = vpop.permute.xlu1 %8096 }
 0x3f7   :  { %v8099_v9 = vunpack.i.h.bf16 %v8097_v53  ;;  %v8098_v30 = vunpack.i.l.bf16 %v8097_v53 }
 0x3f9   :  { %v7654_v13 = vpack.c.bf16 %v8099_v9, %v8098_v30 }
 0x3fb   :  { %7656 = vmatprep.subr.msk.bf16.mxu1 %vm10339_vm2, %v7654_v13 }
 0x3fc   :  { %7659 = vmatpush3.bf16.xpose.msk.msra.mxu1 %vm10339_vm2, %v7654_v13 }
 0x3fe   :  { %v8102_v34 = vpop.permute.xlu0 %8101 }
 0x3ff   :  { %v8104_v10 = vunpack.i.h.bf16 %v8102_v34  ;;  %v8103_v51 = vunpack.i.l.bf16 %v8102_v34 }
 0x400   :  { %v6884_v38 = vpop.f32.mrb[44].mxu1 }
 0x401   :  { %v7660_v32 = vpack.c.bf16 %v8104_v10, %v8103_v51  ;;  %v10729_v7 = vadd.f32 %v6884_v38, %v10721_v28  ;;  %v1607_v1 = vpop.f32.mrb[45].mxu1  ;;  %v10781_v10 = vld [vmem:[%s12807_s7 + $0x38] sm:$0xff]  ;;  %v10788_v51 = vld [vmem:[%s12807_s7 + $0x30] sm:$0xff] }
 0x402   :  { %v10734_v54 = vadd.f32 %v1607_v1, %v10726_v60 }
 0x403   :  { %7662 = vmatprep.subr.msk.bf16.mxu1 %vm10339_vm2, %v7660_v32  ;;  %v2215_v49 = vsel %vm2211_vm3, %v10729_v7, -inf }
 0x404   :  { %7665 = vmatpush3.bf16.xpose.msk.msra.mxu1 %vm10339_vm2, %v7660_v32  ;;  %2216 = vmax.xlane.f32.xlu0 %v2215_v49  ;;  %v6887_v37 = vpop.f32.mrb[46].mxu1  ;;  %v2212_v14 = vsel %vm2211_vm3, %v10734_v54, -inf }
 0x405   :  { %v10753_v15 = vadd.f32 %v6887_v37, %v10741_v43  ;;  %v1617_v63 = vpop.f32.mrb[47].mxu1  ;;  %2213 = vmax.xlane.f32.xlu1 %v2212_v14 }
 0x406   :  { %v10756_v21 = vadd.f32 %v1617_v63, %v10748_v25  ;;  %v8107_v45 = vpop.permute.xlu1 %8106 }
 0x407   :  { %v8109_v18 = vunpack.i.h.bf16 %v8107_v45  ;;  %v8108_v29 = vunpack.i.l.bf16 %v8107_v45  ;;  %v2221_v19 = vsel %vm2211_vm3, %v10753_v15, -inf  ;;  %v10805_v45 = vld [vmem:[%s12807_s7 + $0x48] sm:$0xff] }
 0x408   :  { %v6890_v5 = vpop.f32.mrb[48].mxu1  ;;  %v2218_v53 = vsel %vm2211_vm3, %v10756_v21, -inf }
 0x409   :  { %v7666_v9 = vpack.c.bf16 %v8109_v18, %v8108_v29  ;;  %v10773_v30 = vadd.f32 %v6890_v5, %v10761_v36  ;;  %v1627_v13 = vpop.f32.mrb[49].mxu1  ;;  %2219 = vmax.xlane.f32.xlu0 %v2218_v53  ;;  %2222 = vmax.xlane.f32.xlu1 %v2221_v19 }
 0x40a   :  { %v10776_v34 = vadd.f32 %v1627_v13, %v10766_v22 }
 0x40b   :  { %7668 = vmatprep.subr.msk.bf16.mxu1 %vm10339_vm2, %v7666_v9  ;;  %v2227_v32 = vsel %vm2211_vm3, %v10773_v30, -inf }
 0x40c   :  { %v6893_v38 = vpop.f32.mrb[50].mxu1  ;;  %7671 = vmatpush3.bf16.xpose.msk.msra.mxu1 %vm10339_vm2, %v7666_v9  ;;  %v2224_v1 = vsel %vm2211_vm3, %v10776_v34, -inf }
 0x40d   :  { %v10797_v49 = vadd.f32 %v6893_v38, %v10781_v10  ;;  %v1637_v37 = vpop.f32.mrb[51].mxu1  ;;  %2225 = vmax.xlane.f32.xlu0 %v2224_v1  ;;  %2228 = vmax.xlane.f32.xlu1 %v2227_v32  ;;  %v10817_v38 = vld [vmem:[%s12807_s7 + $0x40] sm:$0xff] }
 0x40e   :  { %v10800_v14 = vadd.f32 %v1637_v37, %v10788_v51 }
 0x40f   :  { %v8112_v63 = vpop.permute.xlu0 %8111  ;;  %v2233_v53 = vsel %vm2211_vm3, %v10797_v49, -inf }
 0x410   :  { %v8114_v18 = vunpack.i.h.bf16 %v8112_v63  ;;  %v8113_v29 = vunpack.i.l.bf16 %v8112_v63  ;;  %v6896_v19 = vpop.f32.mrb[52].mxu1  ;;  %v2230_v5 = vsel %vm2211_vm3, %v10800_v14, -inf  ;;  %v13034_v63 = vld [vmem:[#allocation14_spill] sm:$0xff] }
 0x411   :  { %v10812_v13 = vadd.f32 %v6896_v19, %v10805_v45  ;;  %v1647_v32 = vpop.f32.mrb[53].mxu1  ;;  %2231 = vmax.xlane.f32.xlu0 %v2230_v5  ;;  %2234 = vmax.xlane.f32.xlu1 %v2233_v53  ;;  %v13036_v19 = vld [vmem:[#allocation23_spill] sm:$0xff]  ;;  %v13037_v5 = vld [vmem:[#allocation29_spill] sm:$0xff] }
 0x412   :  { %v7672_v9 = vpack.c.bf16 %v8114_v18, %v8113_v29  ;;  %v10822_v1 = vadd.f32 %v1647_v32, %v10817_v38  ;;  %v13035_v29 = vld [vmem:[#allocation20_spill] sm:$0xff]  ;;  %v13038_v53 = vld [vmem:[#allocation19_spill] sm:$0xff]  ;;  %v10859_v32 = vpop.permute.xlu1 %8116 }
 0x413   :  { %v2239_v37 = vsel %vm2211_vm3, %v10812_v13, -inf }
 0x414   :  { %7674 = vmatprep.subr.msk.bf16.mxu1 %vm10339_vm2, %v7672_v9  ;;  %v2236_v18 = vsel %vm2211_vm3, %v10822_v1, -inf }
 0x415   :  { %7677 = vmatpush3.bf16.xpose.msk.msra.mxu1 %vm10339_vm2, %v7672_v9  ;;  %2240 = vmax.xlane.f32.xlu1 %v2239_v37  ;;  %v13039_v9 = vld [vmem:[#allocation47_spill] sm:$0xff] }
 0x416   :  { %7699 = vmatprep.subr.bf16.mxu1 %v13034_v63  ;;  %v10861_v37 = vpop.permute.xlu1 %8126 }
 0x419   :  { %2237 = vmax.xlane.f32.xlu1 %v2236_v18 }
 0x41c   :  { %6988 = vmatmul.mubr.msk.f32.vlgmr.msra.gmra.mrb[74].mxu1 %vm1500_vm1, %v10524_v6 }
 0x41d   :  { %6990 = vmatprep.mubr.msk.f32.mxu1 %vm1500_vm1, %v10541_v27  ;;  %7701 = vmatpush3.bf16.msra.mxu1 %v13034_v63  ;;  %v10863_v63 = vpop.permute.xlu1 %8136 }
 0x41e   :  { %7703 = vmatprep.subr.bf16.mxu1 %v13035_v29 }
 0x420   :  { %6991 = vmatmul.mubr.msk.f32.gmra.mrb[76].mxu1 %vm1500_vm1, %v10544_v50 }
 0x421   :  { %6993 = vmatprep.mubr.msk.f32.mxu1 %vm1500_vm1, %v10557_v0  ;;  %7705 = vmatpush3.bf16.msra.mxu1 %v13035_v29  ;;  %v10865_v18 = vpop.permute.xlu1 %8146 }
 0x422   :  { %7707 = vmatprep.subr.bf16.mxu1 %v13036_v19 }
 0x424   :  { %6994 = vmatmul.mubr.msk.f32.gmra.mrb[78].mxu1 %vm1500_vm1, %v10560_v42 }
 0x425   :  { %6996 = vmatprep.mubr.msk.f32.mxu1 %vm1500_vm1, %v10577_v20  ;;  %7709 = vmatpush3.bf16.msra.mxu1 %v13036_v19  ;;  %v10867_v29 = vpop.permute.xlu1 %8151 }
 0x426   :  { %7711 = vmatprep.subr.bf16.mxu1 %v13037_v5  ;;  %13040 = vst [vmem:[#allocation48_spill] sm:$0xff] %v10867_v29 }
 0x428   :  { %6997 = vmatmul.mubr.msk.f32.gmra.mrb[80].mxu1 %vm1500_vm1, %v10580_v24  ;;  %v10873_v24 = vpop.permute.xlu0 %8121 }
 0x429   :  { %6999 = vmatprep.mubr.msk.f32.mxu1 %vm1500_vm1, %v10601_v12  ;;  %7713 = vmatpush3.bf16.msra.mxu1 %v13037_v5  ;;  %v10869_v19 = vpop.permute.xlu1 %3232 }
 0x42a   :  { %7715 = vmatprep.subr.bf16.mxu1 %v13038_v53 }
 0x42c   :  { %7000 = vmatmul.mubr.msk.f32.gmra.mrb[82].mxu1 %vm1500_vm1, %v10604_v2 }
 0x42d   :  { %7717 = vmatpush3.bf16.msra.mxu1 %v13038_v53  ;;  %v10871_v5 = vpop.permute.xlu1 %3234  ;;  %v10877_v53 = vpop.permute.xlu0 %8131 }
 0x42e   :  { %7739 = vmatprep.subr.bf16.mxu1 %v13039_v9  ;;  %13041 = vst [vmem:[#allocation52_spill] sm:$0xff] %v10871_v5 }
 0x431   :  { %v10875_v2 = vpop.permute.xlu1 %8161  ;;  %v10884_v44 = vpop.permute.xlu0 %8141 }
 0x432   :  { %13042 = vst [vmem:[#allocation44_spill] sm:$0xff] %v10875_v2  ;;  %13044 = vst [vmem:[#allocation14_spill] sm:$0xff] %v10884_v44 }
 0x435   :  { %v10879_v42 = vpop.permute.xlu1 %3236 }
 0x436   :  { %13043 = vst [vmem:[#allocation36_spill] sm:$0xff] %v10879_v42 }
 0x439   :  { %v10886_v29 = vpop.permute.xlu1 %3238 }
 0x43a   :  { %13045 = vst [vmem:[#allocation20_spill] sm:$0xff] %v10886_v29 }
 0x43d   :  { %v10905_v40 = vpop.permute.xlu1 %8166 }
 0x43e   :  { %13046 = vst [vmem:[#allocation23_spill] sm:$0xff] %v10905_v40 }
 0x463   :  { %v6919_v50 = vpop.f32.mrb[54].mxu1 }
 0x464   :  { %v10882_v6 = vadd.f32 %v6919_v50, %v10721_v28  ;;  %v1792_v12 = vpop.f32.mrb[55].mxu1 }
 0x465   :  { %v10889_v20 = vadd.f32 %v1792_v12, %v10726_v60  ;;  %v10903_v12 = vpop.permute.xlu0 %8156 }
 0x466   :  { %v2245_v41 = vsel %vm2211_vm3, %v10882_v6, -inf }
 0x467   :  { %v6922_v2 = vpop.f32.mrb[56].mxu1  ;;  %2246 = vmax.xlane.f32.xlu0 %v2245_v41  ;;  %v2242_v44 = vsel %vm2211_vm3, %v10889_v20, -inf }
 0x468   :  { %v10894_v0 = vadd.f32 %v6922_v2, %v10741_v43  ;;  %v1802_v23 = vpop.f32.mrb[57].mxu1 }
 0x469   :  { %v10897_v50 = vadd.f32 %v1802_v23, %v10748_v25  ;;  %v10920_v3 = vpop.permute.xlu0 %3240 }
 0x46a   :  { %v2251_v27 = vsel %vm2211_vm3, %v10894_v0, -inf  ;;  %13047 = vst [vmem:[#allocation29_spill] sm:$0xff] %v10920_v3 }
 0x46b   :  { %v6925_v11 = vpop.f32.mrb[58].mxu1  ;;  %2243 = vmax.xlane.f32.xlu0 %v2242_v44  ;;  %2252 = vmax.xlane.f32.xlu1 %v2251_v27  ;;  %v2248_v57 = vsel %vm2211_vm3, %v10897_v50, -inf }
 0x46c   :  { %v10908_v41 = vadd.f32 %v6925_v11, %v10761_v36  ;;  %v1812_v2 = vpop.f32.mrb[59].mxu1  ;;  %v10922_v11 = vpop.permute.xlu1 %3242 }
 0x46d   :  { %v10911_v23 = vadd.f32 %v1812_v2, %v10766_v22  ;;  %13048 = vst [vmem:[#allocation19_spill] sm:$0xff] %v10922_v11  ;;  %v10941_v3 = vpop.permute.xlu0 %8171 }
 0x46e   :  { %v2257_v33 = vsel %vm2211_vm3, %v10908_v41, -inf  ;;  %13049 = vst [vmem:[#allocation47_spill] sm:$0xff] %v10941_v3 }
 0x46f   :  { %v6928_v62 = vpop.f32.mrb[60].mxu1  ;;  %2249 = vmax.xlane.f32.xlu0 %v2248_v57  ;;  %2258 = vmax.xlane.f32.xlu1 %v2257_v33  ;;  %v2254_v17 = vsel %vm2211_vm3, %v10911_v23, -inf }
 0x470   :  { %v10918_v44 = vadd.f32 %v6928_v62, %v10781_v10  ;;  %v1822_v27 = vpop.f32.mrb[61].mxu1  ;;  %v10943_v48 = vpop.permute.xlu1 %3244 }
 0x471   :  { %v10925_v2 = vadd.f32 %v1822_v27, %v10788_v51  ;;  %13050 = vst [vmem:[#allocation88_spill] sm:$0xff] %v10943_v48 }
 0x472   :  { %v2263_v39 = vsel %vm2211_vm3, %v10918_v44, -inf }
 0x473   :  { %v6931_v29 = vpop.f32.mrb[62].mxu1  ;;  %2255 = vmax.xlane.f32.xlu0 %v2254_v17  ;;  %2264 = vmax.xlane.f32.xlu1 %v2263_v39  ;;  %v2260_v27 = vsel %vm2211_vm3, %v10925_v2, -inf  ;;  %v10947_v39 = vpop.permute.xlu0 %3246 }
 0x474   :  { %v10932_v62 = vadd.f32 %v6931_v29, %v10805_v45  ;;  %v1832_v57 = vpop.f32.mrb[63].mxu1  ;;  %13051 = vst [vmem:[#allocation89_spill] sm:$0xff] %v10947_v39  ;;  %v10949_v29 = vpop.permute.xlu1 %8176 }
 0x475   :  { %v10935_v33 = vadd.f32 %v1832_v57, %v10817_v38  ;;  %13052 = vst [vmem:[#allocation90_spill] sm:$0xff] %v10949_v29 }
 0x476   :  { %v2269_v11 = vsel %vm2211_vm3, %v10932_v62, -inf }
 0x477   :  { %2261 = vmax.xlane.f32.xlu0 %v2260_v27  ;;  %2270 = vmax.xlane.f32.xlu1 %v2269_v11  ;;  %v2266_v17 = vsel %vm2211_vm3, %v10935_v33, -inf  ;;  %v10951_v57 = vpop.permute.xlu0 %3248 }
 0x478   :  { %13053 = vst [vmem:[#allocation91_spill] sm:$0xff] %v10951_v57  ;;  %v10953_v8 = vpop.permute.xlu1 %3250 }
 0x479   :  { %13054 = vst [vmem:[#allocation92_spill] sm:$0xff] %v10953_v8 }
 0x47b   :  { %2267 = vmax.xlane.f32.xlu0 %v2266_v17  ;;  %v10955_v42 = vpop.permute.xlu0 %8181 }
 0x47c   :  { %13055 = vst [vmem:[#allocation93_spill] sm:$0xff] %v10955_v42  ;;  %v10957_v5 = vpop.permute.xlu1 %3427 }
 0x47d   :  { %13056 = vst [vmem:[#allocation94_spill] sm:$0xff] %v10957_v5 }
 0x47f   :  { %v10959_v11 = vpop.permute.xlu0 %3429 }
 0x480   :  { %13057 = vst [vmem:[#allocation95_spill] sm:$0xff] %v10959_v11  ;;  %v10964_v17 = vpop.permute.xlu1 %8186 }
 0x481   :  { %13058 = vst [vmem:[#allocation96_spill] sm:$0xff] %v10964_v17 }
 0x48d   :  { %v6954_v27 = vpop.f32.mrb[64].mxu1 }
 0x48e   :  { %v10962_v3 = vadd.f32 %v6954_v27, %v10721_v28  ;;  %v1977_v48 = vpop.f32.mrb[65].mxu1 }
 0x48f   :  { %v10967_v39 = vadd.f32 %v1977_v48, %v10726_v60 }
 0x490   :  { %v2275_v57 = vsel %vm2211_vm3, %v10962_v3, -inf }
 0x491   :  { %v6957_v8 = vpop.f32.mrb[66].mxu1  ;;  %2276 = vmax.xlane.f32.xlu1 %v2275_v57  ;;  %v2272_v5 = vsel %vm2211_vm3, %v10967_v39, -inf  ;;  %v2217_v27 = vpop.xlane.xlu0 %2216 }
 0x492   :  { %v10974_v42 = vadd.f32 %v6957_v8, %v10741_v43  ;;  %v1987_v11 = vpop.f32.mrb[67].mxu1  ;;  %2273 = vmax.xlane.f32.xlu0 %v2272_v5  ;;  %v2333_v48 = vsub.f32 %v10729_v7, %v2217_v27  ;;  %v2214_v17 = vpop.xlane.xlu1 %2213 }
 0x493   :  { %v10977_v29 = vadd.f32 %v1987_v11, %v10748_v25  ;;  %v2332_v56 = vsub.f32 %v10734_v54, %v2214_v17 }
 0x494   :  { %v2281_v57 = vsel %vm2211_vm3, %v10974_v42, -inf  ;;  %v2374_v61 = vmul.f32 1.442695, %v2333_v48 }
 0x495   :  { %v6960_v40 = vpop.f32.mrb[68].mxu1  ;;  %2282 = vmax.xlane.f32.xlu1 %v2281_v57  ;;  %v2278_v8 = vsel %vm2211_vm3, %v10977_v29, -inf  ;;  %v2372_v55 = vmul.f32 1.442695, %v2332_v56 }
 0x496   :  { %v10986_v5 = vadd.f32 %v6960_v40, %v10761_v36  ;;  %v1997_v11 = vpop.f32.mrb[69].mxu1  ;;  %2279 = vmax.xlane.f32.xlu0 %v2278_v8  ;;  %v2220_v46 = vpop.xlane.xlu0 %2219 }
 0x497   :  { %v2223_v7 = vpop.xlane.xlu1 %2222  ;;  %8395 = vpow2.f32 %v2372_v55  ;;  %v2334_v54 = vsub.f32 %v10756_v21, %v2220_v46  ;;  %v10993_v48 = vadd.f32 %v1997_v11, %v10766_v22 }
 0x498   :  { %v2335_v17 = vsub.f32 %v10753_v15, %v2223_v7  ;;  %v2287_v27 = vsel %vm2211_vm3, %v10986_v5, -inf  ;;  %8397 = vpow2.f32 %v2374_v61 }
 0x499   :  { %v6963_v56 = vpop.f32.mrb[70].mxu1  ;;  %v2376_v57 = vmul.f32 1.442695, %v2334_v54  ;;  %v2284_v21 = vsel %vm2211_vm3, %v10993_v48, -inf }
 0x49a   :  { %v2378_v40 = vmul.f32 1.442695, %v2335_v17  ;;  %v2007_v26 = vpop.f32.mrb[71].mxu1  ;;  %2288 = vmax.xlane.f32.xlu0 %v2287_v27  ;;  %v2226_v8 = vpop.xlane.xlu0 %2225  ;;  %v10998_v15 = vadd.f32 %v6963_v56, %v10781_v10 }
 0x49b   :  { %v2229_v52 = vpop.xlane.xlu1 %2228  ;;  %8399 = vpow2.f32 %v2376_v57  ;;  %v2336_v55 = vsub.f32 %v10776_v34, %v2226_v8  ;;  %v11010_v56 = vadd.f32 %v2007_v26, %v10788_v51 }
 0x49c   :  { %v2337_v46 = vsub.f32 %v10773_v30, %v2229_v52  ;;  %8401 = vpow2.f32 %v2378_v40  ;;  %v2293_v40 = vsel %vm2211_vm3, %v10998_v15, -inf }
 0x49d   :  { %v6966_v61 = vpop.f32.mrb[72].mxu1  ;;  %v2380_v11 = vmul.f32 1.442695, %v2336_v55 }
 0x49e   :  { %v2382_v7 = vmul.f32 1.442695, %v2337_v46  ;;  %v11003_v54 = vadd.f32 %v6966_v61, %v10805_v45  ;;  %v2017_v17 = vpop.f32.mrb[73].mxu1  ;;  %2285 = vmax.xlane.f32.xlu0 %v2284_v21  ;;  %v2232_v27 = vpop.xlane.xlu0 %2231  ;;  %v13061_v21 = vld [vmem:[#allocation26_spill] sm:$0xff] }
 0x49f   :  { %v2235_v57 = vpop.xlane.xlu1 %2234  ;;  %8403 = vpow2.f32 %v2380_v11  ;;  %v2338_v52 = vsub.f32 %v10800_v14, %v2232_v27  ;;  %v11023_v26 = vadd.f32 %v2017_v17, %v10817_v38  ;;  %v2290_v11 = vsel %vm2211_vm3, %v11010_v56, -inf  ;;  %v13063_v27 = vld [vmem:[#allocation32_spill] sm:$0xff] }
 0x4a0   :  { %v2339_v30 = vsub.f32 %v10797_v49, %v2235_v57  ;;  %v2299_v34 = vsel %vm2211_vm3, %v11003_v54, -inf  ;;  %8405 = vpow2.f32 %v2382_v7 }
 0x4a1   :  { %2300 = vmax.xlane.f32.xlu1 %v2299_v34  ;;  %v11014_v8 = vpop.eup %8395  ;;  %v2384_v55 = vmul.f32 1.442695, %v2338_v52 }
 0x4a2   :  { %13059 = vst [vmem:[#allocation97_spill] sm:$0xff] %v11014_v8  ;;  %v2386_v46 = vmul.f32 1.442695, %v2339_v30  ;;  %2294 = vmax.xlane.f32.xlu0 %v2293_v40  ;;  %v11016_v61 = vpop.eup %8397  ;;  %7022 = vmatprep.mubr.msk.f32.mxu0 %vm2211_vm3, %v11014_v8  ;;  %v2296_v30 = vsel %vm2211_vm3, %v11023_v26, -inf }
 0x4a3   :  { %13060 = vst [vmem:[#allocation98_spill] sm:$0xff] %v11016_v61  ;;  %v2241_v49 = vpop.xlane.xlu1 %2240  ;;  %8407 = vpow2.f32 %v2384_v55  ;;  %7023 = vmatmul.mubr.msk.f32.vlgmr.msra.gmra.mrb[36].mxu0 %vm2211_vm3, %v11016_v61  ;;  %v13066_v55 = vld [vmem:[#allocation35_spill] sm:$0xff] }
 0x4a4   :  { %8409 = vpow2.f32 %v2386_v46  ;;  %v2341_v14 = vsub.f32 %v10812_v13, %v2241_v49  ;;  %7721 = vmatpush3.bf16.msra.mxu0 %v13061_v21  ;;  %v13069_v49 = vld [vmem:[#allocation39_spill] sm:$0xff]  ;;  %v8119_v21 = vunpack.i.h.bf16 %v10859_v32 }
 0x4a5   :  { %v11029_v7 = vpop.eup %8399  ;;  %7723 = vmatprep.subr.bf16.mxu0 %v13063_v27 }
 0x4a6   :  { %13062 = vst [vmem:[#allocation26_spill] sm:$0xff] %v11029_v7  ;;  %2291 = vmax.xlane.f32.xlu0 %v2290_v11  ;;  %v11032_v57 = vpop.eup %8401  ;;  %7025 = vmatprep.mubr.msk.f32.mxu0 %vm2211_vm3, %v11029_v7  ;;  %v2390_v13 = vmul.f32 1.442695, %v2341_v14  ;;  %v8118_v11 = vunpack.i.l.bf16 %v10859_v32 }
 0x4a7   :  { %13064 = vst [vmem:[#allocation32_spill] sm:$0xff] %v11032_v57  ;;  %v2238_v17 = vpop.xlane.xlu1 %2237  ;;  %7026 = vmatmul.mubr.msk.f32.gmra.mrb[38].mxu0 %vm2211_vm3, %v11032_v57 }
 0x4a8   :  { %v2340_v52 = vsub.f32 %v10822_v1, %v2238_v17  ;;  %7725 = vmatpush3.bf16.msra.mxu0 %v13063_v27  ;;  %v13071_v27 = vld [vmem:[#allocation43_spill] sm:$0xff]  ;;  %v11065_v17 = vpack.c.bf16 %v8119_v21, %v8118_v11 }
 0x4a9   :  { %v11042_v34 = vpop.eup %8403  ;;  %7727 = vmatprep.subr.bf16.mxu0 %v13066_v55 }
 0x4aa   :  { %13065 = vst [vmem:[#allocation99_spill] sm:$0xff] %v11042_v34  ;;  %v2388_v40 = vmul.f32 1.442695, %v2340_v52  ;;  %2297 = vmax.xlane.f32.xlu0 %v2296_v30  ;;  %v11045_v46 = vpop.eup %8405  ;;  %7028 = vmatprep.mubr.msk.f32.mxu0 %vm2211_vm3, %v11042_v34 }
 0x4ab   :  { %13067 = vst [vmem:[#allocation35_spill] sm:$0xff] %v11045_v46  ;;  %7029 = vmatmul.mubr.msk.f32.gmra.mrb[40].mxu0 %vm2211_vm3, %v11045_v46 }
 0x4ac   :  { %8411 = vpow2.f32 %v2388_v40  ;;  %7729 = vmatpush3.bf16.msra.mxu0 %v13066_v55 }
 0x4ad   :  { %8413 = vpow2.f32 %v2390_v13  ;;  %v11052_v1 = vpop.eup %8407  ;;  %7731 = vmatprep.subr.bf16.mxu0 %v13069_v49 }
 0x4ae   :  { %13068 = vst [vmem:[#allocation100_spill] sm:$0xff] %v11052_v1  ;;  %v11055_v14 = vpop.eup %8409  ;;  %7031 = vmatprep.mubr.msk.f32.mxu0 %vm2211_vm3, %v11052_v1 }
 0x4af   :  { %13070 = vst [vmem:[#allocation39_spill] sm:$0xff] %v11055_v14  ;;  %7032 = vmatmul.mubr.msk.f32.gmra.mrb[42].mxu0 %vm2211_vm3, %v11055_v14 }
 0x4b0   :  { %7733 = vmatpush3.bf16.msra.mxu0 %v13069_v49 }
 0x4b1   :  { %7735 = vmatprep.subr.bf16.mxu0 %v13071_v27 }
 0x4b4   :  { %7737 = vmatpush3.bf16.msra.mxu0 %v13071_v27 }
 0x4b5   :  { %7760 = vmatprep.subr.msk.bf16.mxu0 %vm10339_vm2, %v11065_v17 }
 0x4b6   :  { %v11068_v52 = vpop.eup %8411 }
 0x4b7   :  { %13072 = vst [vmem:[#allocation43_spill] sm:$0xff] %v11068_v52  ;;  %v11073_v13 = vpop.eup %8413  ;;  %7034 = vmatprep.mubr.msk.f32.mxu0 %vm2211_vm3, %v11068_v52 }
 0x4b8   :  { %13073 = vst [vmem:[#allocation101_spill] sm:$0xff] %v11073_v13  ;;  %7035 = vmatmul.mubr.msk.f32.gmra.mrb[44].mxu0 %vm2211_vm3, %v11073_v13 }
 0x4ef   :  { %v6989_v32 = vpop.f32.mrb[74].mxu1 }
 0x4f0   :  { %v11080_v30 = vadd.f32 %v6989_v32, %v10721_v28  ;;  %v2162_v40 = vpop.f32.mrb[75].mxu1 }
 0x4f1   :  { %v11083_v55 = vadd.f32 %v2162_v40, %v10726_v60 }
 0x4f2   :  { %v2305_v49 = vsel %vm2211_vm3, %v11080_v30, -inf }
 0x4f3   :  { %v11087_v21 = vpop.f32.mrb[76].mxu1  ;;  %2306 = vmax.xlane.f32.xlu1 %v2305_v49  ;;  %v2302_v11 = vsel %vm2211_vm3, %v11083_v55, -inf }
 0x4f4   :  { %v2247_v27 = vpop.xlane.xlu0 %2246  ;;  %v11091_v14 = vpop.f32.mrb[77].mxu1  ;;  %2303 = vmax.xlane.f32.xlu0 %v2302_v11 }
 0x4f5   :  { %v2343_v28 = vsub.f32 %v10882_v6, %v2247_v27 }
 0x4f7   :  { %v11094_v32 = vpop.f32.mrb[78].mxu1  ;;  %v2394_v46 = vmul.f32 1.442695, %v2343_v28 }
 0x4f8   :  { %v2244_v13 = vpop.xlane.xlu0 %2243  ;;  %v11096_v60 = vpop.f32.mrb[79].mxu1 }
 0x4f9   :  { %v2342_v40 = vsub.f32 %v10889_v20, %v2244_v13  ;;  %v2253_v52 = vpop.xlane.xlu1 %2252 }
 0x4fa   :  { %v2345_v49 = vsub.f32 %v10894_v0, %v2253_v52 }
 0x4fb   :  { %v2392_v1 = vmul.f32 1.442695, %v2342_v40  ;;  %v11100_v57 = vpop.f32.mrb[80].mxu1 }
 0x4fc   :  { %v2250_v34 = vpop.xlane.xlu0 %2249  ;;  %v11102_v61 = vpop.f32.mrb[81].mxu1  ;;  %v2398_v27 = vmul.f32 1.442695, %v2345_v49 }
 0x4fd   :  { %8415 = vpow2.f32 %v2392_v1  ;;  %v2344_v6 = vsub.f32 %v10897_v50, %v2250_v34  ;;  %v2259_v11 = vpop.xlane.xlu1 %2258 }
 0x4fe   :  { %8417 = vpow2.f32 %v2394_v46  ;;  %v2347_v7 = vsub.f32 %v10908_v41, %v2259_v11 }
 0x4ff   :  { %v2396_v8 = vmul.f32 1.442695, %v2344_v6  ;;  %v11106_v20 = vpop.f32.mrb[82].mxu1 }
 0x500   :  { %v2256_v13 = vpop.xlane.xlu0 %2255  ;;  %v11108_v0 = vpop.f32.mrb[83].mxu1  ;;  %v2402_v1 = vmul.f32 1.442695, %v2347_v7 }
 0x501   :  { %8419 = vpow2.f32 %v2396_v8  ;;  %v2346_v52 = vsub.f32 %v10911_v23, %v2256_v13  ;;  %v2265_v28 = vpop.xlane.xlu1 %2264 }
 0x502   :  { %8421 = vpow2.f32 %v2398_v27  ;;  %v2349_v40 = vsub.f32 %v10918_v44, %v2265_v28  ;;  %v13074_v27 = vld [vmem:[#allocation51_spill] sm:$0xff]  ;;  %v13077_v28 = vld [vmem:[#allocation58_spill] sm:$0xff] }
 0x503   :  { %v2400_v50 = vmul.f32 1.442695, %v2346_v52 }
 0x504   :  { %v2262_v34 = vpop.xlane.xlu0 %2261  ;;  %3433 = vrot.lane.b32.xlu1 %v10266_v16, %s8769_s2  ;;  %v2406_v8 = vmul.f32 1.442695, %v2349_v40  ;;  %v8134_v40 = vunpack.i.h.bf16 %v10877_v53 }
 0x505   :  { %8423 = vpow2.f32 %v2400_v50  ;;  %v2348_v41 = vsub.f32 %v10925_v2, %v2262_v34  ;;  %v2271_v46 = vpop.xlane.xlu1 %2270  ;;  %v8133_v50 = vunpack.i.l.bf16 %v10877_v53 }
 0x506   :  { %8425 = vpow2.f32 %v2402_v1  ;;  %v2351_v49 = vsub.f32 %v10932_v62, %v2271_v46 }
 0x507   :  { %v11116_v6 = vpop.eup %8415  ;;  %v2404_v23 = vmul.f32 1.442695, %v2348_v41  ;;  %v11167_v46 = vpack.c.bf16 %v8134_v40, %v8133_v50  ;;  %v11189_v40 = vadd.f32 %v11102_v61, %v10788_v51  ;;  %v8124_v51 = vunpack.i.h.bf16 %v10873_v24 }
 0x508   :  { %v11118_v11 = vpop.eup %8417  ;;  %7057 = vmatprep.mubr.msk.f32.mxu1 %vm2211_vm3, %v11116_v6  ;;  %v2268_v44 = vpop.xlane.xlu0 %2267  ;;  %v2410_v16 = vmul.f32 1.442695, %v2351_v49  ;;  %v11203_v61 = vadd.f32 %v11108_v0, %v10817_v38 }
 0x509   :  { %8427 = vpow2.f32 %v2404_v23  ;;  %v2350_v7 = vsub.f32 %v10935_v33, %v2268_v44  ;;  %7058 = vmatmul.mubr.msk.f32.vlgmr.msra.gmra.mrb[84].mxu1 %vm2211_vm3, %v11118_v11  ;;  %v13075_v33 = vld [vmem:[#allocation55_spill] sm:$0xff] }
 0x50a   :  { %8429 = vpow2.f32 %v2406_v8  ;;  %7741 = vmatpush3.bf16.msra.mxu1 %v13039_v9  ;;  %3431 = vrot.lane.b32.xlu0 %v10263_v58, %s8769_s2 }
 0x50b   :  { %v11126_v2 = vpop.eup %8419  ;;  %v2408_v62 = vmul.f32 1.442695, %v2350_v7  ;;  %7743 = vmatprep.subr.bf16.mxu1 %v13074_v27 }
 0x50c   :  { %v11131_v13 = vpop.eup %8421  ;;  %7060 = vmatprep.mubr.msk.f32.mxu1 %vm2211_vm3, %v11126_v2 }
 0x50d   :  { %8431 = vpow2.f32 %v2408_v62  ;;  %7061 = vmatmul.mubr.msk.f32.gmra.mrb[86].mxu1 %vm2211_vm3, %v11131_v13  ;;  %v11179_v62 = vadd.f32 %v11096_v60, %v10766_v22  ;;  %v11210_v60 = vadd.f32 %v11094_v32, %v10761_v36 }
 0x50e   :  { %8433 = vpow2.f32 %v2410_v16  ;;  %7745 = vmatpush3.bf16.msra.mxu1 %v13074_v27 }
 0x50f   :  { %v11138_v9 = vpop.eup %8423  ;;  %7747 = vmatprep.subr.bf16.mxu1 %v13075_v33  ;;  %v2314_v22 = vsel %vm2211_vm3, %v11179_v62, -inf  ;;  %v2317_v32 = vsel %vm2211_vm3, %v11210_v60, -inf }
 0x510   :  { %v11141_v52 = vpop.eup %8425  ;;  %7063 = vmatprep.mubr.msk.f32.mxu1 %vm2211_vm3, %v11138_v9 }
 0x511   :  { %13076 = vst [vmem:[#allocation51_spill] sm:$0xff] %v11141_v52  ;;  %7064 = vmatmul.mubr.msk.f32.gmra.mrb[88].mxu1 %vm2211_vm3, %v11141_v52 }
 0x512   :  { %7749 = vmatpush3.bf16.msra.mxu1 %v13075_v33  ;;  %v11184_v33 = vadd.f32 %v11087_v21, %v10741_v43 }
 0x513   :  { %v11148_v58 = vpop.eup %8427  ;;  %7751 = vmatprep.subr.bf16.mxu1 %v13077_v28 }
 0x514   :  { %v11151_v1 = vpop.eup %8429  ;;  %7066 = vmatprep.mubr.msk.f32.mxu1 %vm2211_vm3, %v11148_v58  ;;  %v2311_v43 = vsel %vm2211_vm3, %v11184_v33, -inf }
 0x515   :  { %13078 = vst [vmem:[#allocation55_spill] sm:$0xff] %v11151_v1  ;;  %7067 = vmatmul.mubr.msk.f32.gmra.mrb[90].mxu1 %vm2211_vm3, %v11151_v1 }
 0x516   :  { %7753 = vmatpush3.bf16.msra.mxu1 %v13077_v28 }
 0x517   :  { %v11160_v34 = vpop.eup %8431  ;;  %7755 = vmatprep.subr.bf16.mxu1 %v10335_v59 }
 0x518   :  { %13079 = vst [vmem:[#allocation58_spill] sm:$0xff] %v11160_v34  ;;  %v11163_v41 = vpop.eup %8433  ;;  %7069 = vmatprep.mubr.msk.f32.mxu1 %vm2211_vm3, %v11160_v34 }
 0x519   :  { %13080 = vst [vmem:[#allocation102_spill] sm:$0xff] %v11163_v41  ;;  %7070 = vmatmul.mubr.msk.f32.gmra.mrb[92].mxu1 %vm2211_vm3, %v11163_v41 }
 0x51a   :  { %7757 = vmatpush3.bf16.msra.mxu1 %v10335_v59 }
 0x51b   :  { %7790 = vmatprep.subr.msk.bf16.mxu1 %vm10339_vm2, %v11167_v46 }
 0x51e   :  { %v2277_v53 = vpop.xlane.xlu1 %2276 }
 0x51f   :  { %v2353_v8 = vsub.f32 %v10962_v3, %v2277_v53  ;;  %v2274_v49 = vpop.xlane.xlu0 %2273 }
 0x520   :  { %v2352_v23 = vsub.f32 %v10967_v39, %v2274_v49 }
 0x521   :  { %v2414_v44 = vmul.f32 1.442695, %v2353_v8 }
 0x522   :  { %v2412_v7 = vmul.f32 1.442695, %v2352_v23  ;;  %v2283_v16 = vpop.xlane.xlu1 %2282 }
 0x523   :  { %v2355_v27 = vsub.f32 %v10974_v42, %v2283_v16  ;;  %v2280_v59 = vpop.xlane.xlu0 %2279  ;;  %v11195_v42 = vadd.f32 %v11091_v14, %v10748_v25  ;;  %v2320_v25 = vsel %vm2211_vm3, %v11189_v40, -inf  ;;  %v8123_v14 = vunpack.i.l.bf16 %v10873_v24 }
 0x524   :  { %8435 = vpow2.f32 %v2412_v7  ;;  %v2354_v3 = vsub.f32 %v10977_v29, %v2280_v59  ;;  %v2326_v24 = vsel %vm2211_vm3, %v11203_v61, -inf  ;;  %v8129_v16 = vunpack.i.h.bf16 %v10861_v37 }
 0x525   :  { %8437 = vpow2.f32 %v2414_v44  ;;  %v2418_v28 = vmul.f32 1.442695, %v2355_v27  ;;  %v7764_v36 = vpack.c.bf16 %v8124_v51, %v8123_v14  ;;  %v8138_v51 = vunpack.i.l.bf16 %v10863_v63 }
 0x526   :  { %v2416_v39 = vmul.f32 1.442695, %v2354_v3 }
 0x527   :  { %v2289_v50 = vpop.xlane.xlu0 %2288 }
 0x528   :  { %8439 = vpow2.f32 %v2416_v39  ;;  %2315 = vmax.xlane.f32.xlu1 %v2314_v22  ;;  %v2357_v29 = vsub.f32 %v10986_v5, %v2289_v50  ;;  %v2308_v5 = vsel %vm2211_vm3, %v11195_v42, -inf }
 0x529   :  { %8441 = vpow2.f32 %v2418_v28  ;;  %2312 = vmax.xlane.f32.xlu0 %v2311_v43 }
 0x52a   :  { %v2422_v8 = vmul.f32 1.442695, %v2357_v29 }
 0x52b   :  { %v2286_v21 = vpop.xlane.xlu0 %2285 }
 0x52c   :  { %v2356_v53 = vsub.f32 %v10993_v48, %v2286_v21  ;;  %2321 = vmax.xlane.f32.xlu1 %v2320_v25  ;;  %v11225_v48 = vadd.f32 %v11100_v57, %v10781_v10 }
 0x52d   :  { %2309 = vmax.xlane.f32.xlu0 %v2308_v5 }
 0x52e   :  { %v11215_v38 = vpop.eup %8435  ;;  %v2420_v0 = vmul.f32 1.442695, %v2356_v53  ;;  %v2301_v10 = vpop.xlane.xlu1 %2300  ;;  %v2323_v3 = vsel %vm2211_vm3, %v11225_v48, -inf  ;;  %v8148_v53 = vunpack.i.l.bf16 %v10865_v18 }
 0x52f   :  { %13081 = vst [vmem:[#allocation103_spill] sm:$0xff] %v11215_v38  ;;  %v11217_v49 = vpop.eup %8437  ;;  %v2295_v23 = vpop.xlane.xlu0 %2294  ;;  %7092 = vmatprep.mubr.msk.f32.mxu0 %vm2211_vm3, %v11215_v38  ;;  %v2361_v28 = vsub.f32 %v11003_v54, %v2301_v10  ;;  %v13097_v10 = vld [vmem:[#allocation62_spill] sm:$0xff] }
 0x530   :  { %13082 = vst [vmem:[#allocation104_spill] sm:$0xff] %v11217_v49  ;;  %8443 = vpow2.f32 %v2420_v0  ;;  %7093 = vmatmul.mubr.msk.f32.vlgmr.msra.gmra.mrb[46].mxu0 %vm2211_vm3, %v11217_v49  ;;  %2327 = vmax.xlane.f32.xlu1 %v2326_v24  ;;  %v2359_v44 = vsub.f32 %v10998_v15, %v2295_v23  ;;  %v8128_v15 = vunpack.i.l.bf16 %v10861_v37  ;;  %v13091_v0 = vld [vmem:[#allocation63_spill] sm:$0xff] }
 0x531   :  { %8445 = vpow2.f32 %v2422_v8  ;;  %7763 = vmatpush3.bf16.xpose.msk.msra.mxu0 %vm10339_vm2, %v11065_v17  ;;  %2318 = vmax.xlane.f32.xlu0 %v2317_v32  ;;  %v11247_v17 = vadd.f32 %v11106_v20, %v10805_v45  ;;  %v13092_v23 = vld [vmem:[#allocation79_spill] sm:$0xff] }
 0x532   :  { %v11235_v7 = vpop.eup %8439  ;;  %7766 = vmatprep.subr.msk.bf16.mxu0 %vm10339_vm2, %v7764_v36  ;;  %v2426_v39 = vmul.f32 1.442695, %v2359_v44  ;;  %v7770_v43 = vpack.c.bf16 %v8129_v16, %v8128_v15  ;;  %v13096_v44 = vld [vmem:[#allocation85_spill] sm:$0xff]  ;;  %v13099_v15 = vld [vmem:[#allocation36_spill] sm:$0xff] }
 0x533   :  { %13083 = vst [vmem:[#allocation105_spill] sm:$0xff] %v11235_v7  ;;  %v11239_v57 = vpop.eup %8441  ;;  %v2292_v27 = vpop.xlane.xlu0 %2291  ;;  %7095 = vmatprep.mubr.msk.f32.mxu0 %vm2211_vm3, %v11235_v7  ;;  %v2329_v45 = vsel %vm2211_vm3, %v11247_v17, -inf }
 0x534   :  { %13084 = vst [vmem:[#allocation106_spill] sm:$0xff] %v11239_v57  ;;  %v2358_v59 = vsub.f32 %v11010_v56, %v2292_v27  ;;  %7096 = vmatmul.mubr.msk.f32.gmra.mrb[48].mxu0 %vm2211_vm3, %v11239_v57  ;;  %v2430_v56 = vmul.f32 1.442695, %v2361_v28  ;;  %v13098_v27 = vld [vmem:[#allocation52_spill] sm:$0xff]  ;;  %v13102_v28 = vld [vmem:[#allocation90_spill] sm:$0xff] }
 0x535   :  { %2324 = vmax.xlane.f32.xlu0 %v2323_v3  ;;  %v13101_v3 = vld [vmem:[#allocation82_spill] sm:$0xff] }
 0x536   :  { %v2424_v50 = vmul.f32 1.442695, %v2358_v59  ;;  %v13100_v59 = vld [vmem:[#allocation68_spill] sm:$0xff] }
 0x537   :  { %v2298_v22 = vpop.xlane.xlu0 %2297 }
 0x538   :  { %8447 = vpow2.f32 %v2424_v50  ;;  %v2360_v37 = vsub.f32 %v11023_v26, %v2298_v22  ;;  %v8139_v26 = vunpack.i.h.bf16 %v10863_v63  ;;  %v8149_v63 = vunpack.i.h.bf16 %v10865_v18  ;;  %v13103_v22 = vld [vmem:[#allocation20_spill] sm:$0xff] }
 0x539   :  { %8449 = vpow2.f32 %v2426_v39  ;;  %7769 = vmatpush3.bf16.xpose.msk.msra.mxu0 %vm10339_vm2, %v7764_v36  ;;  %2330 = vmax.xlane.f32.xlu0 %v2329_v45  ;;  %v8158_v18 = vunpack.i.l.bf16 %v10903_v12  ;;  %v8179_v39 = vunpack.i.h.bf16 %v13102_v28  ;;  %v8178_v50 = vunpack.i.l.bf16 %v13102_v28  ;;  %v13106_v45 = vld [vmem:[#allocation64_spill] sm:$0xff] }
 0x53a   :  { %v11260_v20 = vpop.eup %8443  ;;  %v2428_v54 = vmul.f32 1.442695, %v2360_v37  ;;  %7772 = vmatprep.subr.msk.bf16.mxu0 %vm10339_vm2, %v7770_v43  ;;  %v7776_v21 = vpack.c.bf16 %v8139_v26, %v8138_v51  ;;  %v7782_v8 = vpack.c.bf16 %v8149_v63, %v8148_v53  ;;  %v13105_v37 = vld [vmem:[#allocation70_spill] sm:$0xff]  ;;  %v13108_v26 = vld [vmem:[#allocation88_spill] sm:$0xff]  ;;  %v13109_v51 = vld [vmem:[#allocation71_spill] sm:$0xff] }
 0x53b   :  { %13085 = vst [vmem:[#allocation107_spill] sm:$0xff] %v11260_v20  ;;  %v11264_v29 = vpop.eup %8445  ;;  %7098 = vmatprep.mubr.msk.f32.mxu0 %vm2211_vm3, %v11260_v20  ;;  %v13111_v63 = vld [vmem:[#allocation96_spill] sm:$0xff] }
 0x53c   :  { %13086 = vst [vmem:[#allocation108_spill] sm:$0xff] %v11264_v29  ;;  %8451 = vpow2.f32 %v2428_v54  ;;  %7099 = vmatmul.mubr.msk.f32.gmra.mrb[50].mxu0 %vm2211_vm3, %v11264_v29  ;;  %v13107_v54 = vld [vmem:[#allocation19_spill] sm:$0xff]  ;;  %v8189_v53 = vunpack.i.h.bf16 %v13111_v63  ;;  %v13128_v28 = vld [vmem:[#allocation76_spill] sm:$0xff] }
 0x53d   :  { %8453 = vpow2.f32 %v2430_v56  ;;  %v7830_v56 = vpack.c.bf16 %v8179_v39, %v8178_v50 }
 0x541   :  { %7775 = vmatpush3.bf16.xpose.msk.msra.mxu0 %vm10339_vm2, %v7770_v43  ;;  %3435 = vrot.lane.b32.xlu1 %v10289_v47, %s8769_s2  ;;  %v13104_v43 = vld [vmem:[#allocation29_spill] sm:$0xff] }
 0x542   :  { %v11276_v25 = vpop.eup %8447  ;;  %7778 = vmatprep.subr.msk.bf16.mxu0 %vm10339_vm2, %v7776_v21 }
 0x543   :  { %13087 = vst [vmem:[#allocation109_spill] sm:$0xff] %v11276_v25  ;;  %v11280_v14 = vpop.eup %8449  ;;  %7101 = vmatprep.mubr.msk.f32.mxu0 %vm2211_vm3, %v11276_v25 }
 0x544   :  { %13088 = vst [vmem:[#allocation110_spill] sm:$0xff] %v11280_v14  ;;  %7102 = vmatmul.mubr.msk.f32.gmra.mrb[52].mxu0 %vm2211_vm3, %v11280_v14 }
 0x545   :  { %8196 = vrot.lane.b32.xlu1 %v10512_v4, %s8768_s17  ;;  %v8159_v4 = vunpack.i.h.bf16 %v10903_v12  ;;  %v13095_v12 = vld [vmem:[#allocation23_spill] sm:$0xff] }
 0x546   :  { %v11290_v47 = vpop.eup %8451  ;;  %v8169_v36 = vunpack.i.h.bf16 %v13095_v12  ;;  %v8168_v32 = vunpack.i.l.bf16 %v13095_v12  ;;  %v13118_v12 = vld [vmem:[#allocation69_spill] sm:$0xff] }
 0x547   :  { %13089 = vst [vmem:[#allocation111_spill] sm:$0xff] %v11290_v47  ;;  %v11292_v5 = vpop.eup %8453  ;;  %7104 = vmatprep.mubr.msk.f32.mxu0 %vm2211_vm3, %v11290_v47  ;;  %v7818_v24 = vpack.c.bf16 %v8159_v4, %v8158_v18  ;;  %v13112_v4 = vld [vmem:[#allocation89_spill] sm:$0xff]  ;;  %v13113_v18 = vld [vmem:[#allocation91_spill] sm:$0xff] }
 0x548   :  { %13090 = vst [vmem:[#allocation112_spill] sm:$0xff] %v11292_v5  ;;  %7105 = vmatmul.mubr.msk.f32.gmra.mrb[54].mxu0 %vm2211_vm3, %v11292_v5  ;;  %v7824_v16 = vpack.c.bf16 %v8169_v36, %v8168_v32  ;;  %v13119_v36 = vld [vmem:[#allocation77_spill] sm:$0xff]  ;;  %v13120_v32 = vld [vmem:[#allocation40_spill] sm:$0xff] }
 0x549   :  { %7781 = vmatpush3.bf16.xpose.msk.msra.mxu0 %vm10339_vm2, %v7776_v21  ;;  %7162 = vmatprep.mubr.msk.f32.mxu0 %vm1500_vm1, %v10869_v19  ;;  %v13093_v19 = vld [vmem:[#allocation65_spill] sm:$0xff]  ;;  %v13110_v21 = vld [vmem:[#allocation66_spill] sm:$0xff] }
 0x54a   :  { %7784 = vmatprep.subr.msk.bf16.mxu0 %vm10339_vm2, %v7782_v8  ;;  %3441 = vrot.lane.b32.xlu1 %v10347_v31, %s8769_s2  ;;  %v13094_v31 = vld [vmem:[#allocation59_spill] sm:$0xff] }
 0x54e   :  { %3443 = vrot.lane.b32.xlu1 %v13091_v0, %s8769_s2  ;;  %v13114_v0 = vld [vmem:[#allocation73_spill] sm:$0xff] }
 0x54f   :  { %8191 = vrot.lane.b32.xlu0 %v13092_v23, %s8768_s17  ;;  %v13115_v23 = vld [vmem:[#allocation67_spill] sm:$0xff] }
 0x551   :  { %7787 = vmatpush3.bf16.xpose.msk.msra.mxu0 %vm10339_vm2, %v7782_v8  ;;  %v8188_v8 = vunpack.i.l.bf16 %v13111_v63 }
 0x552   :  { %7820 = vmatprep.subr.msk.bf16.mxu0 %vm10339_vm2, %v7818_v24  ;;  %3622 = vrot.lane.b32.xlu1 %v13093_v19, %s8769_s2  ;;  %v13116_v19 = vld [vmem:[#allocation92_spill] sm:$0xff] }
 0x553   :  { %3437 = vrot.lane.b32.xlu0 %v13094_v31, %s8769_s2  ;;  %v13117_v31 = vld [vmem:[#allocation75_spill] sm:$0xff] }
 0x556   :  { %8206 = vrot.lane.b32.xlu1 %v13096_v44, %s8768_s17  ;;  %v13121_v44 = vld [vmem:[#allocation80_spill] sm:$0xff] }
 0x557   :  { %3439 = vrot.lane.b32.xlu0 %v13097_v10, %s8769_s2  ;;  %v13122_v10 = vld [vmem:[#allocation72_spill] sm:$0xff] }
 0x558   :  { %7163 = vmatmul.mubr.msk.f32.vlgmr.msra.gmra.mrb[56].mxu0 %vm1500_vm1, %v13098_v27  ;;  %v13124_v27 = vld [vmem:[#allocation74_spill] sm:$0xff] }
 0x559   :  { %7165 = vmatprep.mubr.msk.f32.mxu0 %vm1500_vm1, %v13099_v15  ;;  %7823 = vmatpush3.bf16.xpose.msk.msra.mxu0 %vm10339_vm2, %v7818_v24  ;;  %v7836_v24 = vpack.c.bf16 %v8189_v53, %v8188_v8  ;;  %v13137_v53 = vld [vmem:[#allocation7_spill] sm:$0xff]  ;;  %v13138_v8 = vld [vmem:[#allocation6_spill] sm:$0xff] }
 0x55a   :  { %7826 = vmatprep.subr.msk.bf16.mxu0 %vm10339_vm2, %v7824_v16  ;;  %3628 = vrot.lane.b32.xlu1 %v13100_v59, %s8769_s2 }
 0x55b   :  { %8201 = vrot.lane.b32.xlu0 %v13101_v3, %s8768_s17  ;;  %v13127_v3 = vld [vmem:[#allocation86_spill] sm:$0xff] }
 0x55c   :  { %7166 = vmatmul.mubr.msk.f32.gmra.mrb[58].mxu0 %vm1500_vm1, %v13103_v22  ;;  %v13131_v22 = vld [vmem:[#allocation3_spill] sm:$0xff] }
 0x55d   :  { %7168 = vmatprep.mubr.msk.f32.mxu0 %vm1500_vm1, %v13104_v43  ;;  %v13132_v43 = vld [vmem:[#allocation2_spill] sm:$0xff] }
 0x55e   :  { %3632 = vrot.lane.b32.xlu1 %v13105_v37, %s8769_s2  ;;  %v13133_v37 = vpack.i.bf16 %v13131_v22, %v13132_v43  ;;  %v13154_v43 = vld [vmem:[#allocation28_spill] sm:$0xff] }
 0x55f   :  { %3445 = vrot.lane.b32.xlu0 %v13106_v45, %s8769_s2  ;;  %v13134_v45 = vld [vmem:[#allocation78_spill] sm:$0xff] }
 0x560   :  { %7169 = vmatmul.mubr.msk.f32.gmra.mrb[60].mxu0 %vm1500_vm1, %v13107_v54 }
 0x561   :  { %7171 = vmatprep.mubr.msk.f32.mxu0 %vm1500_vm1, %v13108_v26  ;;  %7829 = vmatpush3.bf16.xpose.msk.msra.mxu0 %vm10339_vm2, %v7824_v16  ;;  %v13123_v16 = vld [vmem:[#allocation83_spill] sm:$0xff] }
 0x562   :  { %7832 = vmatprep.subr.msk.bf16.mxu0 %vm10339_vm2, %v7830_v56  ;;  %3634 = vrot.lane.b32.xlu1 %v13109_v51, %s8769_s2 }
 0x563   :  { %3624 = vrot.lane.b32.xlu0 %v13110_v21, %s8769_s2 }
 0x564   :  { %7172 = vmatmul.mubr.msk.f32.gmra.mrb[62].mxu0 %vm1500_vm1, %v13112_v4  ;;  %v13139_v4 = vpack.i.bf16 %v13137_v53, %v13138_v8 }
 0x565   :  { %7174 = vmatprep.mubr.msk.f32.mxu0 %vm1500_vm1, %v13113_v18 }
 0x566   :  { %3638 = vrot.lane.b32.xlu1 %v13114_v0, %s8769_s2  ;;  %v13140_v0 = vld [vmem:[#allocation81_spill] sm:$0xff] }
 0x567   :  { %3626 = vrot.lane.b32.xlu0 %v13115_v23, %s8769_s2 }
 0x568   :  { %7175 = vmatmul.mubr.msk.f32.gmra.mrb[64].mxu0 %vm1500_vm1, %v13116_v19 }
 0x569   :  { %7835 = vmatpush3.bf16.xpose.msk.msra.mxu0 %vm10339_vm2, %v7830_v56 }
 0x56a   :  { %7838 = vmatprep.subr.msk.bf16.mxu0 %vm10339_vm2, %v7836_v24  ;;  %3817 = vrot.lane.b32.xlu1 %v13117_v31, %s8769_s2  ;;  %v13144_v31 = vld [vmem:[#allocation10_spill] sm:$0xff] }
 0x56b   :  { %3630 = vrot.lane.b32.xlu0 %v13118_v12, %s8769_s2 }
 0x56e   :  { %3821 = vrot.lane.b32.xlu1 %v13119_v36, %s8769_s2  ;;  %v13147_v36 = vld [vmem:[#allocation18_spill] sm:$0xff] }
 0x56f   :  { %8211 = vrot.lane.b32.xlu0 %v13120_v32, %s8768_s17  ;;  %v13148_v32 = vld [vmem:[#allocation17_spill] sm:$0xff] }
 0x571   :  { %7841 = vmatpush3.bf16.xpose.msk.msra.mxu0 %vm10339_vm2, %v7836_v24 }
 0x572   :  { %3825 = vrot.lane.b32.xlu1 %v13121_v44, %s8769_s2  ;;  %v13149_v44 = vpack.i.bf16 %v13147_v36, %v13148_v32  ;;  %v13169_v32 = vld [vmem:[#allocation34_spill] sm:$0xff] }
 0x573   :  { %3636 = vrot.lane.b32.xlu0 %v13122_v10, %s8769_s2  ;;  %v13150_v10 = vld [vmem:[#allocation87_spill] sm:$0xff] }
 0x576   :  { %3829 = vrot.lane.b32.xlu1 %v13123_v16, %s8769_s2  ;;  %v11394_v15 = vpop.f32.mrb[36].mxu0 }
 0x577   :  { %3640 = vrot.lane.b32.xlu0 %v13124_v27, %s8769_s2  ;;  %13125 = vst [vmem:[#allocation63_spill] sm:$0xff] %v11394_v15  ;;  %v11396_v59 = vpop.f32.mrb[37].mxu0 }
 0x578   :  { %13126 = vst [vmem:[#allocation79_spill] sm:$0xff] %v11396_v59 }
 0x57a   :  { %3833 = vrot.lane.b32.xlu1 %v13127_v3, %s8769_s2  ;;  %v11402_v39 = vpop.f32.mrb[38].mxu0  ;;  %v13153_v3 = vld [vmem:[#allocation14_spill] sm:$0xff] }
 0x57b   :  { %3819 = vrot.lane.b32.xlu0 %v13128_v28, %s8769_s2  ;;  %13129 = vst [vmem:[#allocation65_spill] sm:$0xff] %v11402_v39  ;;  %v11404_v50 = vpop.f32.mrb[39].mxu0  ;;  %v8144_v28 = vunpack.i.h.bf16 %v13153_v3  ;;  %v8143_v22 = vunpack.i.l.bf16 %v13153_v3  ;;  %v13172_v3 = vld [vmem:[#allocation13_spill] sm:$0xff] }
 0x57c   :  { %13130 = vst [vmem:[#allocation59_spill] sm:$0xff] %v11404_v50 }
 0x57d   :  { %v7794_v8 = vpack.c.bf16 %v8144_v28, %v8143_v22 }
 0x57e   :  { %8216 = vrot.lane.b32.xlu1 %v13133_v37, %s8769_s2  ;;  %v11412_v56 = vpop.f32.mrb[40].mxu0  ;;  %v13155_v37 = vld [vmem:[#allocation27_spill] sm:$0xff] }
 0x57f   :  { %3823 = vrot.lane.b32.xlu0 %v13134_v45, %s8769_s2  ;;  %13135 = vst [vmem:[#allocation23_spill] sm:$0xff] %v11412_v56  ;;  %v11414_v54 = vpop.f32.mrb[41].mxu0  ;;  %v13156_v45 = vpack.i.bf16 %v13154_v43, %v13155_v37  ;;  %v13175_v43 = vld [vmem:[#allocation42_spill] sm:$0xff]  ;;  %v13176_v37 = vld [vmem:[#allocation41_spill] sm:$0xff] }
 0x580   :  { %13136 = vst [vmem:[#allocation85_spill] sm:$0xff] %v11414_v54  ;;  %v2307_v26 = vpop.xlane.xlu1 %2306 }
 0x581   :  { %v2363_v51 = vsub.f32 %v11080_v30, %v2307_v26  ;;  %v2304_v21 = vpop.xlane.xlu0 %2303  ;;  %v13143_v30 = vld [vmem:[#allocation11_spill] sm:$0xff]  ;;  %v13157_v26 = vld [vmem:[#allocation5_spill] sm:$0xff] }
 0x582   :  { %v2362_v63 = vsub.f32 %v11083_v55, %v2304_v21  ;;  %8226 = vrot.lane.b32.xlu1 %v13139_v4, %s8769_s2  ;;  %v11424_v23 = vpop.f32.mrb[42].mxu0  ;;  %v13145_v12 = vpack.i.bf16 %v13143_v30, %v13144_v31  ;;  %v13146_v55 = vld [vmem:[#allocation84_spill] sm:$0xff]  ;;  %v13162_v4 = vld [vmem:[#allocation25_spill] sm:$0xff] }
 0x583   :  { %v2434_v18 = vmul.f32 1.442695, %v2363_v51  ;;  %3827 = vrot.lane.b32.xlu0 %v13140_v0, %s8769_s2  ;;  %13141 = vst [vmem:[#allocation62_spill] sm:$0xff] %v11424_v23  ;;  %v11426_v19 = vpop.f32.mrb[43].mxu0  ;;  %v13158_v51 = vld [vmem:[#allocation4_spill] sm:$0xff] }
 0x584   :  { %v2432_v24 = vmul.f32 1.442695, %v2362_v63  ;;  %13142 = vst [vmem:[#allocation52_spill] sm:$0xff] %v11426_v19  ;;  %v13159_v21 = vpack.i.bf16 %v13157_v26, %v13158_v51  ;;  %v13166_v30 = vld [vmem:[#allocation8_spill] sm:$0xff]  ;;  %v13178_v26 = vld [vmem:[#allocation22_spill] sm:$0xff]  ;;  %v13179_v51 = vld [vmem:[#allocation21_spill] sm:$0xff] }
 0x586   :  { %8455 = vpow2.f32 %v2432_v24  ;;  %8236 = vrot.lane.b32.xlu1 %v13145_v12, %s8769_s2  ;;  %v13165_v24 = vld [vmem:[#allocation9_spill] sm:$0xff]  ;;  %v13168_v12 = vld [vmem:[#allocation48_spill] sm:$0xff] }
 0x587   :  { %8457 = vpow2.f32 %v2434_v18  ;;  %3831 = vrot.lane.b32.xlu0 %v13146_v55, %s8769_s2  ;;  %v13163_v18 = vld [vmem:[#allocation24_spill] sm:$0xff]  ;;  %v13167_v31 = vpack.i.bf16 %v13165_v24, %v13166_v30  ;;  %v8154_v55 = vunpack.i.h.bf16 %v13168_v12  ;;  %v8153_v36 = vunpack.i.l.bf16 %v13168_v12  ;;  %v13182_v24 = vld [vmem:[#allocation50_spill] sm:$0xff]  ;;  %v13183_v30 = vld [vmem:[#allocation49_spill] sm:$0xff] }
 0x588   :  { %v13164_v0 = vpack.i.bf16 %v13162_v4, %v13163_v18  ;;  %v13181_v4 = vld [vmem:[#allocation44_spill] sm:$0xff] }
 0x589   :  { %v7800_v22 = vpack.c.bf16 %v8154_v55, %v8153_v36  ;;  %v8164_v18 = vunpack.i.h.bf16 %v13181_v4  ;;  %v13185_v12 = vld [vmem:[#allocation16_spill] sm:$0xff] }
 0x58a   :  { %8246 = vrot.lane.b32.xlu1 %v13149_v44, %s8769_s2  ;;  %v13170_v44 = vld [vmem:[#allocation33_spill] sm:$0xff] }
 0x58b   :  { %3835 = vrot.lane.b32.xlu0 %v13150_v10, %s8769_s2  ;;  %v11440_v16 = vpop.f32.mrb[44].mxu0  ;;  %v13171_v10 = vpack.i.bf16 %v13169_v32, %v13170_v44  ;;  %v13188_v32 = vld [vmem:[#allocation31_spill] sm:$0xff]  ;;  %v13189_v44 = vld [vmem:[#allocation30_spill] sm:$0xff] }
 0x58c   :  { %13151 = vst [vmem:[#allocation36_spill] sm:$0xff] %v11440_v16  ;;  %v11442_v27 = vpop.f32.mrb[45].mxu0 }
 0x58d   :  { %13152 = vst [vmem:[#allocation68_spill] sm:$0xff] %v11442_v27 }
 0x58e   :  { %8256 = vrot.lane.b32.xlu1 %v13156_v45, %s8769_s2  ;;  %v13177_v45 = vpack.i.bf16 %v13175_v43, %v13176_v37  ;;  %v13192_v43 = vld [vmem:[#allocation38_spill] sm:$0xff]  ;;  %v13193_v37 = vld [vmem:[#allocation37_spill] sm:$0xff] }
 0x58f   :  { %8221 = vrot.lane.b32.xlu0 %v13159_v21, %s8769_s2  ;;  %v13180_v21 = vpack.i.bf16 %v13178_v26, %v13179_v51  ;;  %v13196_v51 = vld [vmem:[#allocation45_spill] sm:$0xff] }
 0x590   :  { %v11454_v63 = vpop.eup %8455 }
 0x591   :  { %13160 = vst [vmem:[#allocation82_spill] sm:$0xff] %v11454_v63  ;;  %v11456_v53 = vpop.eup %8457  ;;  %7127 = vmatprep.mubr.msk.f32.mxu1 %vm2211_vm3, %v11454_v63 }
 0x592   :  { %13161 = vst [vmem:[#allocation90_spill] sm:$0xff] %v11456_v53  ;;  %8266 = vrot.lane.b32.xlu1 %v13164_v0, %s8769_s2  ;;  %7128 = vmatmul.mubr.msk.f32.vlgmr.msra.gmra.mrb[94].mxu1 %vm2211_vm3, %v11456_v53  ;;  %v8163_v0 = vunpack.i.l.bf16 %v13181_v4  ;;  %v13198_v4 = vld [vmem:[#allocation93_spill] sm:$0xff] }
 0x593   :  { %7793 = vmatpush3.bf16.xpose.msk.msra.mxu1 %vm10339_vm2, %v11167_v46  ;;  %8231 = vrot.lane.b32.xlu0 %v13167_v31, %s8769_s2  ;;  %v13173_v46 = vld [vmem:[#allocation12_spill] sm:$0xff]  ;;  %v13184_v31 = vpack.i.bf16 %v13182_v24, %v13183_v30  ;;  %v11531_v24 = vpop.permute.xlu1 %3433 }
 0x594   :  { %7796 = vmatprep.subr.msk.bf16.mxu1 %vm10339_vm2, %v7794_v8  ;;  %v13174_v28 = vpack.i.bf16 %v13172_v3, %v13173_v46  ;;  %v7806_v36 = vpack.c.bf16 %v8164_v18, %v8163_v0  ;;  %v13191_v3 = vld [vmem:[#allocation47_spill] sm:$0xff]  ;;  %v8184_v18 = vunpack.i.h.bf16 %v13198_v4  ;;  %v8183_v0 = vunpack.i.l.bf16 %v13198_v4 }
 0x595   :  { %v8174_v46 = vunpack.i.h.bf16 %v13191_v3 }
 0x596   :  { %8276 = vrot.lane.b32.xlu1 %v13171_v10, %s8769_s2  ;;  %v13190_v10 = vpack.i.bf16 %v13188_v32, %v13189_v44  ;;  %v11533_v30 = vpack.c.bf16 %v8184_v18, %v8183_v0 }
 0x597   :  { %8241 = vrot.lane.b32.xlu0 %v13174_v28, %s8769_s2  ;;  %v8173_v28 = vunpack.i.l.bf16 %v13191_v3 }
 0x599   :  { %v7812_v26 = vpack.c.bf16 %v8174_v46, %v8173_v28 }
 0x59a   :  { %8286 = vrot.lane.b32.xlu1 %v13177_v45, %s8769_s2  ;;  %v13194_v45 = vpack.i.bf16 %v13192_v43, %v13193_v37 }
 0x59b   :  { %7799 = vmatpush3.bf16.xpose.msk.msra.mxu1 %vm10339_vm2, %v7794_v8  ;;  %8251 = vrot.lane.b32.xlu0 %v13180_v21, %s8769_s2  ;;  %v13186_v8 = vld [vmem:[#allocation15_spill] sm:$0xff] }
 0x59c   :  { %7802 = vmatprep.subr.msk.bf16.mxu1 %vm10339_vm2, %v7800_v22  ;;  %v13187_v55 = vpack.i.bf16 %v13185_v12, %v13186_v8 }
 0x59e   :  { %8296 = vrot.lane.b32.xlu1 %v13184_v31, %s8769_s2  ;;  %v11535_v31 = vpop.permute.xlu0 %3431 }
 0x59f   :  { %8261 = vrot.lane.b32.xlu0 %v13187_v55, %s8769_s2 }
 0x5a3   :  { %7805 = vmatpush3.bf16.xpose.msk.msra.mxu1 %vm10339_vm2, %v7800_v22  ;;  %8271 = vrot.lane.b32.xlu0 %v13190_v10, %s8769_s2  ;;  %v13195_v22 = vld [vmem:[#allocation46_spill] sm:$0xff] }
 0x5a4   :  { %7808 = vmatprep.subr.msk.bf16.mxu1 %vm10339_vm2, %v7806_v36  ;;  %v13197_v21 = vpack.i.bf16 %v13195_v22, %v13196_v51 }
 0x5a7   :  { %8281 = vrot.lane.b32.xlu0 %v13194_v45, %s8769_s2 }
 0x5ab   :  { %7811 = vmatpush3.bf16.xpose.msk.msra.mxu1 %vm10339_vm2, %v7806_v36  ;;  %8291 = vrot.lane.b32.xlu0 %v13197_v21, %s8769_s2 }
 0x5ac   :  { %7814 = vmatprep.subr.msk.bf16.mxu1 %vm10339_vm2, %v7812_v26 }
 0x5b3   :  { %7817 = vmatpush3.bf16.xpose.msk.msra.mxu1 %vm10339_vm2, %v7812_v26 }
 0x5b4   :  { %7850 = vmatprep.subr.msk.bf16.mxu1 %vm10339_vm2, %v11533_v30 }
 0x5b5   :  { %v2316_v12 = vpop.xlane.xlu1 %2315 }
 0x5b6   :  { %v2313_v8 = vpop.xlane.xlu0 %2312  ;;  %v2366_v36 = vsub.f32 %v11179_v62, %v2316_v12 }
 0x5b7   :  { %v2365_v55 = vsub.f32 %v11184_v33, %v2313_v8 }
 0x5b8   :  { %v2440_v46 = vmul.f32 1.442695, %v2366_v36 }
 0x5b9   :  { %v2322_v32 = vpop.xlane.xlu1 %2321  ;;  %v2438_v3 = vmul.f32 1.442695, %v2365_v55 }
 0x5ba   :  { %v2310_v44 = vpop.xlane.xlu0 %2309  ;;  %v2368_v28 = vsub.f32 %v11189_v40, %v2322_v32 }
 0x5bb   :  { %v2364_v10 = vsub.f32 %v11195_v42, %v2310_v44 }
 0x5bc   :  { %v2444_v22 = vmul.f32 1.442695, %v2368_v28 }
 0x5bd   :  { %v2436_v43 = vmul.f32 1.442695, %v2364_v10  ;;  %v2328_v37 = vpop.xlane.xlu1 %2327 }
 0x5be   :  { %v2319_v45 = vpop.xlane.xlu0 %2318  ;;  %v2370_v33 = vsub.f32 %v11203_v61, %v2328_v37 }
 0x5bf   :  { %8459 = vpow2.f32 %v2436_v43  ;;  %v2367_v26 = vsub.f32 %v11210_v60, %v2319_v45 }
 0x5c0   :  { %8461 = vpow2.f32 %v2438_v3  ;;  %v2448_v40 = vmul.f32 1.442695, %v2370_v33 }
 0x5c1   :  { %8463 = vpow2.f32 %v2440_v46  ;;  %v2442_v62 = vmul.f32 1.442695, %v2367_v26  ;;  %v11548_v51 = vpop.permute.xlu1 %3435 }
 0x5c2   :  { %v2325_v21 = vpop.xlane.xlu0 %2324 }
 0x5c3   :  { %8465 = vpow2.f32 %v2442_v62  ;;  %v2369_v42 = vsub.f32 %v11225_v48, %v2325_v21 }
 0x5c4   :  { %8467 = vpow2.f32 %v2444_v22 }
 0x5c5   :  { %v2446_v4 = vmul.f32 1.442695, %v2369_v42  ;;  %v8197_v18 = vpop.permute.xlu1 %8196 }
 0x5c6   :  { %v8199_v0 = vunpack.i.h.bf16 %v8197_v18  ;;  %v8198_v12 = vunpack.i.l.bf16 %v8197_v18  ;;  %v2331_v8 = vpop.xlane.xlu0 %2330 }
 0x5c7   :  { %8469 = vpow2.f32 %v2446_v4  ;;  %v2371_v60 = vsub.f32 %v11247_v17, %v2331_v8 }
 0x5c8   :  { %v7842_v55 = vpack.c.bf16 %v8199_v0, %v8198_v12  ;;  %8471 = vpow2.f32 %v2448_v40  ;;  %v13207_v40 = vld [vmem:[#allocation94_spill] sm:$0xff]  ;;  %v13208_v12 = vld [vmem:[#allocation95_spill] sm:$0xff] }
 0x5c9   :  { %v11552_v36 = vpop.eup %8459  ;;  %v2450_v61 = vmul.f32 1.442695, %v2371_v60  ;;  %v11554_v32 = vpop.permute.xlu1 %3441 }
 0x5ca   :  { %13199 = vst [vmem:[#allocation20_spill] sm:$0xff] %v11552_v36  ;;  %v11556_v44 = vpop.eup %8461  ;;  %v8192_v48 = vpop.permute.xlu0 %8191  ;;  %7130 = vmatprep.mubr.msk.f32.mxu1 %vm2211_vm3, %v11552_v36  ;;  %7844 = vmatprep.subr.msk.bf16.mxu0 %vm10339_vm2, %v7842_v55 }
 0x5cb   :  { %13200 = vst [vmem:[#allocation29_spill] sm:$0xff] %v11556_v44  ;;  %v11562_v10 = vpop.eup %8463  ;;  %8473 = vpow2.f32 %v2450_v61  ;;  %7131 = vmatmul.mubr.msk.f32.gmra.mrb[96].mxu1 %vm2211_vm3, %v11556_v44  ;;  %7847 = vmatpush3.bf16.xpose.msk.msra.mxu0 %vm10339_vm2, %v7842_v55  ;;  %v8194_v21 = vunpack.i.h.bf16 %v8192_v48  ;;  %v8193_v42 = vunpack.i.l.bf16 %v8192_v48 }
 0x5cc   :  { %13201 = vst [vmem:[#allocation70_spill] sm:$0xff] %v11562_v10  ;;  %7133 = vmatprep.mubr.msk.f32.mxu1 %vm2211_vm3, %v11562_v10 }
 0x5cd   :  { %v11570_v17 = vpop.eup %8465  ;;  %v3444_v3 = vpop.permute.xlu1 %3443  ;;  %v7854_v0 = vpack.c.bf16 %v8194_v21, %v8193_v42 }
 0x5ce   :  { %13202 = vst [vmem:[#allocation64_spill] sm:$0xff] %v11570_v17  ;;  %v3438_v46 = vpop.permute.xlu0 %3437  ;;  %v11572_v28 = vpop.eup %8467 }
 0x5cf   :  { %13203 = vst [vmem:[#allocation19_spill] sm:$0xff] %v11572_v28  ;;  %7134 = vmatmul.mubr.msk.f32.gmra.mrb[98].mxu1 %vm2211_vm3, %v11570_v17 }
 0x5d0   :  { %7136 = vmatprep.mubr.msk.f32.mxu1 %vm2211_vm3, %v11572_v28 }
 0x5d1   :  { %v11578_v43 = vpop.eup %8469  ;;  %v3623_v37 = vpop.permute.xlu1 %3622 }
 0x5d2   :  { %13204 = vst [vmem:[#allocation88_spill] sm:$0xff] %v11578_v43  ;;  %v3440_v45 = vpop.permute.xlu0 %3439  ;;  %7232 = vmatprep.mubr.msk.f32.mxu0 %vm1500_vm1, %v3623_v37  ;;  %v11581_v26 = vpop.eup %8471 }
 0x5d3   :  { %13205 = vst [vmem:[#allocation71_spill] sm:$0xff] %v11581_v26  ;;  %7137 = vmatmul.mubr.msk.f32.gmra.mrb[100].mxu1 %vm2211_vm3, %v11578_v43 }
 0x5d4   :  { %7139 = vmatprep.mubr.msk.f32.mxu1 %vm2211_vm3, %v11581_v26 }
 0x5d5   :  { %v11587_v22 = vpop.eup %8473  ;;  %v8207_v33 = vpop.permute.xlu1 %8206 }
 0x5d6   :  { %13206 = vst [vmem:[#allocation66_spill] sm:$0xff] %v11587_v22  ;;  %v8202_v62 = vpop.permute.xlu0 %8201 }
 0x5d7   :  { %7140 = vmatmul.mubr.msk.f32.gmra.mrb[102].mxu1 %vm2211_vm3, %v11587_v22  ;;  %v8204_v48 = vunpack.i.h.bf16 %v8202_v62  ;;  %v8203_v37 = vunpack.i.l.bf16 %v8202_v62 }
 0x5d8   :  { %7197 = vmatprep.mubr.msk.f32.mxu1 %vm1500_vm1, %v13207_v40 }
 0x5d9   :  { %v3629_v4 = vpop.permute.xlu1 %3628  ;;  %v7860_v40 = vpack.c.bf16 %v8204_v48, %v8203_v37 }
 0x5da   :  { %v3446_v18 = vpop.permute.xlu0 %3445 }
 0x5db   :  { %7198 = vmatmul.mubr.msk.f32.vlgmr.msra.gmra.mrb[104].mxu1 %vm1500_vm1, %v13208_v12 }
 0x5dc   :  { %v11595_v8 = vpop.f32.mrb[84].mxu1  ;;  %7853 = vmatpush3.bf16.xpose.msk.msra.mxu1 %vm10339_vm2, %v11533_v30  ;;  %7200 = vmatprep.mubr.msk.f32.mxu1 %vm1500_vm1, %v11535_v31 }
 0x5dd   :  { %13209 = vst [vmem:[#allocation96_spill] sm:$0xff] %v11595_v8  ;;  %v11602_v60 = vpop.f32.mrb[85].mxu1  ;;  %7856 = vmatprep.subr.msk.bf16.mxu1 %vm10339_vm2, %v7854_v0  ;;  %v3633_v55 = vpop.permute.xlu1 %3632 }
 0x5de   :  { %13210 = vst [vmem:[#allocation89_spill] sm:$0xff] %v11602_v60  ;;  %v3625_v61 = vpop.permute.xlu0 %3624 }
 0x5df   :  { %7201 = vmatmul.mubr.msk.f32.gmra.mrb[106].mxu1 %vm1500_vm1, %v11531_v24  ;;  %7233 = vmatmul.mubr.msk.f32.vlgmr.msra.gmra.mrb[66].mxu0 %vm1500_vm1, %v3625_v61  ;;  %v8209_v61 = vunpack.i.h.bf16 %v8207_v33 }
 0x5e0   :  { %v11609_v21 = vpop.f32.mrb[86].mxu1  ;;  %7203 = vmatprep.mubr.msk.f32.mxu1 %vm1500_vm1, %v11548_v51 }
 0x5e1   :  { %13211 = vst [vmem:[#allocation91_spill] sm:$0xff] %v11609_v21  ;;  %v11613_v30 = vpop.f32.mrb[87].mxu1  ;;  %v3635_v31 = vpop.permute.xlu1 %3634 }
 0x5e2   :  { %13212 = vst [vmem:[#allocation73_spill] sm:$0xff] %v11613_v30  ;;  %v3627_v42 = vpop.permute.xlu0 %3626 }
 0x5e3   :  { %7204 = vmatmul.mubr.msk.f32.gmra.mrb[108].mxu1 %vm1500_vm1, %v3438_v46  ;;  %7235 = vmatprep.mubr.msk.f32.mxu0 %vm1500_vm1, %v3627_v42  ;;  %v8208_v46 = vunpack.i.l.bf16 %v8207_v33 }
 0x5e4   :  { %v11617_v62 = vpop.f32.mrb[88].mxu1  ;;  %7859 = vmatpush3.bf16.xpose.msk.msra.mxu1 %vm10339_vm2, %v7854_v0  ;;  %7206 = vmatprep.mubr.msk.f32.mxu1 %vm1500_vm1, %v3440_v45 }
 0x5e5   :  { %13213 = vst [vmem:[#allocation67_spill] sm:$0xff] %v11617_v62  ;;  %v11622_v24 = vpop.f32.mrb[89].mxu1  ;;  %7236 = vmatmul.mubr.msk.f32.gmra.mrb[68].mxu0 %vm1500_vm1, %v3629_v4  ;;  %7862 = vmatprep.subr.msk.bf16.mxu1 %vm10339_vm2, %v7860_v40  ;;  %v3639_v51 = vpop.permute.xlu1 %3638  ;;  %v7866_v37 = vpack.c.bf16 %v8209_v61, %v8208_v46 }
 0x5e6   :  { %13214 = vst [vmem:[#allocation92_spill] sm:$0xff] %v11622_v24  ;;  %v3631_v12 = vpop.permute.xlu0 %3630 }
 0x5e7   :  { %7207 = vmatmul.mubr.msk.f32.gmra.mrb[110].mxu1 %vm1500_vm1, %v11554_v32  ;;  %7238 = vmatprep.mubr.msk.f32.mxu0 %vm1500_vm1, %v3631_v12 }
 0x5e8   :  { %v11630_v48 = vpop.f32.mrb[90].mxu1  ;;  %7209 = vmatprep.mubr.msk.f32.mxu1 %vm1500_vm1, %v3444_v3 }
 0x5e9   :  { %13215 = vst [vmem:[#allocation75_spill] sm:$0xff] %v11630_v48  ;;  %v11633_v45 = vpop.f32.mrb[91].mxu1  ;;  %7239 = vmatmul.mubr.msk.f32.gmra.mrb[70].mxu0 %vm1500_vm1, %v3633_v55  ;;  %v3818_v4 = vpop.permute.xlu1 %3817 }
 0x5ea   :  { %13216 = vst [vmem:[#allocation69_spill] sm:$0xff] %v11633_v45  ;;  %7241 = vmatprep.mubr.msk.f32.mxu0 %vm1500_vm1, %v3635_v31  ;;  %v8212_v0 = vpop.permute.xlu0 %8211 }
 0x5eb   :  { %7210 = vmatmul.mubr.msk.f32.gmra.mrb[112].mxu1 %vm1500_vm1, %v3446_v18  ;;  %v8214_v42 = vunpack.i.h.bf16 %v8212_v0  ;;  %v8213_v31 = vunpack.i.l.bf16 %v8212_v0 }
 0x5ec   :  { %v11638_v33 = vpop.f32.mrb[92].mxu1  ;;  %7865 = vmatpush3.bf16.xpose.msk.msra.mxu1 %vm10339_vm2, %v7860_v40  ;;  %7267 = vmatprep.mubr.msk.f32.mxu1 %vm1500_vm1, %v3818_v4 }
 0x5ed   :  { %13217 = vst [vmem:[#allocation77_spill] sm:$0xff] %v11638_v33  ;;  %v11643_v32 = vpop.f32.mrb[93].mxu1  ;;  %7868 = vmatprep.subr.msk.bf16.mxu1 %vm10339_vm2, %v7866_v37  ;;  %v3822_v3 = vpop.permute.xlu1 %3821  ;;  %v7872_v61 = vpack.c.bf16 %v8214_v42, %v8213_v31 }
 0x5ee   :  { %13218 = vst [vmem:[#allocation40_spill] sm:$0xff] %v11643_v32  ;;  %v3637_v55 = vpop.permute.xlu0 %3636 }
 0x5ef   :  { %7242 = vmatmul.mubr.msk.f32.gmra.mrb[72].mxu0 %vm1500_vm1, %v3637_v55 }
 0x5f0   :  { %7244 = vmatprep.mubr.msk.f32.mxu0 %vm1500_vm1, %v3639_v51 }
 0x5f1   :  { %v3826_v18 = vpop.permute.xlu1 %3825 }
 0x5f2   :  { %v3641_v12 = vpop.permute.xlu0 %3640 }
 0x5f3   :  { %7245 = vmatmul.mubr.msk.f32.gmra.mrb[74].mxu0 %vm1500_vm1, %v3641_v12 }
 0x5f4   :  { %7871 = vmatpush3.bf16.xpose.msk.msra.mxu1 %vm10339_vm2, %v7866_v37 }
 0x5f5   :  { %7874 = vmatprep.subr.msk.bf16.mxu1 %vm10339_vm2, %v7872_v61  ;;  %v3830_v40 = vpop.permute.xlu1 %3829 }
 0x5f6   :  { %v3820_v46 = vpop.permute.xlu0 %3819 }
 0x5f9   :  { %v3834_v4 = vpop.permute.xlu1 %3833 }
 0x5fa   :  { %v3824_v33 = vpop.permute.xlu0 %3823 }
 0x5fc   :  { %7877 = vmatpush3.bf16.xpose.msk.msra.mxu1 %vm10339_vm2, %v7872_v61 }
 0x5fd   :  { %v8217_v0 = vpop.permute.xlu1 %8216 }
 0x5fe   :  { %v8219_v51 = vunpack.i.h.bf16 %v8217_v0  ;;  %v8218_v55 = vunpack.i.l.bf16 %v8217_v0  ;;  %v3828_v32 = vpop.permute.xlu0 %3827 }
 0x600   :  { %v7878_v42 = vpack.c.bf16 %v8219_v51, %v8218_v55 }
 0x601   :  { %v8227_v31 = vpop.permute.xlu1 %8226 }
 0x602   :  { %v3832_v12 = vpop.permute.xlu0 %3831  ;;  %7879 = vmatprep.subr.bf16.mxu0 %v7878_v42  ;;  %v8228_v62 = vunpack.i.l.bf16 %v8227_v31 }
 0x603   :  { %v11656_v48 = vpop.f32.mrb[46].mxu0  ;;  %7268 = vmatmul.mubr.msk.f32.vlgmr.msra.gmra.mrb[114].mxu1 %vm1500_vm1, %v3820_v46  ;;  %7881 = vmatpush3.bf16.msra.mxu0 %v7878_v42 }
 0x604   :  { %13219 = vst [vmem:[#allocation80_spill] sm:$0xff] %v11656_v48  ;;  %v11659_v37 = vpop.f32.mrb[47].mxu0  ;;  %7270 = vmatprep.mubr.msk.f32.mxu1 %vm1500_vm1, %v3822_v3  ;;  %v8229_v48 = vunpack.i.h.bf16 %v8227_v31 }
 0x605   :  { %13220 = vst [vmem:[#allocation72_spill] sm:$0xff] %v11659_v37  ;;  %v8237_v45 = vpop.permute.xlu1 %8236 }
 0x606   :  { %v3836_v35 = vpop.permute.xlu0 %3835  ;;  %v8238_v31 = vunpack.i.l.bf16 %v8237_v45 }
 0x607   :  { %v11662_v61 = vpop.f32.mrb[48].mxu0  ;;  %7271 = vmatmul.mubr.msk.f32.gmra.mrb[116].mxu1 %vm1500_vm1, %v3824_v33 }
 0x608   :  { %13221 = vst [vmem:[#allocation83_spill] sm:$0xff] %v11662_v61  ;;  %v11665_v0 = vpop.f32.mrb[49].mxu0  ;;  %7273 = vmatprep.mubr.msk.f32.mxu1 %vm1500_vm1, %v3826_v18  ;;  %v7886_v18 = vpack.c.bf16 %v8229_v48, %v8228_v62 }
 0x609   :  { %13222 = vst [vmem:[#allocation74_spill] sm:$0xff] %v11665_v0  ;;  %v8247_v51 = vpop.permute.xlu1 %8246 }
 0x60a   :  { %v8222_v55 = vpop.permute.xlu0 %8221 }
 0x60b   :  { %v8224_v46 = vunpack.i.h.bf16 %v8222_v55  ;;  %v8223_v42 = vunpack.i.l.bf16 %v8222_v55  ;;  %7274 = vmatmul.mubr.msk.f32.gmra.mrb[118].mxu1 %vm1500_vm1, %v3828_v32  ;;  %v8239_v32 = vunpack.i.h.bf16 %v8237_v45  ;;  %v8248_v55 = vunpack.i.l.bf16 %v8247_v51 }
 0x60c   :  { %7276 = vmatprep.mubr.msk.f32.mxu1 %vm1500_vm1, %v3830_v40  ;;  %v8249_v40 = vunpack.i.h.bf16 %v8247_v51 }
 0x60d   :  { %v7882_v3 = vpack.c.bf16 %v8224_v46, %v8223_v42  ;;  %v8257_v37 = vpop.permute.xlu1 %8256 }
 0x60e   :  { %v8232_v24 = vpop.permute.xlu0 %8231 }
 0x60f   :  { %v8234_v61 = vunpack.i.h.bf16 %v8232_v24  ;;  %v8233_v21 = vunpack.i.l.bf16 %v8232_v24  ;;  %v11670_v33 = vpop.f32.mrb[50].mxu0  ;;  %7277 = vmatmul.mubr.msk.f32.gmra.mrb[120].mxu1 %vm1500_vm1, %v3832_v12  ;;  %7883 = vmatprep.subr.bf16.mxu0 %v7882_v3  ;;  %v7894_v12 = vpack.c.bf16 %v8239_v32, %v8238_v31 }
 0x610   :  { %13223 = vst [vmem:[#allocation86_spill] sm:$0xff] %v11670_v33  ;;  %v11673_v0 = vpop.f32.mrb[51].mxu0  ;;  %7279 = vmatprep.mubr.msk.f32.mxu1 %vm1500_vm1, %v3834_v4  ;;  %7885 = vmatpush3.bf16.msra.mxu0 %v7882_v3 }
 0x611   :  { %13224 = vst [vmem:[#allocation76_spill] sm:$0xff] %v11673_v0  ;;  %7887 = vmatprep.subr.bf16.mxu0 %v7886_v18  ;;  %v7890_v24 = vpack.c.bf16 %v8234_v61, %v8233_v21  ;;  %v8267_v33 = vpop.permute.xlu1 %8266  ;;  %v7902_v0 = vpack.c.bf16 %v8249_v40, %v8248_v55  ;;  %v8258_v61 = vunpack.i.l.bf16 %v8257_v37 }
 0x612   :  { %v8242_v46 = vpop.permute.xlu0 %8241  ;;  %v8269_v4 = vunpack.i.h.bf16 %v8267_v33  ;;  %v8268_v3 = vunpack.i.l.bf16 %v8267_v33 }
 0x613   :  { %v8244_v42 = vunpack.i.h.bf16 %v8242_v46  ;;  %v8243_v30 = vunpack.i.l.bf16 %v8242_v46  ;;  %7280 = vmatmul.mubr.msk.f32.gmra.mrb[122].mxu1 %vm1500_vm1, %v3836_v35  ;;  %v8259_v35 = vunpack.i.h.bf16 %v8257_v37 }
 0x614   :  { %7889 = vmatpush3.bf16.msra.mxu0 %v7886_v18  ;;  %v11683_v32 = vpack.c.bf16 %v8269_v4, %v8268_v3  ;;  %v11706_v3 = vld [vmem:[%s12807_s7] sm:$0xff] }
 0x615   :  { %7891 = vmatprep.subr.bf16.mxu0 %v7890_v24  ;;  %v7898_v62 = vpack.c.bf16 %v8244_v42, %v8243_v30  ;;  %v7910_v46 = vpack.c.bf16 %v8259_v35, %v8258_v61  ;;  %v11813_v22 = vpop.permute.xlu1 %8276 }
 0x616   :  { %v8252_v48 = vpop.permute.xlu0 %8251  ;;  %v8279_v34 = vunpack.i.h.bf16 %v11813_v22 }
 0x617   :  { %v8254_v8 = vunpack.i.h.bf16 %v8252_v48  ;;  %v8253_v60 = vunpack.i.l.bf16 %v8252_v48  ;;  %v11677_v45 = vpop.f32.mrb[52].mxu0  ;;  %7899 = vmatprep.subr.bf16.mxu1 %v7898_v62  ;;  %v11698_v48 = vld [vmem:[%s12807_s7 + $0x8] sm:$0xff] }
 0x618   :  { %13225 = vst [vmem:[#allocation3_spill] sm:$0xff] %v11677_v45  ;;  %v11679_v51 = vpop.f32.mrb[53].mxu0  ;;  %7893 = vmatpush3.bf16.msra.mxu0 %v7890_v24  ;;  %7901 = vmatpush3.bf16.msra.mxu1 %v7898_v62 }
 0x619   :  { %13226 = vst [vmem:[#allocation2_spill] sm:$0xff] %v11679_v51  ;;  %7895 = vmatprep.subr.bf16.mxu0 %v7894_v12  ;;  %7903 = vmatprep.subr.bf16.mxu1 %v7902_v0  ;;  %v7906_v18 = vpack.c.bf16 %v8254_v8, %v8253_v60  ;;  %v11766_v51 = vld [vmem:[%s12807_s7 + $0x30] sm:$0xff] }
 0x61a   :  { %v8262_v21 = vpop.permute.xlu0 %8261 }
 0x61b   :  { %v11681_v30 = vpop.f32.mrb[54].mxu0  ;;  %v8264_v40 = vunpack.i.h.bf16 %v8262_v21  ;;  %v8263_v55 = vunpack.i.l.bf16 %v8262_v21 }
 0x61c   :  { %13227 = vst [vmem:[#allocation78_spill] sm:$0xff] %v11681_v30  ;;  %v11685_v33 = vpop.f32.mrb[55].mxu0  ;;  %7897 = vmatpush3.bf16.msra.mxu0 %v7894_v12  ;;  %7905 = vmatpush3.bf16.msra.mxu1 %v7902_v0 }
 0x61d   :  { %13228 = vst [vmem:[#allocation7_spill] sm:$0xff] %v11685_v33  ;;  %7907 = vmatprep.subr.bf16.mxu1 %v7906_v18  ;;  %7919 = vmatprep.subr.bf16.mxu0 %v11683_v32  ;;  %v7914_v42 = vpack.c.bf16 %v8264_v40, %v8263_v55  ;;  %v11718_v40 = vld [vmem:[%s12807_s7 + $0x18] sm:$0xff] }
 0x61e   :  { %v11688_v31 = vpop.permute.xlu0 %8271 }
 0x620   :  { %7909 = vmatpush3.bf16.msra.mxu1 %v7906_v18 }
 0x621   :  { %7911 = vmatprep.subr.bf16.mxu1 %v7910_v46 }
 0x622   :  { %v11690_v37 = vpop.permute.xlu0 %8281 }
 0x624   :  { %7913 = vmatpush3.bf16.msra.mxu1 %v7910_v46 }
 0x625   :  { %7915 = vmatprep.subr.bf16.mxu1 %v7914_v42 }
 0x626   :  { %v8292_v8 = vpop.permute.xlu0 %8291 }
 0x627   :  { %v8294_v60 = vunpack.i.h.bf16 %v8292_v8  ;;  %v8293_v24 = vunpack.i.l.bf16 %v8292_v8 }
 0x628   :  { %7917 = vmatpush3.bf16.msra.mxu1 %v7914_v42  ;;  %v11726_v42 = vld [vmem:[%s12807_s7 + $0x10] sm:$0xff] }
 0x629   :  { %v11692_v0 = vpack.c.bf16 %v8294_v60, %v8293_v24 }
 0x62b   :  { %v7164_v62 = vpop.f32.mrb[56].mxu0  ;;  %7939 = vmatprep.subr.bf16.mxu1 %v11692_v0 }
 0x62c   :  { %v11701_v12 = vadd.f32 %v11698_v48, %v7164_v62  ;;  %v3378_v4 = vpop.f32.mrb[57].mxu0 }
 0x62d   :  { %v11709_v21 = vadd.f32 %v11706_v3, %v3378_v4  ;;  %v11738_v4 = vld [vmem:[%s12807_s7 + $0x28] sm:$0xff] }
 0x62e   :  { %v4015_v35 = vsel %vm2211_vm3, %v11701_v12, -inf }
 0x62f   :  { %4016 = vmax.xlane.f32.xlu0 %v4015_v35  ;;  %v7167_v61 = vpop.f32.mrb[58].mxu0  ;;  %v4012_v18 = vsel %vm2211_vm3, %v11709_v21, -inf }
 0x630   :  { %v11721_v55 = vadd.f32 %v11718_v40, %v7167_v61  ;;  %v3388_v46 = vpop.f32.mrb[59].mxu0  ;;  %4013 = vmax.xlane.f32.xlu1 %v4012_v18 }
 0x631   :  { %v11729_v8 = vadd.f32 %v11726_v42, %v3388_v46  ;;  %v11748_v46 = vld [vmem:[%s12807_s7 + $0x20] sm:$0xff] }
 0x632   :  { %v4021_v60 = vsel %vm2211_vm3, %v11721_v55, -inf }
 0x633   :  { %v7170_v24 = vpop.f32.mrb[60].mxu0  ;;  %v4018_v62 = vsel %vm2211_vm3, %v11729_v8, -inf }
 0x634   :  { %v11741_v35 = vadd.f32 %v11738_v4, %v7170_v24  ;;  %v3398_v61 = vpop.f32.mrb[61].mxu0  ;;  %4019 = vmax.xlane.f32.xlu0 %v4018_v62  ;;  %4022 = vmax.xlane.f32.xlu1 %v4021_v60  ;;  %v11756_v24 = vld [vmem:[%s12807_s7 + $0x38] sm:$0xff] }
 0x635   :  { %v11751_v30 = vadd.f32 %v11748_v46, %v3398_v61 }
 0x636   :  { %v4027_v18 = vsel %vm2211_vm3, %v11741_v35, -inf }
 0x637   :  { %v7173_v33 = vpop.f32.mrb[62].mxu0  ;;  %v4024_v27 = vsel %vm2211_vm3, %v11751_v30, -inf }
 0x638   :  { %v11759_v62 = vadd.f32 %v11756_v24, %v7173_v33  ;;  %v3408_v60 = vpop.f32.mrb[63].mxu0  ;;  %4028 = vmax.xlane.f32.xlu0 %v4027_v18  ;;  %v11776_v18 = vld [vmem:[%s12807_s7 + $0x48] sm:$0xff] }
 0x639   :  { %v11769_v61 = vadd.f32 %v11766_v51, %v3408_v60 }
 0x63a   :  { %v4033_v45 = vsel %vm2211_vm3, %v11759_v62, -inf }
 0x63b   :  { %v7176_v16 = vpop.f32.mrb[64].mxu0  ;;  %4034 = vmax.xlane.f32.xlu1 %v4033_v45  ;;  %v4030_v19 = vsel %vm2211_vm3, %v11769_v61, -inf  ;;  %v11786_v45 = vld [vmem:[%s12807_s7 + $0x40] sm:$0xff] }
 0x63c   :  { %v3418_v33 = vpop.f32.mrb[65].mxu0  ;;  %4025 = vmax.xlane.f32.xlu0 %v4024_v27  ;;  %v11779_v23 = vadd.f32 %v11776_v18, %v7176_v16 }
 0x63d   :  { %v11789_v60 = vadd.f32 %v11786_v45, %v3418_v33 }
 0x63e   :  { %v4039_v27 = vsel %vm2211_vm3, %v11779_v23, -inf }
 0x63f   :  { %v4036_v16 = vsel %vm2211_vm3, %v11789_v60, -inf }
 0x640   :  { %4031 = vmax.xlane.f32.xlu0 %v4030_v19 }
 0x644   :  { %4040 = vmax.xlane.f32.xlu0 %v4039_v27 }
 0x648   :  { %4037 = vmax.xlane.f32.xlu0 %v4036_v16 }
 0x665   :  { %v11795_v56 = vpop.f32.mrb[94].mxu1 }
 0x666   :  { %13229 = vst [vmem:[#allocation6_spill] sm:$0xff] %v11795_v56  ;;  %v11797_v54 = vpop.f32.mrb[95].mxu1 }
 0x667   :  { %13230 = vst [vmem:[#allocation81_spill] sm:$0xff] %v11797_v54 }
 0x69e   :  { %v11799_v19 = vpop.f32.mrb[96].mxu1 }
 0x69f   :  { %13231 = vst [vmem:[#allocation11_spill] sm:$0xff] %v11799_v19  ;;  %v11801_v39 = vpop.f32.mrb[97].mxu1 }
 0x6a0   :  { %13232 = vst [vmem:[#allocation10_spill] sm:$0xff] %v11801_v39  ;;  %v11820_v39 = vpop.permute.xlu1 %8286 }
 0x6a2   :  { %v11803_v50 = vpop.f32.mrb[98].mxu1 }
 0x6a3   :  { %13233 = vst [vmem:[#allocation84_spill] sm:$0xff] %v11803_v50  ;;  %v11805_v33 = vpop.f32.mrb[99].mxu1 }
 0x6a4   :  { %13234 = vst [vmem:[#allocation18_spill] sm:$0xff] %v11805_v33  ;;  %v11837_v44 = vpop.permute.xlu1 %8296 }
 0x6a6   :  { %v11807_v15 = vpop.f32.mrb[100].mxu1 }
 0x6a7   :  { %13235 = vst [vmem:[#allocation17_spill] sm:$0xff] %v11807_v15  ;;  %v11809_v59 = vpop.f32.mrb[101].mxu1 }
 0x6a8   :  { %13236 = vst [vmem:[#allocation87_spill] sm:$0xff] %v11809_v59 }
 0x6aa   :  { %v11811_v27 = vpop.f32.mrb[102].mxu1 }
 0x6ab   :  { %13237 = vst [vmem:[#allocation14_spill] sm:$0xff] %v11811_v27  ;;  %v11815_v16 = vpop.f32.mrb[103].mxu1 }
 0x6ac   :  { %13238 = vst [vmem:[#allocation28_spill] sm:$0xff] %v11815_v16 }
 0x6ae   :  { %v7199_v56 = vpop.f32.mrb[104].mxu1 }
 0x6af   :  { %v11818_v54 = vadd.f32 %v11698_v48, %v7199_v56  ;;  %v3573_v19 = vpop.f32.mrb[105].mxu1 }
 0x6b0   :  { %v11831_v56 = vadd.f32 %v11706_v3, %v3573_v19 }
 0x6b1   :  { %v4045_v50 = vsel %vm2211_vm3, %v11818_v54, -inf }
 0x6b2   :  { %4046 = vmax.xlane.f32.xlu1 %v4045_v50  ;;  %v7202_v15 = vpop.f32.mrb[106].mxu1  ;;  %v7234_v33 = vpop.f32.mrb[66].mxu0  ;;  %v4042_v19 = vsel %vm2211_vm3, %v11831_v56, -inf }
 0x6b3   :  { %v11825_v59 = vadd.f32 %v11698_v48, %v7234_v33  ;;  %v3583_v27 = vpop.f32.mrb[107].mxu1  ;;  %v3768_v43 = vpop.f32.mrb[67].mxu0  ;;  %v11840_v10 = vadd.f32 %v11718_v40, %v7202_v15 }
 0x6b4   :  { %v11828_v16 = vadd.f32 %v11706_v3, %v3768_v43 }
 0x6b5   :  { %v4075_v26 = vsel %vm2211_vm3, %v11825_v59, -inf }
 0x6b6   :  { %v7205_v17 = vpop.f32.mrb[108].mxu1  ;;  %4076 = vmax.xlane.f32.xlu0 %v4075_v26  ;;  %v4072_v50 = vsel %vm2211_vm3, %v11828_v16, -inf }
 0x6b7   :  { %v3593_v28 = vpop.f32.mrb[109].mxu1  ;;  %4073 = vmax.xlane.f32.xlu1 %v4072_v50  ;;  %v11881_v38 = vadd.f32 %v11738_v4, %v7205_v17 }
 0x6b8   :  { %v7237_v33 = vpop.f32.mrb[68].mxu0  ;;  %v11850_v5 = vadd.f32 %v11748_v46, %v3593_v28 }
 0x6b9   :  { %v3778_v43 = vpop.f32.mrb[69].mxu0  ;;  %v11855_v14 = vadd.f32 %v11718_v40, %v7237_v33  ;;  %v11869_v33 = vadd.f32 %v11726_v42, %v3583_v27 }
 0x6ba   :  { %v11845_v53 = vadd.f32 %v11726_v42, %v3778_v43  ;;  %v11847_v36 = vpop.f32.mrb[110].mxu1  ;;  %4043 = vmax.xlane.f32.xlu0 %v4042_v19  ;;  %v4051_v19 = vsel %vm2211_vm3, %v11840_v10, -inf }
 0x6bb   :  { %v3603_v26 = vpop.f32.mrb[111].mxu1 }
 0x6bc   :  { %v4017_v50 = vpop.xlane.xlu0 %4016  ;;  %v7240_v63 = vpop.f32.mrb[70].mxu0  ;;  %v4078_v15 = vsel %vm2211_vm3, %v11845_v53, -inf }
 0x6bd   :  { %v4133_v47 = vsub.f32 %v11701_v12, %v4017_v50  ;;  %v4014_v29 = vpop.xlane.xlu1 %4013  ;;  %v3788_v43 = vpop.f32.mrb[71].mxu0  ;;  %4079 = vmax.xlane.f32.xlu1 %v4078_v15  ;;  %v4054_v12 = vsel %vm2211_vm3, %v11850_v5, -inf }
 0x6be   :  { %v4132_v25 = vsub.f32 %v11709_v21, %v4014_v29  ;;  %v11861_v28 = vpop.f32.mrb[112].mxu1  ;;  %4052 = vmax.xlane.f32.xlu0 %v4051_v19  ;;  %v11864_v7 = vadd.f32 %v11748_v46, %v3788_v43  ;;  %v4081_v29 = vsel %vm2211_vm3, %v11855_v14, -inf  ;;  %v11876_v19 = vadd.f32 %v11766_v51, %v3603_v26 }
 0x6bf   :  { %v4174_v57 = vmul.f32 1.442695, %v4133_v47  ;;  %v3613_v20 = vpop.f32.mrb[113].mxu1 }
 0x6c0   :  { %v4172_v49 = vmul.f32 1.442695, %v4132_v25  ;;  %v4060_v17 = vsel %vm2211_vm3, %v11876_v19, -inf }
 0x6c1   :  { %v4020_v50 = vpop.xlane.xlu0 %4019  ;;  %v4023_v15 = vpop.xlane.xlu1 %4022  ;;  %4055 = vmax.xlane.f32.xlu1 %v4054_v12  ;;  %v4084_v12 = vsel %vm2211_vm3, %v11864_v7, -inf }
 0x6c2   :  { %8475 = vpow2.f32 %v4172_v49  ;;  %v4134_v47 = vsub.f32 %v11729_v8, %v4020_v50  ;;  %v4135_v25 = vsub.f32 %v11721_v55, %v4023_v15  ;;  %4082 = vmax.xlane.f32.xlu0 %v4081_v29  ;;  %v7243_v21 = vpop.f32.mrb[72].mxu0  ;;  %v4048_v55 = vsel %vm2211_vm3, %v11869_v33, -inf }
 0x6c3   :  { %8477 = vpow2.f32 %v4174_v57  ;;  %v3798_v43 = vpop.f32.mrb[73].mxu0  ;;  %v11894_v29 = vadd.f32 %v11738_v4, %v7240_v63  ;;  %v11905_v63 = vadd.f32 %v11786_v45, %v3613_v20 }
 0x6c4   :  { %v4176_v27 = vmul.f32 1.442695, %v4134_v47  ;;  %v4178_v41 = vmul.f32 1.442695, %v4135_v25  ;;  %v11889_v50 = vadd.f32 %v11766_v51, %v3798_v43  ;;  %v4057_v25 = vsel %vm2211_vm3, %v11881_v38, -inf }
 0x6c5   :  { %v4029_v49 = vpop.xlane.xlu0 %4028  ;;  %4085 = vmax.xlane.f32.xlu1 %v4084_v12  ;;  %v4087_v20 = vsel %vm2211_vm3, %v11894_v29, -inf }
 0x6c6   :  { %8479 = vpow2.f32 %v4176_v27  ;;  %4049 = vmax.xlane.f32.xlu0 %v4048_v55  ;;  %v11885_v57 = vpop.f32.mrb[74].mxu0  ;;  %v4137_v8 = vsub.f32 %v11741_v35, %v4029_v49  ;;  %v8273_v35 = vunpack.i.l.bf16 %v11688_v31 }
 0x6c7   :  { %8481 = vpow2.f32 %v4178_v41  ;;  %v3808_v26 = vpop.f32.mrb[75].mxu0  ;;  %v8274_v41 = vunpack.i.h.bf16 %v11688_v31 }
 0x6c8   :  { %v4035_v15 = vpop.xlane.xlu1 %4034  ;;  %v4182_v43 = vmul.f32 1.442695, %v4137_v8 }
 0x6c9   :  { %v4026_v47 = vpop.xlane.xlu0 %4025  ;;  %4061 = vmax.xlane.f32.xlu1 %v4060_v17  ;;  %v4139_v12 = vsub.f32 %v11759_v62, %v4035_v15  ;;  %v4090_v17 = vsel %vm2211_vm3, %v11889_v50, -inf  ;;  %v8278_v62 = vunpack.i.l.bf16 %v11813_v22  ;;  %v7922_v15 = vpack.c.bf16 %v8274_v41, %v8273_v35 }
 0x6ca   :  { %v4136_v27 = vsub.f32 %v11751_v30, %v4026_v47  ;;  %4058 = vmax.xlane.f32.xlu0 %v4057_v25  ;;  %v11914_v30 = vadd.f32 %v11756_v24, %v11847_v36  ;;  %v11928_v25 = vadd.f32 %v11786_v45, %v3808_v26  ;;  %v4066_v22 = vsel %vm2211_vm3, %v11905_v63, -inf }
 0x6cb   :  { %v4186_v36 = vmul.f32 1.442695, %v4139_v12  ;;  %v8284_v26 = vunpack.i.h.bf16 %v11690_v37  ;;  %v8283_v35 = vunpack.i.l.bf16 %v11690_v37 }
 0x6cc   :  { %v11902_v49 = vpop.eup %8475  ;;  %v4180_v55 = vmul.f32 1.442695, %v4136_v27  ;;  %v4096_v12 = vsel %vm2211_vm3, %v11928_v25, -inf }
 0x6cd   :  { %v11909_v1 = vpop.eup %8477  ;;  %v4032_v31 = vpop.xlane.xlu0 %4031  ;;  %7302 = vmatprep.mubr.msk.f32.mxu0 %vm2211_vm3, %v11902_v49  ;;  %4091 = vmax.xlane.f32.xlu1 %v4090_v17  ;;  %v11950_v17 = vadd.f32 %v11776_v18, %v11861_v28 }
 0x6ce   :  { %8483 = vpow2.f32 %v4180_v55  ;;  %v4138_v8 = vsub.f32 %v11769_v61, %v4032_v31  ;;  %7303 = vmatmul.mubr.msk.f32.vlgmr.msra.gmra.mrb[76].mxu0 %vm2211_vm3, %v11909_v1  ;;  %4088 = vmax.xlane.f32.xlu0 %v4087_v20  ;;  %v11935_v55 = vadd.f32 %v11756_v24, %v7243_v21  ;;  %v8288_v20 = vunpack.i.l.bf16 %v11820_v39 }
 0x6cf   :  { %8485 = vpow2.f32 %v4182_v43  ;;  %7921 = vmatpush3.bf16.msra.mxu0 %v11683_v32  ;;  %v4063_v32 = vsel %vm2211_vm3, %v11914_v30, -inf  ;;  %v7926_v43 = vpack.c.bf16 %v8279_v34, %v8278_v62  ;;  %v8289_v34 = vunpack.i.h.bf16 %v11820_v39 }
 0x6d0   :  { %v11925_v47 = vpop.eup %8479  ;;  %v4184_v27 = vmul.f32 1.442695, %v4138_v8  ;;  %7923 = vmatprep.subr.bf16.mxu0 %v7922_v15  ;;  %v4093_v37 = vsel %vm2211_vm3, %v11935_v55, -inf  ;;  %v7930_v8 = vpack.c.bf16 %v8284_v26, %v8283_v35  ;;  %v4069_v39 = vsel %vm2211_vm3, %v11950_v17, -inf }
 0x6d1   :  { %v11932_v61 = vpop.eup %8481  ;;  %v4041_v41 = vpop.xlane.xlu0 %4040  ;;  %7305 = vmatprep.mubr.msk.f32.mxu0 %vm2211_vm3, %v11925_v47  ;;  %4067 = vmax.xlane.f32.xlu1 %v4066_v22 }
 0x6d2   :  { %8487 = vpow2.f32 %v4184_v27  ;;  %7306 = vmatmul.mubr.msk.f32.gmra.mrb[78].mxu0 %vm2211_vm3, %v11932_v61  ;;  %4064 = vmax.xlane.f32.xlu0 %v4063_v32  ;;  %v4141_v21 = vsub.f32 %v11779_v23, %v4041_v41  ;;  %v7934_v32 = vpack.c.bf16 %v8289_v34, %v8288_v20 }
 0x6d3   :  { %8489 = vpow2.f32 %v4186_v36  ;;  %7925 = vmatpush3.bf16.msra.mxu0 %v7922_v15 }
 0x6d4   :  { %7927 = vmatprep.subr.bf16.mxu0 %v7926_v43  ;;  %v4190_v15 = vmul.f32 1.442695, %v4141_v21 }
 0x6d5   :  { %v4038_v31 = vpop.xlane.xlu0 %4037  ;;  %4097 = vmax.xlane.f32.xlu1 %v4096_v12 }
 0x6d6   :  { %v4140_v23 = vsub.f32 %v11789_v60, %v4038_v31  ;;  %v7269_v62 = vpop.f32.mrb[114].mxu1  ;;  %4094 = vmax.xlane.f32.xlu0 %v4093_v37 }
 0x6d7   :  { %7929 = vmatpush3.bf16.msra.mxu0 %v7926_v43  ;;  %v3963_v36 = vpop.f32.mrb[115].mxu1 }
 0x6d8   :  { %v11957_v27 = vpop.eup %8483  ;;  %v4188_v28 = vmul.f32 1.442695, %v4140_v23  ;;  %7931 = vmatprep.subr.bf16.mxu0 %v7930_v8  ;;  %v11960_v22 = vadd.f32 %v11706_v3, %v3963_v36 }
 0x6d9   :  { %v11962_v41 = vpop.eup %8485  ;;  %7308 = vmatprep.mubr.msk.f32.mxu0 %vm2211_vm3, %v11957_v27 }
 0x6da   :  { %8491 = vpow2.f32 %v4188_v28  ;;  %7309 = vmatmul.mubr.msk.f32.gmra.mrb[80].mxu0 %vm2211_vm3, %v11962_v41  ;;  %v7272_v60 = vpop.f32.mrb[116].mxu1  ;;  %4070 = vmax.xlane.f32.xlu0 %v4069_v39  ;;  %v4102_v26 = vsel %vm2211_vm3, %v11960_v22, -inf }
 0x6db   :  { %8493 = vpow2.f32 %v4190_v15  ;;  %7933 = vmatpush3.bf16.msra.mxu0 %v7930_v8  ;;  %v3973_v3 = vpop.f32.mrb[117].mxu1  ;;  %4103 = vmax.xlane.f32.xlu1 %v4102_v26  ;;  %v13240_v26 = vld [vmem:[#allocation53_spill] sm:$0xff]  ;;  %v12009_v52 = vadd.f32 %v11718_v40, %v7272_v60 }
 0x6dc   :  { %v8488_v35 = vpop.eup %8487  ;;  %7935 = vmatprep.subr.bf16.mxu0 %v7934_v32  ;;  %v11973_v43 = vadd.f32 %v11726_v42, %v3973_v3 }
 0x6dd   :  { %v8490_v21 = vpop.eup %8489  ;;  %7311 = vmatprep.mubr.msk.f32.mxu0 %vm2211_vm3, %v8488_v35 }
 0x6de   :  { %7312 = vmatmul.mubr.msk.f32.gmra.mrb[82].mxu0 %vm2211_vm3, %v8490_v21  ;;  %v7275_v12 = vpop.f32.mrb[118].mxu1  ;;  %v4108_v31 = vsel %vm2211_vm3, %v11973_v43, -inf }
 0x6df   :  { %7937 = vmatpush3.bf16.msra.mxu0 %v7934_v32  ;;  %v3983_v37 = vpop.f32.mrb[119].mxu1  ;;  %4109 = vmax.xlane.f32.xlu1 %v4108_v31  ;;  %v13239_v32 = vld [vmem:[#allocation54_spill] sm:$0xff]  ;;  %v13242_v31 = vld [vmem:[#allocation57_spill] sm:$0xff] }
 0x6e0   :  { %v11980_v34 = vadd.f32 %v11748_v46, %v3983_v37  ;;  %v13241_v3 = vpack.i.bf16 %v13239_v32, %v13240_v26  ;;  %v12014_v26 = vadd.f32 %v11738_v4, %v7275_v12 }
 0x6e2   :  { %v7278_v20 = vpop.f32.mrb[120].mxu1  ;;  %v4114_v42 = vsel %vm2211_vm3, %v11980_v34, -inf  ;;  %v4117_v40 = vsel %vm2211_vm3, %v12014_v26, -inf }
 0x6e3   :  { %v3993_v23 = vpop.f32.mrb[121].mxu1  ;;  %4115 = vmax.xlane.f32.xlu1 %v4114_v42  ;;  %v12001_v42 = vadd.f32 %v11776_v18, %v11885_v57  ;;  %v4111_v57 = vsel %vm2211_vm3, %v12009_v52, -inf }
 0x6e4   :  { %v8492_v8 = vpop.eup %8491  ;;  %v11985_v15 = vadd.f32 %v11766_v51, %v3993_v23  ;;  %v13243_v51 = vld [vmem:[#allocation56_spill] sm:$0xff]  ;;  %v12004_v23 = vadd.f32 %v11698_v48, %v7269_v62  ;;  %v12022_v62 = vadd.f32 %v11756_v24, %v7278_v20  ;;  %v4252_v24 = vsel %vm2211_vm3, %v11902_v49, 0.0 }
 0x6e5   :  { %v8494_v36 = vpop.eup %8493  ;;  %7314 = vmatprep.mubr.msk.f32.mxu0 %vm2211_vm3, %v8492_v8  ;;  %v13244_v37 = vpack.i.bf16 %v13242_v31, %v13243_v51  ;;  %v4261_v20 = vsel %vm2211_vm3, %v11932_v61, 0.0  ;;  %v4267_v31 = vsel %vm2211_vm3, %v11962_v41, 0.0  ;;  %v4264_v49 = vsel %vm2211_vm3, %v11957_v27, 0.0 }
 0x6e6   :  { %7315 = vmatmul.mubr.msk.f32.gmra.mrb[84].mxu0 %vm2211_vm3, %v8494_v36  ;;  %v7281_v28 = vpop.f32.mrb[122].mxu1  ;;  %v4120_v46 = vsel %vm2211_vm3, %v11985_v15, -inf  ;;  %v4105_v32 = vsel %vm2211_vm3, %v12004_v23, -inf  ;;  %v4123_v12 = vsel %vm2211_vm3, %v12022_v62, -inf  ;;  %v4273_v61 = vsel %vm2211_vm3, %v8490_v21, 0.0 }
 0x6e7   :  { %v4003_v39 = vpop.f32.mrb[123].mxu1  ;;  %4121 = vmax.xlane.f32.xlu1 %v4120_v46  ;;  %v4099_v46 = vsel %vm2211_vm3, %v12001_v42, -inf  ;;  %v12029_v4 = vadd.f32 %v11776_v18, %v7281_v28  ;;  %v13246_v18 = vld [vmem:[#allocation60_spill] sm:$0xff]  ;;  %v4270_v51 = vsel %vm2211_vm3, %v8488_v35, 0.0  ;;  %v4276_v21 = vsel %vm2211_vm3, %v8492_v8, 0.0 }
 0x6e8   :  { %v12019_v48 = vadd.f32 %v11786_v45, %v4003_v39  ;;  %v13245_v39 = vld [vmem:[#allocation61_spill] sm:$0xff] }
 0x6e9   :  { %v4129_v45 = vsel %vm2211_vm3, %v12029_v4, -inf  ;;  %v13247_v28 = vpack.i.bf16 %v13245_v39, %v13246_v18 }
 0x6ea   :  { %v4126_v60 = vsel %vm2211_vm3, %v12019_v48, -inf }
 0x6f0   :  { %8301 = vrot.lane.b32.xlu0 %v13241_v3, %s8769_s2  ;;  %v4258_v3 = vsel %vm2211_vm3, %v11925_v47, 0.0  ;;  %v4279_v47 = vsel %vm2211_vm3, %v8494_v36, 0.0 }
 0x6f8   :  { %8306 = vrot.lane.b32.xlu1 %v13244_v37, %s8769_s2 }
 0x70f   :  { %4100 = vmax.xlane.f32.xlu0 %v4099_v46 }
 0x713   :  { %4106 = vmax.xlane.f32.xlu0 %v4105_v32 }
 0x717   :  { %4112 = vmax.xlane.f32.xlu0 %v4111_v57 }
 0x71b   :  { %4118 = vmax.xlane.f32.xlu0 %v4117_v40 }
 0x71c   :  { %4127 = vmax.xlane.f32.xlu1 %v4126_v60 }
 0x71f   :  { %4124 = vmax.xlane.f32.xlu0 %v4123_v12 }
 0x723   :  { %4130 = vmax.xlane.f32.xlu0 %v4129_v45 }
 0x727   :  { %4253 = vadd.xlane.f32.xlu0 %v4252_v24 }
 0x72b   :  { %4262 = vadd.xlane.f32.xlu0 %v4261_v20 }
 0x72d   :  { %8311 = vrot.lane.b32.xlu1 %v13247_v28, %s8769_s2 }
 0x72f   :  { %4259 = vadd.xlane.f32.xlu0 %v4258_v3 }
 0x733   :  { %4268 = vadd.xlane.f32.xlu0 %v4267_v31 }
 0x737   :  { %4265 = vadd.xlane.f32.xlu0 %v4264_v49 }
 0x73b   :  { %4274 = vadd.xlane.f32.xlu0 %v4273_v61 }
 0x73f   :  { %v4047_v37 = vpop.xlane.xlu1 %4046  ;;  %4271 = vadd.xlane.f32.xlu0 %v4270_v51 }
 0x740   :  { %v4143_v46 = vsub.f32 %v11818_v54, %v4047_v37 }
 0x742   :  { %v4194_v32 = vmul.f32 1.442695, %v4143_v46 }
 0x743   :  { %v4077_v57 = vpop.xlane.xlu0 %4076  ;;  %4280 = vadd.xlane.f32.xlu0 %v4279_v47 }
 0x744   :  { %v4153_v41 = vsub.f32 %v11825_v59, %v4077_v57  ;;  %v4074_v40 = vpop.xlane.xlu1 %4073  ;;  %8495 = vpow2.f32 %v4194_v32 }
 0x745   :  { %v4152_v27 = vsub.f32 %v11828_v16, %v4074_v40 }
 0x746   :  { %v4214_v60 = vmul.f32 1.442695, %v4153_v41 }
 0x747   :  { %v4212_v12 = vmul.f32 1.442695, %v4152_v27  ;;  %v4044_v35 = vpop.xlane.xlu0 %4043  ;;  %4277 = vadd.xlane.f32.xlu0 %v4276_v21 }
 0x748   :  { %v4142_v45 = vsub.f32 %v11831_v56, %v4044_v35  ;;  %v4255_v56 = vsel %vm2211_vm3, %v11909_v1, 0.0 }
 0x749   :  { %8497 = vpow2.f32 %v4212_v12 }
 0x74a   :  { %8499 = vpow2.f32 %v4214_v60  ;;  %v4192_v54 = vmul.f32 1.442695, %v4142_v45  ;;  %v4080_v36 = vpop.xlane.xlu1 %4079 }
 0x74b   :  { %v4154_v24 = vsub.f32 %v11845_v53, %v4080_v36  ;;  %v4053_v20 = vpop.xlane.xlu0 %4052 }
 0x74c   :  { %8501 = vpow2.f32 %v4192_v54  ;;  %v4145_v59 = vsub.f32 %v11840_v10, %v4053_v20  ;;  %v8299_v10 = vunpack.i.h.bf16 %v11837_v44 }
 0x74d   :  { %v4216_v16 = vmul.f32 1.442695, %v4154_v24 }
 0x74e   :  { %v4198_v39 = vmul.f32 1.442695, %v4145_v59  ;;  %v4056_v18 = vpop.xlane.xlu1 %4055  ;;  %v8496_v3 = vpop.eup %8495 }
 0x74f   :  { %8503 = vpow2.f32 %v4216_v16  ;;  %v4083_v8 = vpop.xlane.xlu0 %4082  ;;  %v4146_v31 = vsub.f32 %v11850_v5, %v4056_v18  ;;  %v4285_v47 = vsel %vm2211_vm3, %v8496_v3, 0.0 }
 0x750   :  { %8505 = vpow2.f32 %v4198_v39  ;;  %v4155_v28 = vsub.f32 %v11855_v14, %v4083_v8  ;;  %v8298_v14 = vunpack.i.l.bf16 %v11837_v44 }
 0x751   :  { %4256 = vadd.xlane.f32.xlu1 %v4255_v56 }
 0x752   :  { %v4218_v53 = vmul.f32 1.442695, %v4155_v28  ;;  %v4086_v49 = vpop.xlane.xlu1 %4085  ;;  %v7942_v60 = vpack.c.bf16 %v8299_v10, %v8298_v14 }
 0x753   :  { %v12063_v61 = vpop.eup %8497  ;;  %v4156_v51 = vsub.f32 %v11864_v7, %v4086_v49  ;;  %v4050_v37 = vpop.xlane.xlu0 %4049  ;;  %v4200_v7 = vmul.f32 1.442695, %v4146_v31 }
 0x754   :  { %v12067_v46 = vpop.eup %8499  ;;  %8507 = vpow2.f32 %v4218_v53  ;;  %v4144_v1 = vsub.f32 %v11869_v33, %v4050_v37  ;;  %7372 = vmatprep.mubr.msk.f32.mxu0 %vm2211_vm3, %v12063_v61 }
 0x755   :  { %v4220_v5 = vmul.f32 1.442695, %v4156_v51  ;;  %4286 = vadd.xlane.f32.xlu1 %v4285_v47  ;;  %7373 = vmatmul.mubr.msk.f32.vlgmr.msra.gmra.mrb[86].mxu0 %vm2211_vm3, %v12067_v46  ;;  %v1469_v47 = vld [vmem:[%s12808_s4 + $0x18] sm:$0xff] }
 0x756   :  { %v8502_v32 = vpop.eup %8501  ;;  %v4196_v57 = vmul.f32 1.442695, %v4144_v1  ;;  %v4062_v41 = vpop.xlane.xlu1 %4061  ;;  %v1468_v1 = vld [vmem:[%s12808_s4 + $0x10] sm:$0xff] }
 0x757   :  { %8509 = vpow2.f32 %v4220_v5  ;;  %v4148_v44 = vsub.f32 %v11876_v19, %v4062_v41  ;;  %7337 = vmatprep.mubr.msk.f32.mxu1 %vm2211_vm3, %v8502_v32  ;;  %v4059_v33 = vpop.xlane.xlu0 %4058  ;;  %v4282_v40 = vsel %vm2211_vm3, %v8502_v32, 0.0 }
 0x758   :  { %8511 = vpow2.f32 %v4196_v57  ;;  %v4147_v27 = vsub.f32 %v11881_v38, %v4059_v33  ;;  %7338 = vmatmul.mubr.msk.f32.vlgmr.msra.gmra.mrb[124].mxu1 %vm2211_vm3, %v8496_v3  ;;  %4283 = vadd.xlane.f32.xlu0 %v4282_v40  ;;  %v7958_v57 = vpack.c.bf16 %v1469_v47, %v1468_v1 }
 0x759   :  { %v12081_v21 = vpop.eup %8503  ;;  %7941 = vmatpush3.bf16.msra.mxu1 %v11692_v0  ;;  %8513 = vpow2.f32 %v4200_v7  ;;  %v4204_v35 = vmul.f32 1.442695, %v4148_v44 }
 0x75a   :  { %v8506_v12 = vpop.eup %8505  ;;  %v4202_v19 = vmul.f32 1.442695, %v4147_v27  ;;  %7375 = vmatprep.mubr.msk.f32.mxu0 %vm2211_vm3, %v12081_v21  ;;  %7943 = vmatprep.subr.bf16.mxu1 %v7942_v60  ;;  %v4092_v45 = vpop.xlane.xlu1 %4091 }
 0x75b   :  { %v4158_v54 = vsub.f32 %v11889_v50, %v4092_v45  ;;  %v4089_v38 = vpop.xlane.xlu0 %4088  ;;  %v4291_v36 = vsel %vm2211_vm3, %v8506_v12, 0.0  ;;  %7959 = vmatprep.subr.bf16.mxu0 %v7958_v57 }
 0x75c   :  { %8515 = vpow2.f32 %v4202_v19  ;;  %v4157_v24 = vsub.f32 %v11894_v29, %v4089_v38  ;;  %4292 = vadd.xlane.f32.xlu1 %v4291_v36  ;;  %7961 = vmatpush3.bf16.msra.mxu0 %v7958_v57 }
 0x75d   :  { %v4224_v20 = vmul.f32 1.442695, %v4158_v54  ;;  %7945 = vmatpush3.bf16.msra.mxu1 %v7942_v60  ;;  %8517 = vpow2.f32 %v4204_v35 }
 0x75e   :  { %v12089_v0 = vpop.eup %8507  ;;  %v4222_v59 = vmul.f32 1.442695, %v4157_v24  ;;  %v4068_v16 = vpop.xlane.xlu1 %4067 }
 0x75f   :  { %v4150_v39 = vsub.f32 %v11905_v63, %v4068_v16  ;;  %v4065_v18 = vpop.xlane.xlu0 %4064  ;;  %7376 = vmatmul.mubr.msk.f32.gmra.mrb[88].mxu0 %vm2211_vm3, %v12089_v0 }
 0x760   :  { %8519 = vpow2.f32 %v4222_v59  ;;  %v4149_v50 = vsub.f32 %v11914_v30, %v4065_v18 }
 0x761   :  { %v12095_v8 = vpop.eup %8509  ;;  %8521 = vpow2.f32 %v4224_v20  ;;  %v4208_v29 = vmul.f32 1.442695, %v4150_v39  ;;  %v4312_v39 = vsel %vm2211_vm3, %v12063_v61, 0.0 }
 0x762   :  { %v8512_v28 = vpop.eup %8511  ;;  %v4206_v56 = vmul.f32 1.442695, %v4149_v50  ;;  %7378 = vmatprep.mubr.msk.f32.mxu0 %vm2211_vm3, %v12095_v8  ;;  %v4098_v3 = vpop.xlane.xlu1 %4097 }
 0x763   :  { %8523 = vpow2.f32 %v4208_v29  ;;  %v4160_v63 = vsub.f32 %v11928_v25, %v4098_v3  ;;  %7340 = vmatprep.mubr.msk.f32.mxu1 %vm2211_vm3, %v8512_v28  ;;  %v4095_v31 = vpop.xlane.xlu0 %4094  ;;  %v4288_v53 = vsel %vm2211_vm3, %v8512_v28, 0.0  ;;  %v8514_v49 = vpop.eup %8513  ;;  %v4318_v3 = vsel %vm2211_vm3, %v12081_v21, 0.0 }
 0x764   :  { %8525 = vpow2.f32 %v4206_v56  ;;  %v4159_v30 = vsub.f32 %v11935_v55, %v4095_v31  ;;  %7341 = vmatmul.mubr.msk.f32.gmra.mrb[126].mxu1 %vm2211_vm3, %v8506_v12  ;;  %4289 = vadd.xlane.f32.xlu0 %v4288_v53  ;;  %v4294_v7 = vsel %vm2211_vm3, %v8514_v49, 0.0 }
 0x765   :  { %v4228_v10 = vmul.f32 1.442695, %v4160_v63  ;;  %7343 = vmatprep.mubr.msk.f32.mxu1 %vm2211_vm3, %v8514_v49 }
 0x766   :  { %v8516_v51 = vpop.eup %8515  ;;  %v4226_v37 = vmul.f32 1.442695, %v4159_v30  ;;  %v4324_v30 = vsel %vm2211_vm3, %v12095_v8, 0.0 }
 0x767   :  { %v4071_v14 = vpop.xlane.xlu0 %4070  ;;  %v4297_v25 = vsel %vm2211_vm3, %v8516_v51, 0.0  ;;  %v8518_v55 = vpop.eup %8517 }
 0x768   :  { %8527 = vpow2.f32 %v4226_v37  ;;  %v4151_v5 = vsub.f32 %v11950_v17, %v4071_v14  ;;  %v4104_v32 = vpop.xlane.xlu1 %4103  ;;  %4298 = vadd.xlane.f32.xlu1 %v4297_v25  ;;  %7344 = vmatmul.mubr.msk.f32.gmra.mrb[128].mxu1 %vm2211_vm3, %v8516_v51  ;;  %v4300_v19 = vsel %vm2211_vm3, %v8518_v55, 0.0  ;;  %v4321_v51 = vsel %vm2211_vm3, %v12089_v0, 0.0 }
 0x769   :  { %8529 = vpow2.f32 %v4228_v10  ;;  %v4162_v41 = vsub.f32 %v11960_v22, %v4104_v32  ;;  %4295 = vadd.xlane.f32.xlu0 %v4294_v7  ;;  %7346 = vmatprep.mubr.msk.f32.mxu1 %vm2211_vm3, %v8518_v55 }
 0x76a   :  { %v12117_v44 = vpop.eup %8519  ;;  %v4210_v33 = vmul.f32 1.442695, %v4151_v5 }
 0x76b   :  { %v8522_v40 = vpop.eup %8521  ;;  %v4232_v27 = vmul.f32 1.442695, %v4162_v41  ;;  %v8302_v17 = vpop.permute.xlu0 %8301  ;;  %7379 = vmatmul.mubr.msk.f32.gmra.mrb[90].mxu0 %vm2211_vm3, %v12117_v44  ;;  %v4327_v37 = vsel %vm2211_vm3, %v12117_v44, 0.0 }
 0x76c   :  { %8531 = vpow2.f32 %v4210_v33  ;;  %v8304_v60 = vunpack.i.h.bf16 %v8302_v17  ;;  %v8303_v12 = vunpack.i.l.bf16 %v8302_v17  ;;  %v4110_v35 = vpop.xlane.xlu1 %4109  ;;  %7381 = vmatprep.mubr.msk.f32.mxu0 %vm2211_vm3, %v8522_v40 }
 0x76d   :  { %v8524_v22 = vpop.eup %8523  ;;  %8533 = vpow2.f32 %v4232_v27  ;;  %4301 = vadd.xlane.f32.xlu0 %v4300_v19  ;;  %v4164_v29 = vsub.f32 %v11973_v43, %v4110_v35  ;;  %v4315_v43 = vsel %vm2211_vm3, %v12067_v46, 0.0 }
 0x76e   :  { %v8526_v45 = vpop.eup %8525  ;;  %v7946_v54 = vpack.c.bf16 %v8304_v60, %v8303_v12  ;;  %v4306_v24 = vsel %vm2211_vm3, %v8524_v22, 0.0 }
 0x76f   :  { %7347 = vmatmul.mubr.msk.f32.gmra.mrb[130].mxu1 %vm2211_vm3, %v8526_v45  ;;  %v4303_v38 = vsel %vm2211_vm3, %v8526_v45, 0.0  ;;  %v4236_v31 = vmul.f32 1.442695, %v4164_v29 }
 0x770   :  { %v4116_v36 = vpop.xlane.xlu1 %4115  ;;  %7947 = vmatprep.subr.bf16.mxu1 %v7946_v54  ;;  %4304 = vadd.xlane.f32.xlu1 %v4303_v38 }
 0x771   :  { %7349 = vmatprep.mubr.msk.f32.mxu1 %vm2211_vm3, %v8524_v22  ;;  %4307 = vadd.xlane.f32.xlu0 %v4306_v24  ;;  %v4166_v53 = vsub.f32 %v11980_v34, %v4116_v36  ;;  %8535 = vpow2.f32 %v4236_v31  ;;  %v4330_v34 = vsel %vm2211_vm3, %v8522_v40, 0.0 }
 0x772   :  { %v8528_v20 = vpop.eup %8527  ;;  %7949 = vmatpush3.bf16.msra.mxu1 %v7946_v54 }
 0x773   :  { %v8530_v59 = vpop.eup %8529  ;;  %7382 = vmatmul.mubr.msk.f32.gmra.mrb[92].mxu0 %vm2211_vm3, %v8528_v20  ;;  %v4240_v21 = vmul.f32 1.442695, %v4166_v53  ;;  %v4333_v14 = vsel %vm2211_vm3, %v8528_v20, 0.0 }
 0x774   :  { %v4122_v16 = vpop.xlane.xlu1 %4121  ;;  %7384 = vmatprep.mubr.msk.f32.mxu0 %vm2211_vm3, %v8530_v59  ;;  %v4336_v8 = vsel %vm2211_vm3, %v8530_v59, 0.0 }
 0x775   :  { %4313 = vadd.xlane.f32.xlu0 %v4312_v39  ;;  %v4168_v10 = vsub.f32 %v11985_v15, %v4122_v16  ;;  %8537 = vpow2.f32 %v4240_v21 }
 0x776   :  { %v8532_v18 = vpop.eup %8531 }
 0x777   :  { %v8534_v50 = vpop.eup %8533  ;;  %7350 = vmatmul.mubr.msk.f32.gmra.mrb[132].mxu1 %vm2211_vm3, %v8532_v18  ;;  %v4309_v28 = vsel %vm2211_vm3, %v8532_v18, 0.0  ;;  %v4244_v46 = vmul.f32 1.442695, %v4168_v10 }
 0x778   :  { %v8307_v56 = vpop.permute.xlu1 %8306  ;;  %4310 = vadd.xlane.f32.xlu1 %v4309_v28  ;;  %7407 = vmatprep.mubr.msk.f32.mxu1 %vm2211_vm3, %v8534_v50  ;;  %v4342_v15 = vsel %vm2211_vm3, %v8534_v50, 0.0 }
 0x779   :  { %v8309_v63 = vunpack.i.h.bf16 %v8307_v56  ;;  %v8308_v61 = vunpack.i.l.bf16 %v8307_v56  ;;  %4319 = vadd.xlane.f32.xlu0 %v4318_v3  ;;  %8539 = vpow2.f32 %v4244_v46 }
 0x77b   :  { %v7950_v49 = vpack.c.bf16 %v8309_v63, %v8308_v61  ;;  %v12151_v0 = vpop.eup %8535 }
 0x77c   :  { %4316 = vadd.xlane.f32.xlu1 %v4315_v43  ;;  %v4348_v25 = vsel %vm2211_vm3, %v12151_v0, 0.0 }
 0x77d   :  { %4325 = vadd.xlane.f32.xlu0 %v4324_v30  ;;  %7951 = vmatprep.subr.bf16.mxu1 %v7950_v49 }
 0x77e   :  { %7953 = vmatpush3.bf16.msra.mxu1 %v7950_v49 }
 0x77f   :  { %v12155_v1 = vpop.eup %8537 }
 0x780   :  { %4322 = vadd.xlane.f32.xlu1 %v4321_v51  ;;  %v4354_v47 = vsel %vm2211_vm3, %v12155_v1, 0.0 }
 0x781   :  { %4331 = vadd.xlane.f32.xlu0 %v4330_v34 }
 0x783   :  { %v12159_v55 = vpop.eup %8539 }
 0x784   :  { %4328 = vadd.xlane.f32.xlu1 %v4327_v37  ;;  %v4360_v5 = vsel %vm2211_vm3, %v12159_v55, 0.0 }
 0x785   :  { %4337 = vadd.xlane.f32.xlu0 %v4336_v8  ;;  %v13248_v8 = vld [vmem:[#allocation97_spill] sm:$0xff] }
 0x788   :  { %4334 = vadd.xlane.f32.xlu1 %v4333_v14  ;;  %v2452_v14 = vsel %vm2211_vm3, %v13248_v8, 0.0 }
 0x789   :  { %4343 = vadd.xlane.f32.xlu0 %v4342_v15 }
 0x78d   :  { %4349 = vadd.xlane.f32.xlu0 %v4348_v25 }
 0x791   :  { %4355 = vadd.xlane.f32.xlu0 %v4354_v47  ;;  %v13249_v47 = vld [vmem:[#allocation26_spill] sm:$0xff] }
 0x795   :  { %4361 = vadd.xlane.f32.xlu0 %v4360_v5 }
 0x79c   :  { %v4101_v32 = vpop.xlane.xlu0 %4100 }
 0x79d   :  { %v4161_v7 = vsub.f32 %v12001_v42, %v4101_v32 }
 0x79f   :  { %v4230_v57 = vmul.f32 1.442695, %v4161_v7  ;;  %v13250_v7 = vld [vmem:[#allocation98_spill] sm:$0xff] }
 0x7a0   :  { %v4107_v41 = vpop.xlane.xlu0 %4106 }
 0x7a1   :  { %8541 = vpow2.f32 %v4230_v57  ;;  %v12164_v44 = vpop.f32.mrb[76].mxu0  ;;  %v4163_v33 = vsub.f32 %v12004_v23, %v4107_v41  ;;  %v13251_v57 = vld [vmem:[#allocation99_spill] sm:$0xff] }
 0x7a2   :  { %v12167_v40 = vpop.f32.mrb[77].mxu0  ;;  %v2464_v41 = vsel %vm2211_vm3, %v13251_v57, 0.0 }
 0x7a3   :  { %v4234_v27 = vmul.f32 1.442695, %v4163_v33  ;;  %v13252_v33 = vld [vmem:[#allocation32_spill] sm:$0xff] }
 0x7a4   :  { %v4113_v17 = vpop.xlane.xlu0 %4112 }
 0x7a5   :  { %8543 = vpow2.f32 %v4234_v27  ;;  %v12169_v60 = vpop.f32.mrb[78].mxu0  ;;  %v4165_v12 = vsub.f32 %v12009_v52, %v4113_v17  ;;  %v13253_v17 = vld [vmem:[#allocation100_spill] sm:$0xff] }
 0x7a6   :  { %v12172_v35 = vpop.f32.mrb[79].mxu0 }
 0x7a7   :  { %v4238_v19 = vmul.f32 1.442695, %v4165_v12  ;;  %v2470_v12 = vsel %vm2211_vm3, %v13253_v17, 0.0 }
 0x7a8   :  { %v4119_v42 = vpop.xlane.xlu0 %4118 }
 0x7a9   :  { %8545 = vpow2.f32 %v4238_v19  ;;  %v4167_v22 = vsub.f32 %v12014_v26, %v4119_v42  ;;  %v4128_v45 = vpop.xlane.xlu1 %4127  ;;  %v13254_v19 = vld [vmem:[#allocation35_spill] sm:$0xff] }
 0x7aa   :  { %v4170_v54 = vsub.f32 %v12019_v48, %v4128_v45  ;;  %v2467_v42 = vsel %vm2211_vm3, %v13254_v19, 0.0  ;;  %v13269_v19 = vld [vmem:[#allocation111_spill] sm:$0xff] }
 0x7ab   :  { %v8542_v23 = vpop.eup %8541  ;;  %v4242_v38 = vmul.f32 1.442695, %v4167_v22  ;;  %v13255_v22 = vld [vmem:[#allocation43_spill] sm:$0xff] }
 0x7ac   :  { %v4248_v36 = vmul.f32 1.442695, %v4170_v54  ;;  %v4125_v24 = vpop.xlane.xlu0 %4124  ;;  %7385 = vmatmul.mubr.msk.f32.gmra.mrb[94].mxu0 %vm2211_vm3, %v8542_v23  ;;  %v4339_v20 = vsel %vm2211_vm3, %v8542_v23, 0.0  ;;  %v2476_v45 = vsel %vm2211_vm3, %v13255_v22, 0.0  ;;  %v13256_v23 = vld [vmem:[#allocation39_spill] sm:$0xff] }
 0x7ad   :  { %8547 = vpow2.f32 %v4242_v38  ;;  %v12178_v52 = vpop.f32.mrb[80].mxu0  ;;  %v4169_v59 = vsub.f32 %v12022_v62, %v4125_v24  ;;  %v8312_v16 = vpop.permute.xlu1 %8311  ;;  %4340 = vadd.xlane.f32.xlu1 %v4339_v20  ;;  %v2473_v38 = vsel %vm2211_vm3, %v13256_v23, 0.0  ;;  %v1467_v24 = vld [vmem:[%s12808_s4 + $0x8] sm:$0xff]  ;;  %v2482_v20 = vsel %vm2211_vm3, %v11116_v6, 0.0  ;;  %v13271_v23 = vld [vmem:[#allocation82_spill] sm:$0xff] }
 0x7ae   :  { %8549 = vpow2.f32 %v4248_v36  ;;  %v12181_v26 = vpop.f32.mrb[81].mxu0  ;;  %v8314_v39 = vunpack.i.h.bf16 %v8312_v16  ;;  %v8313_v48 = vunpack.i.l.bf16 %v8312_v16  ;;  %v1466_v36 = vld [vmem:[%s12808_s4] sm:$0xff]  ;;  %v13257_v16 = vld [vmem:[#allocation101_spill] sm:$0xff] }
 0x7af   :  { %v8544_v18 = vpop.eup %8543  ;;  %v4246_v50 = vmul.f32 1.442695, %v4169_v59  ;;  %v7962_v59 = vpack.c.bf16 %v1467_v24, %v1466_v36 }
 0x7b0   :  { %v7954_v29 = vpack.c.bf16 %v8314_v39, %v8313_v48  ;;  %v4131_v28 = vpop.xlane.xlu0 %4130  ;;  %v4345_v56 = vsel %vm2211_vm3, %v8544_v18, 0.0  ;;  %v2479_v39 = vsel %vm2211_vm3, %v13257_v16, 0.0 }
 0x7b1   :  { %8551 = vpow2.f32 %v4246_v50  ;;  %v12184_v3 = vpop.f32.mrb[82].mxu0  ;;  %v4171_v63 = vsub.f32 %v12029_v4, %v4131_v28  ;;  %4346 = vadd.xlane.f32.xlu1 %v4345_v56  ;;  %7963 = vmatprep.subr.bf16.mxu0 %v7962_v59  ;;  %v2485_v50 = vsel %vm2211_vm3, %v11118_v11, 0.0  ;;  %v2491_v28 = vsel %vm2211_vm3, %v11131_v13, 0.0  ;;  %v13260_v13 = vld [vmem:[#allocation55_spill] sm:$0xff] }
 0x7b2   :  { %v12187_v62 = vpop.f32.mrb[83].mxu0  ;;  %7955 = vmatprep.subr.bf16.mxu1 %v7954_v29  ;;  %v2500_v56 = vsel %vm2211_vm3, %v11148_v58, 0.0  ;;  %v13261_v58 = vld [vmem:[#allocation103_spill] sm:$0xff] }
 0x7b3   :  { %v8546_v61 = vpop.eup %8545  ;;  %v4250_v31 = vmul.f32 1.442695, %v4171_v63  ;;  %7957 = vmatpush3.bf16.msra.mxu1 %v7954_v29  ;;  %v2494_v29 = vsel %vm2211_vm3, %v11138_v9, 0.0  ;;  %v13258_v63 = vld [vmem:[#allocation51_spill] sm:$0xff]  ;;  %v13259_v9 = vld [vmem:[#allocation58_spill] sm:$0xff] }
 0x7b4   :  { %v4254_v53 = vpop.xlane.xlu0 %4253  ;;  %v4351_v49 = vsel %vm2211_vm3, %v8546_v61, 0.0  ;;  %v2497_v11 = vsel %vm2211_vm3, %v13258_v63, 0.0  ;;  %v13280_v63 = vld [vmem:[#allocation88_spill] sm:$0xff] }
 0x7b5   :  { %8553 = vpow2.f32 %v4250_v31  ;;  %4352 = vadd.xlane.f32.xlu1 %v4351_v49  ;;  %v2506_v31 = vsel %vm2211_vm3, %v13259_v9, 0.0  ;;  %v2512_v49 = vsel %vm2211_vm3, %v13261_v58, 0.0 }
 0x7b6   :  { %8555 = vrcp.f32 %v4254_v53  ;;  %7408 = vmatmul.mubr.msk.f32.vlgmr.msra.gmra.mrb[134].mxu1 %vm2211_vm3, %v8544_v18  ;;  %v2488_v18 = vsel %vm2211_vm3, %v11126_v2, 0.0  ;;  %v2503_v53 = vsel %vm2211_vm3, %v13260_v13, 0.0 }
 0x7b7   :  { %v8548_v43 = vpop.eup %8547  ;;  %7410 = vmatprep.mubr.msk.f32.mxu1 %vm2211_vm3, %v12151_v0 }
 0x7b8   :  { %v8550_v4 = vpop.eup %8549  ;;  %v4357_v30 = vsel %vm2211_vm3, %v8548_v43, 0.0  ;;  %v4263_v37 = vpop.xlane.xlu0 %4262 }
 0x7b9   :  { %v12194_v21 = vpop.f32.mrb[84].mxu0  ;;  %4358 = vadd.xlane.f32.xlu1 %v4357_v30  ;;  %v4366_v10 = vsel %vm2211_vm3, %v8550_v4, 0.0  ;;  %v13262_v30 = vld [vmem:[#allocation102_spill] sm:$0xff] }
 0x7ba   :  { %v12197_v51 = vpop.f32.mrb[85].mxu0  ;;  %4367 = vadd.xlane.f32.xlu0 %v4366_v10  ;;  %7411 = vmatmul.mubr.msk.f32.gmra.mrb[136].mxu1 %vm2211_vm3, %v8546_v61  ;;  %v2509_v10 = vsel %vm2211_vm3, %v13262_v30, 0.0 }
 0x7bb   :  { %v8552_v34 = vpop.eup %8551  ;;  %7413 = vmatprep.mubr.msk.f32.mxu1 %vm2211_vm3, %v12155_v1  ;;  %v2458_v1 = vsel %vm2211_vm3, %v13249_v47, 0.0 }
 0x7bc   :  { %v4363_v46 = vsel %vm2211_vm3, %v8552_v34, 0.0  ;;  %v4260_v32 = vpop.xlane.xlu0 %4259 }
 0x7bd   :  { %4364 = vadd.xlane.f32.xlu1 %v4363_v46  ;;  %8557 = vrcp.f32 %v4260_v32  ;;  %v13263_v46 = vld [vmem:[#allocation105_spill] sm:$0xff] }
 0x7be   :  { %2453 = vadd.xlane.f32.xlu0 %v2452_v14  ;;  %7414 = vmatmul.mubr.msk.f32.gmra.mrb[138].mxu1 %vm2211_vm3, %v8548_v43 }
 0x7bf   :  { %v8554_v15 = vpop.eup %8553  ;;  %7416 = vmatprep.mubr.msk.f32.mxu1 %vm2211_vm3, %v12159_v55  ;;  %v2455_v55 = vsel %vm2211_vm3, %v13250_v7, 0.0 }
 0x7c0   :  { %v8556_v0 = vpop.eup %8555  ;;  %v4369_v25 = vsel %vm2211_vm3, %v8554_v15, 0.0  ;;  %v4269_v27 = vpop.xlane.xlu0 %4268 }
 0x7c1   :  { %4370 = vadd.xlane.f32.xlu1 %v4369_v25  ;;  %v5152_v5 = vmul.f32 %v8556_v0, %v12167_v40  ;;  %v2461_v40 = vsel %vm2211_vm3, %v13252_v33, 0.0  ;;  %v13264_v25 = vld [vmem:[#allocation104_spill] sm:$0xff] }
 0x7c2   :  { %2459 = vadd.xlane.f32.xlu0 %v2458_v1  ;;  %7417 = vmatmul.mubr.msk.f32.gmra.mrb[140].mxu1 %vm2211_vm3, %v8552_v34  ;;  %v2515_v47 = vsel %vm2211_vm3, %v13264_v25, 0.0  ;;  %v13265_v1 = vld [vmem:[#allocation107_spill] sm:$0xff] }
 0x7c3   :  { %7419 = vmatprep.mubr.msk.f32.mxu1 %vm2211_vm3, %v8550_v4  ;;  %7426 = vmatprep.mubr.msk.f32.mxu0 %vm1500_vm1, %v5152_v5  ;;  %v2524_v5 = vsel %vm2211_vm3, %v13265_v1, 0.0 }
 0x7c4   :  { %v4266_v54 = vpop.xlane.xlu0 %4265 }
 0x7c5   :  { %2456 = vadd.xlane.f32.xlu1 %v2455_v55  ;;  %v13266_v55 = vld [vmem:[#allocation106_spill] sm:$0xff] }
 0x7c6   :  { %2465 = vadd.xlane.f32.xlu0 %v2464_v41  ;;  %7420 = vmatmul.mubr.msk.f32.gmra.mrb[142].mxu1 %vm2211_vm3, %v8554_v15  ;;  %v2521_v57 = vsel %vm2211_vm3, %v13266_v55, 0.0  ;;  %v13267_v41 = vld [vmem:[#allocation109_spill] sm:$0xff] }
 0x7c7   :  { %v8558_v4 = vpop.eup %8557  ;;  %v2530_v33 = vsel %vm2211_vm3, %v13267_v41, 0.0 }
 0x7c8   :  { %v4275_v48 = vpop.xlane.xlu0 %4274  ;;  %v5154_v15 = vmul.f32 %v8558_v4, %v12172_v35 }
 0x7c9   :  { %2462 = vadd.xlane.f32.xlu1 %v2461_v40 }
 0x7ca   :  { %2471 = vadd.xlane.f32.xlu0 %v2470_v12 }
 0x7cc   :  { %v4272_v6 = vpop.xlane.xlu0 %4271 }
 0x7cd   :  { %2468 = vadd.xlane.f32.xlu1 %v2467_v42  ;;  %v2536_v42 = vsel %vm2211_vm3, %v13269_v19, 0.0 }
 0x7ce   :  { %2477 = vadd.xlane.f32.xlu0 %v2476_v45 }
 0x7d0   :  { %v4281_v61 = vpop.xlane.xlu0 %4280 }
 0x7d1   :  { %2474 = vadd.xlane.f32.xlu1 %v2473_v38  ;;  %v2542_v38 = vsel %vm2211_vm3, %v13271_v23, 0.0 }
 0x7d2   :  { %2483 = vadd.xlane.f32.xlu0 %v2482_v20 }
 0x7d4   :  { %v4278_v43 = vpop.xlane.xlu0 %4277 }
 0x7d5   :  { %2480 = vadd.xlane.f32.xlu1 %v2479_v39  ;;  %v13275_v39 = vld [vmem:[#allocation70_spill] sm:$0xff] }
 0x7d6   :  { %2489 = vadd.xlane.f32.xlu0 %v2488_v18  ;;  %v13276_v18 = vld [vmem:[#allocation29_spill] sm:$0xff] }
 0x7d9   :  { %2486 = vadd.xlane.f32.xlu1 %v2485_v50  ;;  %v13277_v50 = vld [vmem:[#allocation19_spill] sm:$0xff] }
 0x7da   :  { %2495 = vadd.xlane.f32.xlu0 %v2494_v29  ;;  %v2560_v29 = vsel %vm2211_vm3, %v13277_v50, 0.0 }
 0x7dd   :  { %2492 = vadd.xlane.f32.xlu1 %v2491_v28 }
 0x7de   :  { %2501 = vadd.xlane.f32.xlu0 %v2500_v56  ;;  %v4257_v2 = vpop.xlane.xlu1 %4256  ;;  %v13279_v56 = vld [vmem:[#allocation71_spill] sm:$0xff] }
 0x7df   :  { %8559 = vrcp.f32 %v4257_v2  ;;  %v2566_v2 = vsel %vm2211_vm3, %v13279_v56, 0.0 }
 0x7e0   :  { %8561 = vrcp.f32 %v4263_v37  ;;  %v2518_v37 = vsel %vm2211_vm3, %v13263_v46, 0.0 }
 0x7e1   :  { %2498 = vadd.xlane.f32.xlu1 %v2497_v11  ;;  %8563 = vrcp.f32 %v4266_v54  ;;  %v2563_v11 = vsel %vm2211_vm3, %v13280_v63, 0.0 }
 0x7e2   :  { %2507 = vadd.xlane.f32.xlu0 %v2506_v31  ;;  %8565 = vrcp.f32 %v4269_v27 }
 0x7e3   :  { %8567 = vrcp.f32 %v4272_v6  ;;  %v13278_v6 = vld [vmem:[#allocation64_spill] sm:$0xff] }
 0x7e4   :  { %8569 = vrcp.f32 %v4275_v48  ;;  %v2554_v48 = vsel %vm2211_vm3, %v13275_v39, 0.0  ;;  %v2557_v28 = vsel %vm2211_vm3, %v13278_v6, 0.0 }
 0x7e5   :  { %2504 = vadd.xlane.f32.xlu1 %v2503_v53  ;;  %8571 = vrcp.f32 %v4278_v43  ;;  %v4284_v31 = vpop.xlane.xlu0 %4283  ;;  %v4287_v53 = vpop.xlane.xlu1 %4286 }
 0x7e6   :  { %2513 = vadd.xlane.f32.xlu0 %v2512_v49  ;;  %8573 = vrcp.f32 %v4281_v61  ;;  %v13281_v61 = vld [vmem:[#allocation66_spill] sm:$0xff] }
 0x7e7   :  { %v2569_v9 = vsel %vm2211_vm3, %v13281_v61, 0.0  ;;  %8575 = vrcp.f32 %v4284_v31 }
 0x7e8   :  { %8577 = vrcp.f32 %v4287_v53 }
 0x7e9   :  { %v8560_v34 = vpop.eup %8559  ;;  %2510 = vadd.xlane.f32.xlu1 %v2509_v10  ;;  %v4293_v49 = vpop.xlane.xlu1 %4292 }
 0x7ea   :  { %v5153_v8 = vmul.f32 %v8560_v34, %v12164_v44  ;;  %2519 = vadd.xlane.f32.xlu0 %v2518_v37  ;;  %v8562_v14 = vpop.eup %8561 }
 0x7eb   :  { %v8564_v0 = vpop.eup %8563  ;;  %v5155_v44 = vmul.f32 %v8562_v14, %v12169_v60 }
 0x7ec   :  { %7427 = vmatmul.mubr.msk.f32.vlgmr.msra.gmra.mrb[96].mxu0 %vm1500_vm1, %v5153_v8  ;;  %v8566_v32 = vpop.eup %8565  ;;  %v5156_v35 = vmul.f32 %v8564_v0, %v12181_v26  ;;  %v13268_v26 = vld [vmem:[#allocation108_spill] sm:$0xff] }
 0x7ed   :  { %7429 = vmatprep.mubr.msk.f32.mxu0 %vm1500_vm1, %v5154_v15  ;;  %2516 = vadd.xlane.f32.xlu1 %v2515_v47  ;;  %v8568_v7 = vpop.eup %8567  ;;  %v5157_v40 = vmul.f32 %v8566_v32, %v12178_v52  ;;  %v2527_v12 = vsel %vm2211_vm3, %v13268_v26, 0.0 }
 0x7ee   :  { %2525 = vadd.xlane.f32.xlu0 %v2524_v5  ;;  %7965 = vmatpush3.bf16.msra.mxu0 %v7962_v59  ;;  %v8570_v60 = vpop.eup %8569  ;;  %v5158_v27 = vmul.f32 %v8568_v7, %v12187_v62  ;;  %v13270_v62 = vld [vmem:[#allocation110_spill] sm:$0xff] }
 0x7ef   :  { %v8572_v17 = vpop.eup %8571  ;;  %v5159_v22 = vmul.f32 %v8570_v60, %v12184_v3  ;;  %v2533_v54 = vsel %vm2211_vm3, %v13270_v62, 0.0  ;;  %v13272_v3 = vld [vmem:[#allocation112_spill] sm:$0xff]  ;;  %v13274_v59 = vld [vmem:[#allocation90_spill] sm:$0xff] }
 0x7f0   :  { %7430 = vmatmul.mubr.msk.f32.gmra.mrb[98].mxu0 %vm1500_vm1, %v5155_v44  ;;  %v8574_v45 = vpop.eup %8573  ;;  %v5160_v52 = vmul.f32 %v8572_v17, %v12197_v51  ;;  %v2539_v24 = vsel %vm2211_vm3, %v13272_v3, 0.0  ;;  %v13273_v51 = vld [vmem:[#allocation20_spill] sm:$0xff]  ;;  %v2545_v16 = vsel %vm2211_vm3, %v13274_v59, 0.0 }
 0x7f1   :  { %7432 = vmatprep.mubr.msk.f32.mxu0 %vm1500_vm1, %v5156_v35  ;;  %2522 = vadd.xlane.f32.xlu1 %v2521_v57  ;;  %v5161_v36 = vmul.f32 %v8574_v45, %v12194_v21  ;;  %v2548_v20 = vsel %vm2211_vm3, %v13273_v51, 0.0  ;;  %v2551_v21 = vsel %vm2211_vm3, %v13276_v18, 0.0  ;;  %v4290_v13 = vpop.xlane.xlu0 %4289  ;;  %v8576_v14 = vpop.eup %8575 }
 0x7f2   :  { %2531 = vadd.xlane.f32.xlu0 %v2530_v33  ;;  %v8578_v0 = vpop.eup %8577  ;;  %8579 = vrcp.f32 %v4290_v13 }
 0x7f3   :  { %8581 = vrcp.f32 %v4293_v49 }
 0x7f4   :  { %7433 = vmatmul.mubr.msk.f32.gmra.mrb[100].mxu0 %vm1500_vm1, %v5157_v40 }
 0x7f5   :  { %7435 = vmatprep.mubr.msk.f32.mxu0 %vm1500_vm1, %v5158_v27  ;;  %2528 = vadd.xlane.f32.xlu1 %v2527_v12  ;;  %v4299_v4 = vpop.xlane.xlu1 %4298 }
 0x7f6   :  { %2537 = vadd.xlane.f32.xlu0 %v2536_v42  ;;  %v4296_v58 = vpop.xlane.xlu0 %4295 }
 0x7f7   :  { %8583 = vrcp.f32 %v4296_v58 }
 0x7f8   :  { %7436 = vmatmul.mubr.msk.f32.gmra.mrb[102].mxu0 %vm1500_vm1, %v5159_v22  ;;  %8585 = vrcp.f32 %v4299_v4 }
 0x7f9   :  { %7438 = vmatprep.mubr.msk.f32.mxu0 %vm1500_vm1, %v5160_v52  ;;  %2534 = vadd.xlane.f32.xlu1 %v2533_v54 }
 0x7fa   :  { %2543 = vadd.xlane.f32.xlu0 %v2542_v38  ;;  %v4302_v43 = vpop.xlane.xlu0 %4301 }
 0x7fb   :  { %8587 = vrcp.f32 %v4302_v43 }
 0x7fc   :  { %7439 = vmatmul.mubr.msk.f32.gmra.mrb[104].mxu0 %vm1500_vm1, %v5161_v36  ;;  %v8580_v57 = vpop.eup %8579 }
 0x7fd   :  { %2540 = vadd.xlane.f32.xlu1 %v2539_v24  ;;  %v4305_v30 = vpop.xlane.xlu1 %4304  ;;  %v8582_v33 = vpop.eup %8581 }
 0x7fe   :  { %2549 = vadd.xlane.f32.xlu0 %v2548_v20  ;;  %v4308_v10 = vpop.xlane.xlu0 %4307  ;;  %8589 = vrcp.f32 %v4305_v30 }
 0x7ff   :  { %8591 = vrcp.f32 %v4308_v10 }
 0x801   :  { %2546 = vadd.xlane.f32.xlu1 %v2545_v16  ;;  %v8584_v26 = vpop.eup %8583 }
 0x802   :  { %2555 = vadd.xlane.f32.xlu0 %v2554_v48  ;;  %v4314_v25 = vpop.xlane.xlu0 %4313  ;;  %v8586_v42 = vpop.eup %8585 }
 0x805   :  { %2552 = vadd.xlane.f32.xlu1 %v2551_v21  ;;  %v4311_v37 = vpop.xlane.xlu1 %4310  ;;  %v8588_v36 = vpop.eup %8587 }
 0x806   :  { %2561 = vadd.xlane.f32.xlu0 %v2560_v29  ;;  %v4320_v32 = vpop.xlane.xlu0 %4319  ;;  %8593 = vrcp.f32 %v4311_v37 }
 0x807   :  { %8595 = vrcp.f32 %v4314_v25 }
 0x808   :  { %v8590_v24 = vpop.eup %8589 }
 0x809   :  { %2558 = vadd.xlane.f32.xlu1 %v2557_v28  ;;  %v4317_v5 = vpop.xlane.xlu1 %4316  ;;  %v8592_v21 = vpop.eup %8591 }
 0x80a   :  { %2567 = vadd.xlane.f32.xlu0 %v2566_v2  ;;  %v4326_v40 = vpop.xlane.xlu0 %4325  ;;  %8597 = vrcp.f32 %v4317_v5 }
 0x80b   :  { %8599 = vrcp.f32 %v4320_v32 }
 0x80d   :  { %2564 = vadd.xlane.f32.xlu1 %v2563_v11  ;;  %v4323_v7 = vpop.xlane.xlu1 %4322 }
 0x80e   :  { %v4332_v62 = vpop.xlane.xlu0 %4331  ;;  %8601 = vrcp.f32 %v4323_v7 }
 0x80f   :  { %8603 = vrcp.f32 %v4326_v40 }
 0x810   :  { %v8594_v6 = vpop.eup %8593 }
 0x811   :  { %2570 = vadd.xlane.f32.xlu1 %v2569_v9  ;;  %v4329_v12 = vpop.xlane.xlu1 %4328  ;;  %v8596_v2 = vpop.eup %8595 }
 0x812   :  { %v4338_v20 = vpop.xlane.xlu0 %4337  ;;  %8605 = vrcp.f32 %v4329_v12 }
 0x813   :  { %8607 = vrcp.f32 %v4332_v62 }
 0x814   :  { %v8598_v61 = vpop.eup %8597 }
 0x815   :  { %v4335_v23 = vpop.xlane.xlu1 %4334  ;;  %v8600_v9 = vpop.eup %8599 }
 0x816   :  { %v4344_v50 = vpop.xlane.xlu0 %4343  ;;  %8609 = vrcp.f32 %v4335_v23 }
 0x817   :  { %8611 = vrcp.f32 %v4338_v20 }
 0x818   :  { %v8602_v49 = vpop.eup %8601 }
 0x819   :  { %v8604_v43 = vpop.eup %8603 }
 0x81a   :  { %v4350_v31 = vpop.xlane.xlu0 %4349 }
 0x81e   :  { %v4356_v10 = vpop.xlane.xlu0 %4355 }
 0x828   :  { %v12316_v34 = vpop.f32.mrb[86].mxu0 }
 0x829   :  { %v12318_v46 = vpop.f32.mrb[87].mxu0  ;;  %v5173_v13 = vmul.f32 %v8598_v61, %v12316_v34 }
 0x82a   :  { %v5172_v11 = vmul.f32 %v8596_v2, %v12318_v46  ;;  %v8606_v46 = vpop.eup %8605 }
 0x82b   :  { %v7339_v8 = vpop.f32.mrb[124].mxu1  ;;  %v8608_v34 = vpop.eup %8607 }
 0x82c   :  { %v4693_v15 = vpop.f32.mrb[125].mxu1  ;;  %v5163_v1 = vmul.f32 %v8578_v0, %v7339_v8  ;;  %v4362_v0 = vpop.xlane.xlu0 %4361 }
 0x82d   :  { %v5162_v47 = vmul.f32 %v8576_v14, %v4693_v15  ;;  %v8610_v15 = vpop.eup %8609 }
 0x82f   :  { %7441 = vmatprep.mubr.msk.f32.mxu0 %vm1500_vm1, %v5162_v47 }
 0x830   :  { %7442 = vmatmul.mubr.msk.f32.gmra.mrb[106].mxu0 %vm1500_vm1, %v5163_v1 }
 0x832   :  { %v12322_v44 = vpop.f32.mrb[88].mxu0 }
 0x833   :  { %v12324_v35 = vpop.f32.mrb[89].mxu0  ;;  %v5175_v4 = vmul.f32 %v8602_v49, %v12322_v44 }
 0x834   :  { %v5174_v53 = vmul.f32 %v8600_v9, %v12324_v35 }
 0x837   :  { %v7342_v55 = vpop.f32.mrb[126].mxu1 }
 0x838   :  { %v4703_v41 = vpop.f32.mrb[127].mxu1  ;;  %v5165_v27 = vmul.f32 %v8582_v33, %v7342_v55 }
 0x839   :  { %v5164_v60 = vmul.f32 %v8580_v57, %v4703_v41 }
 0x83a   :  { %v4341_v16 = vpop.xlane.xlu1 %4340 }
 0x83b   :  { %v7345_v17 = vpop.f32.mrb[128].mxu1  ;;  %7444 = vmatprep.mubr.msk.f32.mxu0 %vm1500_vm1, %v5164_v60  ;;  %8613 = vrcp.f32 %v4341_v16 }
 0x83c   :  { %v4713_v19 = vpop.f32.mrb[129].mxu1  ;;  %7445 = vmatmul.mubr.msk.f32.gmra.mrb[108].mxu0 %vm1500_vm1, %v5165_v27  ;;  %v5167_v45 = vmul.f32 %v8586_v42, %v7345_v17  ;;  %v8612_v27 = vpop.eup %8611  ;;  %8615 = vrcp.f32 %v4344_v50 }
 0x83d   :  { %v5166_v22 = vmul.f32 %v8584_v26, %v4713_v19 }
 0x83e   :  { %v7380_v52 = vpop.f32.mrb[90].mxu0  ;;  %v4347_v28 = vpop.xlane.xlu1 %4346 }
 0x83f   :  { %v4898_v54 = vpop.f32.mrb[91].mxu0  ;;  %7447 = vmatprep.mubr.msk.f32.mxu0 %vm1500_vm1, %v5166_v22  ;;  %v5177_v8 = vmul.f32 %v8606_v46, %v7380_v52  ;;  %8617 = vrcp.f32 %v4347_v28 }
 0x840   :  { %7448 = vmatmul.mubr.msk.f32.gmra.mrb[110].mxu0 %vm1500_vm1, %v5167_v45  ;;  %v5176_v30 = vmul.f32 %v8604_v43, %v4898_v54  ;;  %8619 = vrcp.f32 %v4350_v31 }
 0x842   :  { %v7348_v38 = vpop.f32.mrb[130].mxu1  ;;  %v4353_v58 = vpop.xlane.xlu1 %4352 }
 0x843   :  { %v4723_v3 = vpop.f32.mrb[131].mxu1  ;;  %v5169_v59 = vmul.f32 %v8590_v24, %v7348_v38  ;;  %8621 = vrcp.f32 %v4353_v58 }
 0x844   :  { %v5168_v51 = vmul.f32 %v8588_v36, %v4723_v3  ;;  %8623 = vrcp.f32 %v4356_v10 }
 0x845   :  { %v8614_v26 = vpop.eup %8613 }
 0x846   :  { %v7383_v39 = vpop.f32.mrb[92].mxu0  ;;  %7450 = vmatprep.mubr.msk.f32.mxu0 %vm1500_vm1, %v5168_v51  ;;  %v4359_v37 = vpop.xlane.xlu1 %4358 }
 0x847   :  { %v4908_v48 = vpop.f32.mrb[93].mxu0  ;;  %7451 = vmatmul.mubr.msk.f32.gmra.mrb[112].mxu0 %vm1500_vm1, %v5169_v59  ;;  %v5179_v25 = vmul.f32 %v8610_v15, %v7383_v39  ;;  %v4368_v1 = vpop.xlane.xlu0 %4367  ;;  %8625 = vrcp.f32 %v4359_v37 }
 0x848   :  { %v5178_v14 = vmul.f32 %v8608_v34, %v4908_v48  ;;  %v8616_v62 = vpop.eup %8615  ;;  %8627 = vrcp.f32 %v4362_v0 }
 0x849   :  { %v8618_v23 = vpop.eup %8617 }
 0x84a   :  { %v7351_v18 = vpop.f32.mrb[132].mxu1  ;;  %v4365_v47 = vpop.xlane.xlu1 %4364 }
 0x84b   :  { %v4733_v29 = vpop.f32.mrb[133].mxu1  ;;  %v5171_v63 = vmul.f32 %v8594_v6, %v7351_v18  ;;  %v2454_v44 = vpop.xlane.xlu0 %2453  ;;  %8629 = vrcp.f32 %v4365_v47 }
 0x84c   :  { %v5170_v56 = vmul.f32 %v8592_v21, %v4733_v29  ;;  %v8620_v51 = vpop.eup %8619  ;;  %8631 = vrcp.f32 %v4368_v1 }
 0x84d   :  { %v8622_v16 = vpop.eup %8621  ;;  %8633 = vrcp.f32 %v2454_v44  ;;  %v13284_v44 = vld [vmem:[#allocation59_spill] sm:$0xff] }
 0x84e   :  { %7453 = vmatprep.mubr.msk.f32.mxu0 %vm1500_vm1, %v5170_v56  ;;  %v4371_v5 = vpop.xlane.xlu1 %4370  ;;  %v8624_v50 = vpop.eup %8623 }
 0x84f   :  { %7454 = vmatmul.mubr.msk.f32.gmra.mrb[114].mxu0 %vm1500_vm1, %v5171_v63  ;;  %v2460_v35 = vpop.xlane.xlu0 %2459  ;;  %8635 = vrcp.f32 %v4371_v5 }
 0x850   :  { %7456 = vmatprep.mubr.msk.f32.mxu0 %vm1500_vm1, %v5172_v11 }
 0x851   :  { %v8626_v6 = vpop.eup %8625 }
 0x852   :  { %v2457_v32 = vpop.xlane.xlu1 %2456  ;;  %v8628_v11 = vpop.eup %8627 }
 0x853   :  { %7457 = vmatmul.mubr.msk.f32.gmra.mrb[116].mxu0 %vm1500_vm1, %v5173_v13  ;;  %v12348_v55 = vpop.xlane.xlu0 %2465  ;;  %8637 = vrcp.f32 %v2457_v32 }
 0x854   :  { %7459 = vmatprep.mubr.msk.f32.mxu0 %vm1500_vm1, %v5174_v53  ;;  %8639 = vrcp.f32 %v2460_v35 }
 0x855   :  { %v8630_v9 = vpop.eup %8629 }
 0x856   :  { %v12346_v7 = vpop.xlane.xlu1 %2462  ;;  %v8632_v58 = vpop.eup %8631 }
 0x857   :  { %7460 = vmatmul.mubr.msk.f32.gmra.mrb[118].mxu0 %vm1500_vm1, %v5175_v4  ;;  %v12352_v41 = vpop.xlane.xlu0 %2471  ;;  %8641 = vrcp.f32 %v12346_v7  ;;  %v8634_v43 = vpop.eup %8633 }
 0x858   :  { %7462 = vmatprep.mubr.msk.f32.mxu0 %vm1500_vm1, %v5176_v30  ;;  %8643 = vrcp.f32 %v12348_v55  ;;  %v13285_v55 = vld [vmem:[#allocation65_spill] sm:$0xff] }
 0x859   :  { %v8636_v10 = vpop.eup %8635 }
 0x85a   :  { %v12350_v57 = vpop.xlane.xlu1 %2468 }
 0x85b   :  { %7463 = vmatmul.mubr.msk.f32.gmra.mrb[120].mxu0 %vm1500_vm1, %v5177_v8  ;;  %v12356_v40 = vpop.xlane.xlu0 %2477  ;;  %8645 = vrcp.f32 %v12350_v57 }
 0x85c   :  { %7465 = vmatprep.mubr.msk.f32.mxu0 %vm1500_vm1, %v5178_v14  ;;  %8647 = vrcp.f32 %v12352_v41  ;;  %v13282_v14 = vld [vmem:[#allocation79_spill] sm:$0xff] }
 0x85d   :  { %v8638_v34 = vpop.eup %8637  ;;  %v3192_v15 = vmul.f32 %v8634_v43, %v13282_v14 }
 0x85e   :  { %v12354_v33 = vpop.xlane.xlu1 %2474  ;;  %v8640_v0 = vpop.eup %8639 }
 0x85f   :  { %7466 = vmatmul.mubr.msk.f32.gmra.mrb[122].mxu0 %vm1500_vm1, %v5179_v25  ;;  %v12362_v22 = vpop.xlane.xlu0 %2483  ;;  %8649 = vrcp.f32 %v12354_v33  ;;  %v13283_v25 = vld [vmem:[#allocation63_spill] sm:$0xff]  ;;  %v3194_v32 = vmul.f32 %v8640_v0, %v13284_v44  ;;  %v13286_v33 = vld [vmem:[#allocation85_spill] sm:$0xff]  ;;  %v13300_v0 = vld [vmem:[#allocation40_spill] sm:$0xff] }
 0x860   :  { %v3193_v47 = vmul.f32 %v8638_v34, %v13283_v25  ;;  %8651 = vrcp.f32 %v12356_v40  ;;  %v13299_v34 = vld [vmem:[#allocation75_spill] sm:$0xff] }
 0x861   :  { %v8642_v5 = vpop.eup %8641 }
 0x862   :  { %v12358_v19 = vpop.xlane.xlu1 %2480  ;;  %v8644_v35 = vpop.eup %8643  ;;  %v3195_v57 = vmul.f32 %v8642_v5, %v13285_v55  ;;  %v13301_v5 = vld [vmem:[#allocation77_spill] sm:$0xff] }
 0x863   :  { %v12366_v38 = vpop.xlane.xlu0 %2489  ;;  %8653 = vrcp.f32 %v12358_v19 }
 0x864   :  { %8655 = vrcp.f32 %v12362_v22 }
 0x865   :  { %v8646_v41 = vpop.eup %8645 }
 0x866   :  { %v12364_v45 = vpop.xlane.xlu1 %2486  ;;  %v8648_v40 = vpop.eup %8647 }
 0x867   :  { %v12372_v18 = vpop.xlane.xlu0 %2495  ;;  %8657 = vrcp.f32 %v12364_v45 }
 0x868   :  { %8659 = vrcp.f32 %v12366_v38  ;;  %v13290_v38 = vld [vmem:[#allocation68_spill] sm:$0xff] }
 0x86a   :  { %v12369_v20 = vpop.xlane.xlu1 %2492 }
 0x86b   :  { %v2502_v31 = vpop.xlane.xlu0 %2501  ;;  %8661 = vrcp.f32 %v12369_v20 }
 0x86c   :  { %8663 = vrcp.f32 %v12372_v18 }
 0x86e   :  { %v12376_v56 = vpop.xlane.xlu1 %2498 }
 0x86f   :  { %v2508_v8 = vpop.xlane.xlu0 %2507  ;;  %8665 = vrcp.f32 %v12376_v56 }
 0x870   :  { %8667 = vrcp.f32 %v2502_v31  ;;  %v13296_v31 = vld [vmem:[#allocation92_spill] sm:$0xff] }
 0x872   :  { %v2505_v4 = vpop.xlane.xlu1 %2504 }
 0x873   :  { %v2514_v7 = vpop.xlane.xlu0 %2513  ;;  %8669 = vrcp.f32 %v2505_v4 }
 0x874   :  { %8671 = vrcp.f32 %v2508_v8 }
 0x876   :  { %v2511_v1 = vpop.xlane.xlu1 %2510 }
 0x877   :  { %v2520_v19 = vpop.xlane.xlu0 %2519  ;;  %8673 = vrcp.f32 %v2511_v1 }
 0x878   :  { %8675 = vrcp.f32 %v2514_v7 }
 0x87f   :  { %v7386_v60 = vpop.f32.mrb[94].mxu0 }
 0x880   :  { %v4918_v17 = vpop.f32.mrb[95].mxu0  ;;  %v5181_v42 = vmul.f32 %v8614_v26, %v7386_v60  ;;  %v3196_v60 = vmul.f32 %v8644_v35, %v13286_v33  ;;  %v13302_v35 = vld [vmem:[#allocation72_spill] sm:$0xff] }
 0x881   :  { %v5180_v12 = vmul.f32 %v8612_v27, %v4918_v17  ;;  %v2517_v27 = vpop.xlane.xlu1 %2516  ;;  %v13287_v17 = vld [vmem:[#allocation23_spill] sm:$0xff] }
 0x882   :  { %v3197_v26 = vmul.f32 %v8646_v41, %v13287_v17  ;;  %8677 = vrcp.f32 %v2517_v27  ;;  %v13303_v41 = vld [vmem:[#allocation80_spill] sm:$0xff] }
 0x883   :  { %7468 = vmatprep.mubr.msk.f32.mxu0 %vm1500_vm1, %v5180_v12  ;;  %v8650_v12 = vpop.eup %8649  ;;  %8679 = vrcp.f32 %v2520_v19 }
 0x884   :  { %7469 = vmatmul.mubr.msk.f32.gmra.mrb[124].mxu0 %vm1500_vm1, %v5181_v42  ;;  %v13288_v42 = vld [vmem:[#allocation52_spill] sm:$0xff] }
 0x885   :  { %v3198_v22 = vmul.f32 %v8648_v40, %v13288_v42  ;;  %v2523_v45 = vpop.xlane.xlu1 %2522  ;;  %v13304_v40 = vld [vmem:[#allocation74_spill] sm:$0xff] }
 0x886   :  { %8681 = vrcp.f32 %v2523_v45 }
 0x889   :  { %v7409_v52 = vpop.f32.mrb[134].mxu1  ;;  %v2529_v18 = vpop.xlane.xlu1 %2528 }
 0x88a   :  { %v5063_v54 = vpop.f32.mrb[135].mxu1  ;;  %v5183_v3 = vmul.f32 %v8618_v23, %v7409_v52  ;;  %v8652_v52 = vpop.eup %8651 }
 0x88b   :  { %v5182_v36 = vmul.f32 %v8616_v62, %v5063_v54  ;;  %v13289_v62 = vld [vmem:[#allocation62_spill] sm:$0xff]  ;;  %v8654_v23 = vpop.eup %8653 }
 0x88c   :  { %v3199_v54 = vmul.f32 %v8650_v12, %v13289_v62  ;;  %v13305_v12 = vld [vmem:[#allocation83_spill] sm:$0xff] }
 0x88d   :  { %v7412_v24 = vpop.f32.mrb[136].mxu1  ;;  %7471 = vmatprep.mubr.msk.f32.mxu0 %vm1500_vm1, %v5182_v36  ;;  %v3200_v36 = vmul.f32 %v8652_v52, %v13290_v38  ;;  %v13306_v52 = vld [vmem:[#allocation76_spill] sm:$0xff] }
 0x88e   :  { %v5073_v59 = vpop.f32.mrb[137].mxu1  ;;  %7472 = vmatmul.mubr.msk.f32.gmra.mrb[126].mxu0 %vm1500_vm1, %v5183_v3  ;;  %v5185_v48 = vmul.f32 %v8622_v16, %v7412_v24  ;;  %v8656_v3 = vpop.eup %8655  ;;  %v13292_v16 = vld [vmem:[#allocation89_spill] sm:$0xff] }
 0x88f   :  { %v5184_v39 = vmul.f32 %v8620_v51, %v5073_v59  ;;  %v2526_v24 = vpop.xlane.xlu0 %2525  ;;  %v13291_v51 = vld [vmem:[#allocation36_spill] sm:$0xff]  ;;  %v8658_v59 = vpop.eup %8657 }
 0x890   :  { %v3201_v20 = vmul.f32 %v8654_v23, %v13291_v51  ;;  %8683 = vrcp.f32 %v2526_v24  ;;  %v13307_v23 = vld [vmem:[#allocation86_spill] sm:$0xff] }
 0x891   :  { %v7415_v21 = vpop.f32.mrb[138].mxu1  ;;  %7474 = vmatprep.mubr.msk.f32.mxu0 %vm1500_vm1, %v5184_v39  ;;  %v3202_v39 = vmul.f32 %v8656_v3, %v13292_v16  ;;  %8685 = vrcp.f32 %v2529_v18  ;;  %v13308_v3 = vld [vmem:[#allocation2_spill] sm:$0xff] }
 0x892   :  { %v5083_v29 = vpop.f32.mrb[139].mxu1  ;;  %7475 = vmatmul.mubr.msk.f32.gmra.mrb[128].mxu0 %vm1500_vm1, %v5185_v48  ;;  %v5187_v2 = vmul.f32 %v8626_v6, %v7415_v21  ;;  %v8660_v48 = vpop.eup %8659  ;;  %v13293_v21 = vld [vmem:[#allocation96_spill] sm:$0xff] }
 0x893   :  { %v5186_v28 = vmul.f32 %v8624_v50, %v5083_v29  ;;  %v3203_v50 = vmul.f32 %v8658_v59, %v13293_v21  ;;  %v8662_v29 = vpop.eup %8661  ;;  %v2532_v6 = vpop.xlane.xlu0 %2531  ;;  %v13309_v59 = vld [vmem:[#allocation3_spill] sm:$0xff] }
 0x894   :  { %8687 = vrcp.f32 %v2532_v6 }
 0x895   :  { %v7418_v63 = vpop.f32.mrb[140].mxu1  ;;  %7477 = vmatprep.mubr.msk.f32.mxu0 %vm1500_vm1, %v5186_v28  ;;  %v13294_v28 = vld [vmem:[#allocation73_spill] sm:$0xff] }
 0x896   :  { %v5093_v61 = vpop.f32.mrb[141].mxu1  ;;  %7478 = vmatmul.mubr.msk.f32.gmra.mrb[130].mxu0 %vm1500_vm1, %v5187_v2  ;;  %v5189_v53 = vmul.f32 %v8630_v9, %v7418_v63  ;;  %v3204_v56 = vmul.f32 %v8660_v48, %v13294_v28  ;;  %v8664_v2 = vpop.eup %8663  ;;  %v13310_v48 = vld [vmem:[#allocation7_spill] sm:$0xff] }
 0x897   :  { %v5188_v13 = vmul.f32 %v8628_v11, %v5093_v61  ;;  %v2535_v63 = vpop.xlane.xlu1 %2534  ;;  %v13295_v11 = vld [vmem:[#allocation91_spill] sm:$0xff]  ;;  %v8666_v9 = vpop.eup %8665 }
 0x898   :  { %v3205_v61 = vmul.f32 %v8662_v29, %v13295_v11  ;;  %8689 = vrcp.f32 %v2535_v63  ;;  %v13311_v29 = vld [vmem:[#allocation78_spill] sm:$0xff] }
 0x899   :  { %v7421_v49 = vpop.f32.mrb[142].mxu1  ;;  %7480 = vmatprep.mubr.msk.f32.mxu0 %vm1500_vm1, %v5188_v13  ;;  %v3206_v13 = vmul.f32 %v8664_v2, %v13296_v31  ;;  %v13312_v2 = vld [vmem:[#allocation81_spill] sm:$0xff] }
 0x89a   :  { %v5103_v30 = vpop.f32.mrb[143].mxu1  ;;  %7481 = vmatmul.mubr.msk.f32.gmra.mrb[132].mxu0 %vm1500_vm1, %v5189_v53  ;;  %v5191_v37 = vmul.f32 %v8636_v10, %v7421_v49  ;;  %v8668_v53 = vpop.eup %8667  ;;  %v13297_v49 = vld [vmem:[#allocation67_spill] sm:$0xff] }
 0x89b   :  { %v5190_v46 = vmul.f32 %v8632_v58, %v5103_v30  ;;  %v2538_v58 = vpop.xlane.xlu0 %2537  ;;  %v3207_v43 = vmul.f32 %v8666_v9, %v13297_v49  ;;  %v8670_v4 = vpop.eup %8669  ;;  %v13298_v30 = vld [vmem:[#allocation69_spill] sm:$0xff]  ;;  %v13313_v9 = vld [vmem:[#allocation6_spill] sm:$0xff] }
 0x89c   :  { %v3208_v10 = vmul.f32 %v8668_v53, %v13298_v30  ;;  %v3209_v8 = vmul.f32 %v8670_v4, %v13299_v34  ;;  %8691 = vrcp.f32 %v2538_v58  ;;  %v13314_v53 = vld [vmem:[#allocation10_spill] sm:$0xff]  ;;  %v13317_v34 = vld [vmem:[#allocation84_spill] sm:$0xff] }
 0x89d   :  { %7483 = vmatprep.mubr.msk.f32.mxu0 %vm1500_vm1, %v5190_v46  ;;  %v8672_v46 = vpop.eup %8671 }
 0x89e   :  { %7484 = vmatmul.mubr.msk.f32.gmra.mrb[134].mxu0 %vm1500_vm1, %v5191_v37  ;;  %v2541_v37 = vpop.xlane.xlu1 %2540  ;;  %v8674_v14 = vpop.eup %8673  ;;  %v3210_v25 = vmul.f32 %v8672_v46, %v13300_v0 }
 0x89f   :  { %7490 = vmatprep.mubr.msk.f32.mxu0 %vm1500_vm1, %v3192_v15  ;;  %v2544_v15 = vpop.xlane.xlu0 %2543  ;;  %v3211_v44 = vmul.f32 %v8674_v14, %v13301_v5  ;;  %8693 = vrcp.f32 %v2541_v37 }
 0x8a0   :  { %8695 = vrcp.f32 %v2544_v15  ;;  %v13318_v15 = vld [vmem:[#allocation87_spill] sm:$0xff] }
 0x8a2   :  { %7491 = vmatmul.mubr.msk.f32.vlgmr.msra.gmra.mrb[96].mxu0 %vm1500_vm1, %v3193_v47  ;;  %v8676_v47 = vpop.eup %8675  ;;  %v2547_v1 = vpop.xlane.xlu1 %2546 }
 0x8a3   :  { %7493 = vmatprep.mubr.msk.f32.mxu0 %vm1500_vm1, %v3194_v32  ;;  %v8678_v32 = vpop.eup %8677  ;;  %v3212_v7 = vmul.f32 %v8676_v47, %v13302_v35  ;;  %8697 = vrcp.f32 %v2547_v1  ;;  %v13319_v47 = vld [vmem:[#allocation17_spill] sm:$0xff]  ;;  %v13321_v35 = vld [vmem:[#allocation14_spill] sm:$0xff] }
 0x8a4   :  { %v8680_v55 = vpop.eup %8679  ;;  %v3213_v33 = vmul.f32 %v8678_v32, %v13303_v41 }
 0x8a5   :  { %v3214_v27 = vmul.f32 %v8680_v55, %v13304_v40  ;;  %v12480_v55 = vld [vmem:[%s12809_s5] ss:$0 sm:$0xff]  ;;  %v8725_v40 = vld [vmem:[%s12802_s0 + $0x8] sm:$0xff] }
 0x8a6   :  { %7494 = vmatmul.mubr.msk.f32.gmra.mrb[98].mxu0 %vm1500_vm1, %v3195_v57  ;;  %v2550_v57 = vpop.xlane.xlu0 %2549 }
 0x8a7   :  { %7496 = vmatprep.mubr.msk.f32.mxu0 %vm1500_vm1, %v3196_v60  ;;  %v8682_v60 = vpop.eup %8681  ;;  %8699 = vrcp.f32 %v2550_v57 }
 0x8a8   :  { %v8684_v17 = vpop.eup %8683  ;;  %v3215_v19 = vmul.f32 %v8682_v60, %v13305_v12 }
 0x8a9   :  { %v8686_v42 = vpop.eup %8685  ;;  %v3216_v45 = vmul.f32 %v8684_v17, %v13306_v52  ;;  %v8726_v17 = vld [vmem:[%s12802_s0] sm:$0xff]  ;;  %v8727_v52 = vld [vmem:[%s12802_s0 + $0x18] sm:$0xff] }
 0x8aa   :  { %7497 = vmatmul.mubr.msk.f32.gmra.mrb[100].mxu0 %vm1500_vm1, %v3197_v26  ;;  %v2553_v26 = vpop.xlane.xlu1 %2552  ;;  %v8688_v62 = vpop.eup %8687  ;;  %v3217_v38 = vmul.f32 %v8686_v42, %v13307_v23 }
 0x8ab   :  { %7499 = vmatprep.mubr.msk.f32.mxu0 %vm1500_vm1, %v3198_v22  ;;  %v2556_v22 = vpop.xlane.xlu0 %2555  ;;  %v3218_v24 = vmul.f32 %v8688_v62, %v13308_v3  ;;  %8701 = vrcp.f32 %v2553_v26  ;;  %v8728_v62 = vld [vmem:[%s12802_s0 + $0x10] sm:$0xff] }
 0x8ac   :  { %8703 = vrcp.f32 %v2556_v22 }
 0x8ae   :  { %7500 = vmatmul.mubr.msk.f32.gmra.mrb[102].mxu0 %vm1500_vm1, %v3199_v54  ;;  %v2559_v54 = vpop.xlane.xlu1 %2558 }
 0x8af   :  { %7502 = vmatprep.mubr.msk.f32.mxu0 %vm1500_vm1, %v3200_v36  ;;  %v8690_v36 = vpop.eup %8689  ;;  %8705 = vrcp.f32 %v2559_v54 }
 0x8b0   :  { %v8692_v51 = vpop.eup %8691  ;;  %v3219_v16 = vmul.f32 %v8690_v36, %v13309_v59 }
 0x8b1   :  { %v3220_v18 = vmul.f32 %v8692_v51, %v13310_v48 }
 0x8b2   :  { %7503 = vmatmul.mubr.msk.f32.gmra.mrb[104].mxu0 %vm1500_vm1, %v3201_v20  ;;  %v2562_v20 = vpop.xlane.xlu0 %2561 }
 0x8b3   :  { %7505 = vmatprep.mubr.msk.f32.mxu0 %vm1500_vm1, %v3202_v39  ;;  %v8694_v39 = vpop.eup %8693  ;;  %8707 = vrcp.f32 %v2562_v20  ;;  %v8730_v20 = vld [vmem:[%s12802_s0 + $0x20] sm:$0xff] }
 0x8b4   :  { %v8696_v21 = vpop.eup %8695  ;;  %v3221_v6 = vmul.f32 %v8694_v39, %v13311_v29  ;;  %v8732_v29 = vld [vmem:[%s12802_s0 + $0x30] sm:$0xff] }
 0x8b5   :  { %v8698_v28 = vpop.eup %8697  ;;  %v3222_v63 = vmul.f32 %v8696_v21, %v13312_v2  ;;  %v8731_v21 = vld [vmem:[%s12802_s0 + $0x38] sm:$0xff] }
 0x8b6   :  { %7506 = vmatmul.mubr.msk.f32.gmra.mrb[106].mxu0 %vm1500_vm1, %v3203_v50  ;;  %v2565_v50 = vpop.xlane.xlu1 %2564  ;;  %v8700_v11 = vpop.eup %8699  ;;  %v3223_v31 = vmul.f32 %v8698_v28, %v13313_v9  ;;  %v8734_v9 = vld [vmem:[%s12802_s0 + $0x40] sm:$0xff] }
 0x8b7   :  { %7508 = vmatprep.mubr.msk.f32.mxu0 %vm1500_vm1, %v3204_v56  ;;  %v2568_v56 = vpop.xlane.xlu0 %2567  ;;  %8709 = vrcp.f32 %v2565_v50  ;;  %v3224_v58 = vmul.f32 %v8700_v11, %v13314_v53  ;;  %v8733_v11 = vld [vmem:[%s12802_s0 + $0x48] sm:$0xff] }
 0x8b8   :  { %8711 = vrcp.f32 %v2568_v56 }
 0x8ba   :  { %7509 = vmatmul.mubr.msk.f32.gmra.mrb[108].mxu0 %vm1500_vm1, %v3205_v61  ;;  %v2571_v61 = vpop.xlane.xlu1 %2570 }
 0x8bb   :  { %7511 = vmatprep.mubr.msk.f32.mxu0 %vm1500_vm1, %v3206_v13  ;;  %v8702_v13 = vpop.eup %8701  ;;  %8713 = vrcp.f32 %v2571_v61 }
 0x8bc   :  { %v8704_v49 = vpop.eup %8703 }
 0x8bd   :  { %v8706_v30 = vpop.eup %8705 }
 0x8be   :  { %7512 = vmatmul.mubr.msk.f32.gmra.mrb[110].mxu0 %vm1500_vm1, %v3207_v43  ;;  %v13315_v43 = vld [vmem:[#allocation11_spill] sm:$0xff]  ;;  %v8708_v37 = vpop.eup %8707 }
 0x8bf   :  { %7514 = vmatprep.mubr.msk.f32.mxu0 %vm1500_vm1, %v3208_v10  ;;  %v3225_v4 = vmul.f32 %v8702_v13, %v13315_v43  ;;  %v13316_v10 = vld [vmem:[#allocation18_spill] sm:$0xff]  ;;  %v3228_v0 = vmul.f32 %v8708_v37, %v13318_v15  ;;  %v8735_v43 = vld [vmem:[%s12802_s0 + $0x58] sm:$0xff] }
 0x8c0   :  { %v3226_v46 = vmul.f32 %v8704_v49, %v13316_v10 }
 0x8c1   :  { %v8710_v14 = vpop.eup %8709 }
 0x8c2   :  { %7515 = vmatmul.mubr.msk.f32.gmra.mrb[112].mxu0 %vm1500_vm1, %v3209_v8  ;;  %v3227_v8 = vmul.f32 %v8706_v30, %v13317_v34  ;;  %v3229_v1 = vmul.f32 %v8710_v14, %v13319_v47  ;;  %v8736_v30 = vld [vmem:[%s12802_s0 + $0x50] sm:$0xff]  ;;  %v8737_v14 = vld [vmem:[%s12802_s0 + $0x68] sm:$0xff] }
 0x8c3   :  { %7517 = vmatprep.mubr.msk.f32.mxu0 %vm1500_vm1, %v3210_v25  ;;  %v8712_v25 = vpop.eup %8711 }
 0x8c5   :  { %v8714_v5 = vpop.eup %8713 }
 0x8c6   :  { %7518 = vmatmul.mubr.msk.f32.gmra.mrb[114].mxu0 %vm1500_vm1, %v3211_v44  ;;  %v13320_v44 = vld [vmem:[#allocation28_spill] sm:$0xff] }
 0x8c7   :  { %7520 = vmatprep.mubr.msk.f32.mxu0 %vm1500_vm1, %v3212_v7  ;;  %v3230_v32 = vmul.f32 %v8712_v25, %v13320_v44  ;;  %v3231_v7 = vmul.f32 %v8714_v5, %v13321_v35 }
 0x8ca   :  { %7521 = vmatmul.mubr.msk.f32.gmra.mrb[116].mxu0 %vm1500_vm1, %v3213_v33 }
 0x8cb   :  { %7523 = vmatprep.mubr.msk.f32.mxu0 %vm1500_vm1, %v3214_v27 }
 0x8ce   :  { %7524 = vmatmul.mubr.msk.f32.gmra.mrb[118].mxu0 %vm1500_vm1, %v3215_v19 }
 0x8cf   :  { %7526 = vmatprep.mubr.msk.f32.mxu0 %vm1500_vm1, %v3216_v45 }
 0x8d2   :  { %7527 = vmatmul.mubr.msk.f32.gmra.mrb[120].mxu0 %vm1500_vm1, %v3217_v38 }
 0x8d3   :  { %7529 = vmatprep.mubr.msk.f32.mxu0 %vm1500_vm1, %v3218_v24  ;;  %v8729_v24 = vld [vmem:[%s12802_s0 + $0x28] sm:$0xff] }
 0x8d6   :  { %7530 = vmatmul.mubr.msk.f32.gmra.mrb[122].mxu0 %vm1500_vm1, %v3219_v16 }
 0x8d7   :  { %7532 = vmatprep.mubr.msk.f32.mxu0 %vm1500_vm1, %v3220_v18 }
 0x8da   :  { %7533 = vmatmul.mubr.msk.f32.gmra.mrb[124].mxu0 %vm1500_vm1, %v3221_v6 }
 0x8db   :  { %7535 = vmatprep.mubr.msk.f32.mxu0 %vm1500_vm1, %v3222_v63 }
 0x8de   :  { %7536 = vmatmul.mubr.msk.f32.gmra.mrb[126].mxu0 %vm1500_vm1, %v3223_v31 }
 0x8df   :  { %7538 = vmatprep.mubr.msk.f32.mxu0 %vm1500_vm1, %v3224_v58 }
 0x8e2   :  { %7539 = vmatmul.mubr.msk.f32.gmra.mrb[128].mxu0 %vm1500_vm1, %v3225_v4 }
 0x8e3   :  { %7541 = vmatprep.mubr.msk.f32.mxu0 %vm1500_vm1, %v3226_v46 }
 0x8e6   :  { %7542 = vmatmul.mubr.msk.f32.gmra.mrb[130].mxu0 %vm1500_vm1, %v3227_v8 }
 0x8e7   :  { %7544 = vmatprep.mubr.msk.f32.mxu0 %vm1500_vm1, %v3228_v0  ;;  %v8738_v0 = vld [vmem:[%s12802_s0 + $0x60] sm:$0xff] }
 0x8ea   :  { %7545 = vmatmul.mubr.msk.f32.gmra.mrb[132].mxu0 %vm1500_vm1, %v3229_v1 }
 0x8eb   :  { %7547 = vmatprep.mubr.msk.f32.mxu0 %vm1500_vm1, %v3230_v32  ;;  %v8739_v32 = vld [vmem:[%s12802_s0 + $0x78] sm:$0xff] }
 0x8ee   :  { %7548 = vmatmul.mubr.msk.f32.gmra.mrb[134].mxu0 %vm1500_vm1, %v3231_v7  ;;  %v8740_v7 = vld [vmem:[%s12802_s0 + $0x70] sm:$0xff] }
 0x975   :  { %v7492_v57 = vpop.f32.mrb[96].mxu0 }
 0x976   :  { %v5970_v41 = vadd.f32 %v7492_v57, %v12480_v55  ;;  %v5763_v33 = vpop.f32.mrb[97].mxu0 }
 0x977   :  { %v5969_v60 = vadd.f32 %v12480_v55, %v5763_v33 }
 0x978   :  { %v6010_v27 = vadd.f32 %v8725_v40, %v5970_v41 }
 0x979   :  { %v6009_v26 = vadd.f32 %v8726_v17, %v5969_v60  ;;  %v7495_v12 = vpop.f32.mrb[98].mxu0 }
 0x97a   :  { %6050 = vst.msk [vmem:[%s12810_s8 + $0x8] sm:$0xff] %vm73_vm0, %v6010_v27  ;;  %v5972_v19 = vadd.f32 %v7495_v12, %v12480_v55  ;;  %v5773_v42 = vpop.f32.mrb[99].mxu0  ;;  %v8741_v27 = vld [vmem:[%s12802_s0 + $0x88] sm:$0xff] }
 0x97b   :  { %6049 = vst.msk [vmem:[%s12810_s8] sm:$0xff] %vm73_vm0, %v6009_v26  ;;  %v5971_v22 = vadd.f32 %v12480_v55, %v5773_v42  ;;  %v8742_v26 = vld [vmem:[%s12802_s0 + $0x80] sm:$0xff] }
 0x97c   :  { %v6012_v45 = vadd.f32 %v8727_v52, %v5972_v19 }
 0x97d   :  { %v6011_v54 = vadd.f32 %v8728_v62, %v5971_v22  ;;  %v7498_v23 = vpop.f32.mrb[100].mxu0 }
 0x97e   :  { %6052 = vst.msk [vmem:[%s12810_s8 + $0x18] sm:$0xff] %vm73_vm0, %v6012_v45  ;;  %v5974_v38 = vadd.f32 %v7498_v23, %v12480_v55  ;;  %v5783_v36 = vpop.f32.mrb[101].mxu0  ;;  %v8743_v45 = vld [vmem:[%s12802_s0 + $0x98] sm:$0xff] }
 0x97f   :  { %6051 = vst.msk [vmem:[%s12810_s8 + $0x10] sm:$0xff] %vm73_vm0, %v6011_v54  ;;  %v5973_v3 = vadd.f32 %v12480_v55, %v5783_v36  ;;  %v8744_v54 = vld [vmem:[%s12802_s0 + $0x90] sm:$0xff] }
 0x980   :  { %v6014_v51 = vadd.f32 %v8729_v24, %v5974_v38 }
 0x981   :  { %v6013_v59 = vadd.f32 %v8730_v20, %v5973_v3  ;;  %v7501_v16 = vpop.f32.mrb[102].mxu0 }
 0x982   :  { %6054 = vst.msk [vmem:[%s12810_s8 + $0x28] sm:$0xff] %vm73_vm0, %v6014_v51  ;;  %v5976_v39 = vadd.f32 %v7501_v16, %v12480_v55  ;;  %v5793_v48 = vpop.f32.mrb[103].mxu0  ;;  %v8745_v51 = vld [vmem:[%s12802_s0 + $0xa8] sm:$0xff] }
 0x983   :  { %6053 = vst.msk [vmem:[%s12810_s8 + $0x20] sm:$0xff] %vm73_vm0, %v6013_v59  ;;  %v5975_v18 = vadd.f32 %v12480_v55, %v5793_v48  ;;  %v8746_v59 = vld [vmem:[%s12802_s0 + $0xa0] sm:$0xff] }
 0x984   :  { %v6016_v50 = vadd.f32 %v8731_v21, %v5976_v39 }
 0x985   :  { %v6015_v6 = vadd.f32 %v8732_v29, %v5975_v18  ;;  %v7504_v28 = vpop.f32.mrb[104].mxu0 }
 0x986   :  { %6056 = vst.msk [vmem:[%s12810_s8 + $0x38] sm:$0xff] %vm73_vm0, %v6016_v50  ;;  %v5978_v56 = vadd.f32 %v7504_v28, %v12480_v55  ;;  %v5803_v2 = vpop.f32.mrb[105].mxu0  ;;  %v8747_v50 = vld [vmem:[%s12802_s0 + $0xb8] sm:$0xff] }
 0x987   :  { %6055 = vst.msk [vmem:[%s12810_s8 + $0x30] sm:$0xff] %vm73_vm0, %v6015_v6  ;;  %v5977_v63 = vadd.f32 %v12480_v55, %v5803_v2  ;;  %v8748_v6 = vld [vmem:[%s12802_s0 + $0xb0] sm:$0xff] }
 0x988   :  { %v6018_v61 = vadd.f32 %v8733_v11, %v5978_v56 }
 0x989   :  { %v6017_v31 = vadd.f32 %v8734_v9, %v5977_v63  ;;  %v7507_v13 = vpop.f32.mrb[106].mxu0 }
 0x98a   :  { %6058 = vst.msk [vmem:[%s12810_s8 + $0x48] sm:$0xff] %vm73_vm0, %v6018_v61  ;;  %v5980_v53 = vadd.f32 %v7507_v13, %v12480_v55  ;;  %v5813_v58 = vpop.f32.mrb[107].mxu0  ;;  %v8749_v61 = vld [vmem:[%s12802_s0 + $0xc8] sm:$0xff] }
 0x98b   :  { %6057 = vst.msk [vmem:[%s12810_s8 + $0x40] sm:$0xff] %vm73_vm0, %v6017_v31  ;;  %v5979_v49 = vadd.f32 %v12480_v55, %v5813_v58  ;;  %v8750_v31 = vld [vmem:[%s12802_s0 + $0xc0] sm:$0xff] }
 0x98c   :  { %v6020_v4 = vadd.f32 %v8735_v43, %v5980_v53 }
 0x98d   :  { %v6019_v10 = vadd.f32 %v8736_v30, %v5979_v49  ;;  %v7510_v46 = vpop.f32.mrb[108].mxu0 }
 0x98e   :  { %6060 = vst.msk [vmem:[%s12810_s8 + $0x58] sm:$0xff] %vm73_vm0, %v6020_v4  ;;  %v5982_v37 = vadd.f32 %v7510_v46, %v12480_v55  ;;  %v5823_v34 = vpop.f32.mrb[109].mxu0  ;;  %v8751_v4 = vld [vmem:[%s12802_s0 + $0xd8] sm:$0xff] }
 0x98f   :  { %6059 = vst.msk [vmem:[%s12810_s8 + $0x50] sm:$0xff] %vm73_vm0, %v6019_v10  ;;  %v5981_v8 = vadd.f32 %v12480_v55, %v5823_v34  ;;  %v8752_v10 = vld [vmem:[%s12802_s0 + $0xd0] sm:$0xff] }
 0x990   :  { %v6022_v15 = vadd.f32 %v8737_v14, %v5982_v37 }
 0x991   :  { %v6021_v25 = vadd.f32 %v8738_v0, %v5981_v8  ;;  %v7513_v47 = vpop.f32.mrb[110].mxu0 }
 0x992   :  { %6062 = vst.msk [vmem:[%s12810_s8 + $0x68] sm:$0xff] %vm73_vm0, %v6022_v15  ;;  %v5984_v1 = vadd.f32 %v7513_v47, %v12480_v55  ;;  %v5833_v5 = vpop.f32.mrb[111].mxu0  ;;  %v8753_v15 = vld [vmem:[%s12802_s0 + $0xe8] sm:$0xff] }
 0x993   :  { %6061 = vst.msk [vmem:[%s12810_s8 + $0x60] sm:$0xff] %vm73_vm0, %v6021_v25  ;;  %v5983_v44 = vadd.f32 %v12480_v55, %v5833_v5  ;;  %v8754_v25 = vld [vmem:[%s12802_s0 + $0xe0] sm:$0xff] }
 0x994   :  { %v6024_v35 = vadd.f32 %v8739_v32, %v5984_v1 }
 0x995   :  { %v6023_v57 = vadd.f32 %v8740_v7, %v5983_v44  ;;  %v7516_v41 = vpop.f32.mrb[112].mxu0 }
 0x996   :  { %6064 = vst.msk [vmem:[%s12810_s8 + $0x78] sm:$0xff] %vm73_vm0, %v6024_v35  ;;  %v5986_v33 = vadd.f32 %v7516_v41, %v12480_v55  ;;  %v5843_v60 = vpop.f32.mrb[113].mxu0  ;;  %v8755_v35 = vld [vmem:[%s12802_s0 + $0xf8] sm:$0xff] }
 0x997   :  { %6063 = vst.msk [vmem:[%s12810_s8 + $0x70] sm:$0xff] %vm73_vm0, %v6023_v57  ;;  %v5985_v40 = vadd.f32 %v12480_v55, %v5843_v60  ;;  %v8756_v57 = vld [vmem:[%s12802_s0 + $0xf0] sm:$0xff] }
 0x998   :  { %v6026_v17 = vadd.f32 %v8741_v27, %v5986_v33 }
 0x999   :  { %v6025_v12 = vadd.f32 %v8742_v26, %v5985_v40  ;;  %v7519_v19 = vpop.f32.mrb[114].mxu0 }
 0x99a   :  { %6066 = vst.msk [vmem:[%s12810_s8 + $0x88] sm:$0xff] %vm73_vm0, %v6026_v17  ;;  %v5988_v42 = vadd.f32 %v7519_v19, %v12480_v55  ;;  %v5853_v22 = vpop.f32.mrb[115].mxu0  ;;  %v8757_v17 = vld [vmem:[%s12802_s0 + $0x108] sm:$0xff] }
 0x99b   :  { %6065 = vst.msk [vmem:[%s12810_s8 + $0x80] sm:$0xff] %vm73_vm0, %v6025_v12  ;;  %v5987_v52 = vadd.f32 %v12480_v55, %v5853_v22  ;;  %v8758_v12 = vld [vmem:[%s12802_s0 + $0x100] sm:$0xff] }
 0x99c   :  { %v6028_v62 = vadd.f32 %v8743_v45, %v5988_v42 }
 0x99d   :  { %v6027_v23 = vadd.f32 %v8744_v54, %v5987_v52  ;;  %v7522_v38 = vpop.f32.mrb[116].mxu0 }
 0x99e   :  { %6068 = vst.msk [vmem:[%s12810_s8 + $0x98] sm:$0xff] %vm73_vm0, %v6028_v62  ;;  %v5990_v36 = vadd.f32 %v7522_v38, %v12480_v55  ;;  %v5863_v3 = vpop.f32.mrb[117].mxu0  ;;  %v8759_v62 = vld [vmem:[%s12802_s0 + $0x118] sm:$0xff] }
 0x99f   :  { %6067 = vst.msk [vmem:[%s12810_s8 + $0x90] sm:$0xff] %vm73_vm0, %v6027_v23  ;;  %v5989_v24 = vadd.f32 %v12480_v55, %v5863_v3  ;;  %v8760_v23 = vld [vmem:[%s12802_s0 + $0x110] sm:$0xff] }
 0x9a0   :  { %v6030_v20 = vadd.f32 %v8745_v51, %v5990_v36 }
 0x9a1   :  { %v6029_v16 = vadd.f32 %v8746_v59, %v5989_v24  ;;  %v7525_v39 = vpop.f32.mrb[118].mxu0 }
 0x9a2   :  { %6070 = vst.msk [vmem:[%s12810_s8 + $0xa8] sm:$0xff] %vm73_vm0, %v6030_v20  ;;  %v5992_v48 = vadd.f32 %v7525_v39, %v12480_v55  ;;  %v5873_v18 = vpop.f32.mrb[119].mxu0  ;;  %v8761_v20 = vld [vmem:[%s12802_s0 + $0x128] sm:$0xff] }
 0x9a3   :  { %6069 = vst.msk [vmem:[%s12810_s8 + $0xa0] sm:$0xff] %vm73_vm0, %v6029_v16  ;;  %v5991_v21 = vadd.f32 %v12480_v55, %v5873_v18  ;;  %v8762_v16 = vld [vmem:[%s12802_s0 + $0x120] sm:$0xff] }
 0x9a4   :  { %v6032_v29 = vadd.f32 %v8747_v50, %v5992_v48 }
 0x9a5   :  { %v6031_v28 = vadd.f32 %v8748_v6, %v5991_v21  ;;  %v7528_v56 = vpop.f32.mrb[120].mxu0 }
 0x9a6   :  { %6072 = vst.msk [vmem:[%s12810_s8 + $0xb8] sm:$0xff] %vm73_vm0, %v6032_v29  ;;  %v5994_v2 = vadd.f32 %v7528_v56, %v12480_v55  ;;  %v5883_v63 = vpop.f32.mrb[121].mxu0  ;;  %v8763_v29 = vld [vmem:[%s12802_s0 + $0x138] sm:$0xff] }
 0x9a7   :  { %6071 = vst.msk [vmem:[%s12810_s8 + $0xb0] sm:$0xff] %vm73_vm0, %v6031_v28  ;;  %v5993_v11 = vadd.f32 %v12480_v55, %v5883_v63  ;;  %v8764_v28 = vld [vmem:[%s12802_s0 + $0x130] sm:$0xff] }
 0x9a8   :  { %v6034_v9 = vadd.f32 %v8749_v61, %v5994_v2 }
 0x9a9   :  { %v6033_v13 = vadd.f32 %v8750_v31, %v5993_v11  ;;  %v7531_v53 = vpop.f32.mrb[122].mxu0 }
 0x9aa   :  { %6074 = vst.msk [vmem:[%s12810_s8 + $0xc8] sm:$0xff] %vm73_vm0, %v6034_v9  ;;  %v5996_v58 = vadd.f32 %v7531_v53, %v12480_v55  ;;  %v5893_v49 = vpop.f32.mrb[123].mxu0 }
 0x9ab   :  { %6073 = vst.msk [vmem:[%s12810_s8 + $0xc0] sm:$0xff] %vm73_vm0, %v6033_v13  ;;  %v5995_v43 = vadd.f32 %v12480_v55, %v5893_v49 }
 0x9ac   :  { %v6036_v30 = vadd.f32 %v8751_v4, %v5996_v58 }
 0x9ad   :  { %v6035_v46 = vadd.f32 %v8752_v10, %v5995_v43  ;;  %v7534_v37 = vpop.f32.mrb[124].mxu0 }
 0x9ae   :  { %6076 = vst.msk [vmem:[%s12810_s8 + $0xd8] sm:$0xff] %vm73_vm0, %v6036_v30  ;;  %v5998_v34 = vadd.f32 %v7534_v37, %v12480_v55  ;;  %v5903_v8 = vpop.f32.mrb[125].mxu0 }
 0x9af   :  { %6075 = vst.msk [vmem:[%s12810_s8 + $0xd0] sm:$0xff] %vm73_vm0, %v6035_v46  ;;  %v5997_v14 = vadd.f32 %v12480_v55, %v5903_v8 }
 0x9b0   :  { %v6038_v0 = vadd.f32 %v8753_v15, %v5998_v34 }
 0x9b1   :  { %v6037_v47 = vadd.f32 %v8754_v25, %v5997_v14  ;;  %v7537_v1 = vpop.f32.mrb[126].mxu0 }
 0x9b2   :  { %6078 = vst.msk [vmem:[%s12810_s8 + $0xe8] sm:$0xff] %vm73_vm0, %v6038_v0  ;;  %v6000_v5 = vadd.f32 %v7537_v1, %v12480_v55  ;;  %v5913_v44 = vpop.f32.mrb[127].mxu0 }
 0x9b3   :  { %6077 = vst.msk [vmem:[%s12810_s8 + $0xe0] sm:$0xff] %vm73_vm0, %v6037_v47  ;;  %v5999_v32 = vadd.f32 %v12480_v55, %v5913_v44 }
 0x9b4   :  { %v6040_v7 = vadd.f32 %v8755_v35, %v6000_v5 }
 0x9b5   :  { %v6039_v41 = vadd.f32 %v8756_v57, %v5999_v32  ;;  %v7540_v33 = vpop.f32.mrb[128].mxu0 }
 0x9b6   :  { %6080 = vst.msk [vmem:[%s12810_s8 + $0xf8] sm:$0xff] %vm73_vm0, %v6040_v7  ;;  %v6002_v60 = vadd.f32 %v7540_v33, %v12480_v55  ;;  %v5923_v40 = vpop.f32.mrb[129].mxu0 }
 0x9b7   :  { %6079 = vst.msk [vmem:[%s12810_s8 + $0xf0] sm:$0xff] %vm73_vm0, %v6039_v41  ;;  %v6001_v27 = vadd.f32 %v12480_v55, %v5923_v40 }
 0x9b8   :  { %v6042_v26 = vadd.f32 %v8757_v17, %v6002_v60 }
 0x9b9   :  { %v6041_v19 = vadd.f32 %v8758_v12, %v6001_v27  ;;  %v7543_v42 = vpop.f32.mrb[130].mxu0 }
 0x9ba   :  { %6082 = vst.msk [vmem:[%s12810_s8 + $0x108] sm:$0xff] %vm73_vm0, %v6042_v26  ;;  %v6004_v22 = vadd.f32 %v7543_v42, %v12480_v55  ;;  %v5933_v52 = vpop.f32.mrb[131].mxu0 }
 0x9bb   :  { %6081 = vst.msk [vmem:[%s12810_s8 + $0x100] sm:$0xff] %vm73_vm0, %v6041_v19  ;;  %v6003_v45 = vadd.f32 %v12480_v55, %v5933_v52 }
 0x9bc   :  { %v6044_v54 = vadd.f32 %v8759_v62, %v6004_v22 }
 0x9bd   :  { %v6043_v38 = vadd.f32 %v8760_v23, %v6003_v45  ;;  %v7546_v36 = vpop.f32.mrb[132].mxu0 }
 0x9be   :  { %6084 = vst.msk [vmem:[%s12810_s8 + $0x118] sm:$0xff] %vm73_vm0, %v6044_v54  ;;  %v6006_v3 = vadd.f32 %v7546_v36, %v12480_v55  ;;  %v5943_v24 = vpop.f32.mrb[133].mxu0 }
 0x9bf   :  { %6083 = vst.msk [vmem:[%s12810_s8 + $0x110] sm:$0xff] %vm73_vm0, %v6043_v38  ;;  %v6005_v51 = vadd.f32 %v12480_v55, %v5943_v24 }
 0x9c0   :  { %v6046_v59 = vadd.f32 %v8761_v20, %v6006_v3 }
 0x9c1   :  { %v6045_v39 = vadd.f32 %v8762_v16, %v6005_v51  ;;  %v7549_v48 = vpop.f32.mrb[134].mxu0 }
 0x9c2   :  { %6086 = vst.msk [vmem:[%s12810_s8 + $0x128] sm:$0xff] %vm73_vm0, %v6046_v59  ;;  %v6008_v18 = vadd.f32 %v7549_v48, %v12480_v55  ;;  %v5953_v21 = vpop.f32.mrb[135].mxu0 }
 0x9c3   :  { %6085 = vst.msk [vmem:[%s12810_s8 + $0x120] sm:$0xff] %vm73_vm0, %v6045_v39  ;;  %v6007_v50 = vadd.f32 %v12480_v55, %v5953_v21 }
 0x9c4   :  { %v6048_v6 = vadd.f32 %v8763_v29, %v6008_v18 }
 0x9c5   :  { %v6047_v56 = vadd.f32 %v8764_v28, %v6007_v50 }
 0x9c6   :  { %6088 = vst.msk [vmem:[%s12810_s8 + $0x138] sm:$0xff] %vm73_vm0, %v6048_v6 }
 0x9c7   :  { %6087 = vst.msk [vmem:[%s12810_s8 + $0x130] sm:$0xff] %vm73_vm0, %v6047_v56 }

</bundles_post_ra>
